<compile_context>
chip_gen: v6e
topology: v6e:2x2x1
jax: 0.10.0
libtpu: 0.0.40
codegen_flags: <defaults>
</compile_context>

<pallas_src>
from functools import partial

import jax
import jax.numpy as jnp
from jax.experimental import pallas as pl
from jax.experimental.pallas import tpu as pltpu


def _round_up(x, m):
    return ((x + m - 1) // m) * m


def _mlp_decoder_kernel(num_layers, eps, *refs):
    """refs layout:
       x,
       [w_i, gamma_i, beta_i] * num_layers,
       hw_cat, hb_cat,                 (inputs)
       out                              (output, fused heads, lane-padded)
    """
    x_ref = refs[0]
    idx = 1
    layer_refs = []
    for _ in range(num_layers):
        layer_refs.append((refs[idx], refs[idx + 1], refs[idx + 2]))
        idx += 3
    hw_ref = refs[idx]
    hb_ref = refs[idx + 1]
    o_ref = refs[idx + 2]

    compute_dtype = x_ref.dtype
    x = x_ref[...]

    # trunk: Linear(no bias) -> LayerNorm(eps) -> SiLU, repeated num_layers times
    for (w_ref, g_ref, b_ref) in layer_refs:
        # MXU matmul in the input dtype (bf16 stays bf16), f32 accumulation.
        h = jnp.dot(x, w_ref[...], preferred_element_type=jnp.float32)
        # LayerNorm stats in f32: var = E[h^2] - E[h]^2 (single elementwise pass).
        mean = jnp.mean(h, axis=-1, keepdims=True)
        mean_sq = jnp.mean(h * h, axis=-1, keepdims=True)
        var = mean_sq - mean * mean
        inv = jax.lax.rsqrt(var + eps)
        h = (h - mean) * inv
        h = h * g_ref[...].astype(jnp.float32) + b_ref[...].astype(jnp.float32)
        # SiLU, then cast back to the MXU feed dtype for the next matmul.
        x = (h * jax.nn.sigmoid(h)).astype(compute_dtype)

    # fused heads: one lane-dense Linear with bias, single unmasked store.
    y = jnp.dot(x, hw_ref[...], preferred_element_type=jnp.float32)
    y = y + hb_ref[...].astype(jnp.float32)
    o_ref[...] = y.astype(o_ref.dtype)


def mlp_decoder_forward(latent_states, params, keys, output_dims, eps=1e-3,
                        block_rows=128):
    """params: dict with
         'trunk': list of (W_t (in,out), gamma (dense,), beta (dense,))
         'heads': list of (HW_t (dense,out_dim), hb (out_dim,))
       Returns {key: (B, out_dim) array}.
    """
    B, in_dim = latent_states.shape
    num_layers = len(params["trunk"])
    dense = params["trunk"][0][0].shape[1]
    dtype = latent_states.dtype

    # --- batch tiling: pad rows to a multiple of the row tile (>=128 for MXU M).
    # NOTE: on v6e/v7x with large batches, block_rows=256 amortizes per-step
    # overhead further; 128 is a safe default across v5e/v6e/v7x.
    TB = block_rows
    B_pad = _round_up(max(B, 1), TB)
    x_pad = latent_states
    if B_pad > B:
        x_pad = jnp.pad(latent_states, ((0, B_pad - B), (0, 0)))

    # --- fuse all heads into one lane-dense matmul (pad N to multiple of 128).
    hw_cat = jnp.concatenate([hw for (hw, hb) in params["heads"]], axis=1)
    hb_cat = jnp.concatenate([hb for (hw, hb) in params["heads"]], axis=0)
    N = hw_cat.shape[1]
    N_pad = _round_up(N, 128)
    if N_pad > N:
        hw_cat = jnp.pad(hw_cat, ((0, 0), (0, N_pad - N)))
        hb_cat = jnp.pad(hb_cat, ((0, N_pad - N),))
    hb_cat = hb_cat.reshape(1, N_pad)

    # --- pack inputs: x, trunk params, fused head params.
    inputs = [x_pad]
    for (w, g, b) in params["trunk"]:
        inputs += [w, g.reshape(1, -1), b.reshape(1, -1)]
    inputs += [hw_cat, hb_cat]

    # --- BlockSpecs: x/out tiled over the batch grid, params resident (const idx).
    in_specs = [pl.BlockSpec((TB, in_dim), lambda i: (i, 0))]
    for (w, g, b) in params["trunk"]:
        in_specs += [
            pl.BlockSpec(w.shape, lambda i: (0, 0)),
            pl.BlockSpec((1, g.shape[0]), lambda i: (0, 0)),
            pl.BlockSpec((1, b.shape[0]), lambda i: (0, 0)),
        ]
    in_specs += [
        pl.BlockSpec(hw_cat.shape, lambda i: (0, 0)),
        pl.BlockSpec(hb_cat.shape, lambda i: (0, 0)),
    ]
    out_spec = pl.BlockSpec((TB, N_pad), lambda i: (i, 0))

    # --- rough VMEM budget (resident params + double-buffered io tiles + acts).
    param_bytes = 0
    for a in inputs[1:]:
        param_bytes += a.size * a.dtype.itemsize
    io_tiles = 2 * TB * (in_dim + N_pad) * dtype.itemsize   # double-buffered x/out
    act_bytes = 3 * TB * max(dense, N_pad) * 4              # f32 intermediates
    vmem_limit = int(1.5 * (param_bytes + io_tiles + act_bytes))
    vmem_limit = max(32 * 1024 * 1024, min(vmem_limit, 96 * 1024 * 1024))

    grid = (pl.cdiv(B_pad, TB),)
    y_full = pl.pallas_call(
        partial(_mlp_decoder_kernel, num_layers, eps),
        out_shape=jax.ShapeDtypeStruct((B_pad, N_pad), dtype),
        grid=grid,
        in_specs=in_specs,
        out_specs=out_spec,
        compiler_params=pltpu.CompilerParams(
            dimension_semantics=("parallel",),
            vmem_limit_bytes=vmem_limit,
        ),
    )(*inputs)

    # --- drop batch padding and split the fused head output per key (free in XLA).
    y = y_full[:B]
    outs = {}
    off = 0
    for k, d in zip(keys, output_dims):
        outs[k] = y[:, off:off + d]
        off += d
    return outs


def init_params(key, latent_state_size, dense_units, mlp_layers, output_dims):
    """Deterministic synthetic init (shapes match the PyTorch module).
       Linear weights are stored pre-transposed as (in, out)."""
    trunk = []
    in_dim = latent_state_size
    for _ in range(mlp_layers):
        key, sub = jax.random.split(key)
        w = jax.random.normal(sub, (in_dim, dense_units), jnp.float32) * 0.05
        gamma = jnp.ones((dense_units,), jnp.float32)
        beta = jnp.zeros((dense_units,), jnp.float32)
        trunk.append((w, gamma, beta))
        in_dim = dense_units
    heads = []
    for d in output_dims:
        key, sub_w, sub_b = jax.random.split(key, 3)
        hw = jax.random.normal(sub_w, (dense_units, d), jnp.float32) * 0.05
        hb = jax.random.normal(sub_b, (d,), jnp.float32) * 0.01
        heads.append((hw, hb))
    return {"trunk": trunk, "heads": heads}


def reference_forward(latent_states, params, keys, eps=1e-3):
    """Pure-JAX reference (standard LayerNorm form) for sanity checking."""
    x = latent_states.astype(jnp.float32)
    for (w, g, b) in params["trunk"]:
        h = x @ w
        mean = jnp.mean(h, axis=-1, keepdims=True)
        var = jnp.mean((h - mean) ** 2, axis=-1, keepdims=True)
        h = (h - mean) * jax.lax.rsqrt(var + eps)
        h = h * g + b
        x = h * jax.nn.sigmoid(h)
    return {k: x @ hw + hb for k, (hw, hb) in zip(keys, params["heads"])}


if __name__ == "__main__":
    # Small, module-consistent shapes (dense kept 128-aligned per perf notes).
    keys = ("obs_a", "obs_b")
    output_dims = (16, 8)
    latent_state_size = 64
    dense_units = 128
    mlp_layers = 4
    batch = 8   # padded to the 128-row MXU tile inside the wrapper

    root = jax.random.PRNGKey(0)
    k_x, k_p = jax.random.split(root)
    latent = jax.random.normal(k_x, (batch, latent_state_size), jnp.float32)
    params = init_params(k_p, latent_state_size, dense_units, mlp_layers, output_dims)

    out = mlp_decoder_forward(latent, params, keys, output_dims)
    out = jax.tree_util.tree_map(jax.block_until_ready, out)

    # sanity check against pure-JAX reference
    ref = reference_forward(latent, params, keys)
    for k in keys:
        assert out[k].shape == ref[k].shape, (k, out[k].shape, ref[k].shape)
        assert jnp.allclose(out[k], ref[k], atol=1e-3, rtol=1e-3), k

    print("KERNEL_OK")
</pallas_src>

<mosaic_0001>
module attributes {stable_mosaic.version = 11 : i64} {
  func.func @_mlp_decoder_kernel(%arg0: i32, %arg1: memref<128x64xf32, #tpu.memory_space<vmem>>, %arg2: memref<64x128xf32, #tpu.memory_space<vmem>>, %arg3: memref<1x128xf32, #tpu.memory_space<vmem>>, %arg4: memref<1x128xf32, #tpu.memory_space<vmem>>, %arg5: memref<128x128xf32, #tpu.memory_space<vmem>>, %arg6: memref<1x128xf32, #tpu.memory_space<vmem>>, %arg7: memref<1x128xf32, #tpu.memory_space<vmem>>, %arg8: memref<128x128xf32, #tpu.memory_space<vmem>>, %arg9: memref<1x128xf32, #tpu.memory_space<vmem>>, %arg10: memref<1x128xf32, #tpu.memory_space<vmem>>, %arg11: memref<128x128xf32, #tpu.memory_space<vmem>>, %arg12: memref<1x128xf32, #tpu.memory_space<vmem>>, %arg13: memref<1x128xf32, #tpu.memory_space<vmem>>, %arg14: memref<128x128xf32, #tpu.memory_space<vmem>>, %arg15: memref<1x128xf32, #tpu.memory_space<vmem>>, %arg16: memref<128x128xf32, #tpu.memory_space<vmem>>) attributes {dimension_semantics = [#tpu.dimension_semantics<parallel>], iteration_bounds = array<i64: 1>, scalar_prefetch = 0 : i64, scratch_operands = 0 : i64, tpu.core_type = #tpu.core_type<tc>, window_params = [{transform_indices = @transform_0, window_bounds = array<i64: 128, 64>}, {pipeline_mode = #tpu.pipeline_mode<synchronous>, transform_indices = @transform_1, window_bounds = array<i64: 64, 128>}, {pipeline_mode = #tpu.pipeline_mode<synchronous>, transform_indices = @transform_2, window_bounds = array<i64: 1, 128>}, {pipeline_mode = #tpu.pipeline_mode<synchronous>, transform_indices = @transform_3, window_bounds = array<i64: 1, 128>}, {pipeline_mode = #tpu.pipeline_mode<synchronous>, transform_indices = @transform_4, window_bounds = array<i64: 128, 128>}, {pipeline_mode = #tpu.pipeline_mode<synchronous>, transform_indices = @transform_5, window_bounds = array<i64: 1, 128>}, {pipeline_mode = #tpu.pipeline_mode<synchronous>, transform_indices = @transform_6, window_bounds = array<i64: 1, 128>}, {pipeline_mode = #tpu.pipeline_mode<synchronous>, transform_indices = @transform_7, window_bounds = array<i64: 128, 128>}, {pipeline_mode = #tpu.pipeline_mode<synchronous>, transform_indices = @transform_8, window_bounds = array<i64: 1, 128>}, {pipeline_mode = #tpu.pipeline_mode<synchronous>, transform_indices = @transform_9, window_bounds = array<i64: 1, 128>}, {pipeline_mode = #tpu.pipeline_mode<synchronous>, transform_indices = @transform_10, window_bounds = array<i64: 128, 128>}, {pipeline_mode = #tpu.pipeline_mode<synchronous>, transform_indices = @transform_11, window_bounds = array<i64: 1, 128>}, {pipeline_mode = #tpu.pipeline_mode<synchronous>, transform_indices = @transform_12, window_bounds = array<i64: 1, 128>}, {pipeline_mode = #tpu.pipeline_mode<synchronous>, transform_indices = @transform_13, window_bounds = array<i64: 128, 128>}, {pipeline_mode = #tpu.pipeline_mode<synchronous>, transform_indices = @transform_14, window_bounds = array<i64: 1, 128>}, {transform_indices = @transform_15, window_bounds = array<i64: 128, 128>}]} {
    %c0 = arith.constant 0 : index
    %c0_0 = arith.constant 0 : index
    %0 = vector.load %arg1[%c0, %c0_0] : memref<128x64xf32, #tpu.memory_space<vmem>>, vector<128x64xf32>
    %c0_1 = arith.constant 0 : index
    %c0_2 = arith.constant 0 : index
    %1 = vector.load %arg2[%c0_1, %c0_2] : memref<64x128xf32, #tpu.memory_space<vmem>>, vector<64x128xf32>
    %cst = arith.constant dense<0.000000e+00> : vector<128x128xf32>
    %2 = tpu.matmul %0, %1, %cst {dimension_numbers = #tpu.dot_dimension_numbers<[1], [0], [0], [1], [0, 0, 1, 1], [], []>} : vector<128x64xf32>, vector<64x128xf32>, vector<128x128xf32> -> vector<128x128xf32>
    %cst_3 = arith.constant dense<0.000000e+00> : vector<128xf32>
    %3 = vector.multi_reduction <add>, %2, %cst_3 [1] : vector<128x128xf32> to vector<128xf32>
    %4 = vector.shape_cast %3 : vector<128xf32> to vector<128x1xf32>
    %cst_4 = arith.constant 1.280000e+02 : f32
    %5 = vector.broadcast %cst_4 : f32 to vector<128x1xf32>
    %6 = arith.divf %4, %5 : vector<128x1xf32>
    %7 = arith.mulf %2, %2 : vector<128x128xf32>
    %cst_5 = arith.constant dense<0.000000e+00> : vector<128xf32>
    %8 = vector.multi_reduction <add>, %7, %cst_5 [1] : vector<128x128xf32> to vector<128xf32>
    %9 = vector.shape_cast %8 : vector<128xf32> to vector<128x1xf32>
    %cst_6 = arith.constant 1.280000e+02 : f32
    %10 = vector.broadcast %cst_6 : f32 to vector<128x1xf32>
    %11 = arith.divf %9, %10 : vector<128x1xf32>
    %12 = arith.mulf %6, %6 : vector<128x1xf32>
    %13 = arith.subf %11, %12 : vector<128x1xf32>
    %cst_7 = arith.constant 1.000000e-03 : f32
    %14 = vector.broadcast %cst_7 : f32 to vector<128x1xf32>
    %15 = arith.addf %13, %14 : vector<128x1xf32>
    %16 = math.rsqrt %15 : vector<128x1xf32>
    %17 = vector.broadcast %6 : vector<128x1xf32> to vector<128x128xf32>
    %18 = arith.subf %2, %17 : vector<128x128xf32>
    %19 = vector.broadcast %16 : vector<128x1xf32> to vector<128x128xf32>
    %20 = arith.mulf %18, %19 : vector<128x128xf32>
    %c0_8 = arith.constant 0 : index
    %c0_9 = arith.constant 0 : index
    %21 = vector.load %arg3[%c0_8, %c0_9] : memref<1x128xf32, #tpu.memory_space<vmem>>, vector<1x128xf32>
    %22 = vector.broadcast %21 : vector<1x128xf32> to vector<128x128xf32>
    %23 = arith.mulf %20, %22 : vector<128x128xf32>
    %c0_10 = arith.constant 0 : index
    %c0_11 = arith.constant 0 : index
    %24 = vector.load %arg4[%c0_10, %c0_11] : memref<1x128xf32, #tpu.memory_space<vmem>>, vector<1x128xf32>
    %25 = vector.broadcast %24 : vector<1x128xf32> to vector<128x128xf32>
    %26 = arith.addf %23, %25 : vector<128x128xf32>
    %27 = arith.negf %26 : vector<128x128xf32>
    %28 = math.exp %27 : vector<128x128xf32>
    %cst_12 = arith.constant 1.000000e+00 : f32
    %29 = vector.broadcast %cst_12 : f32 to vector<128x128xf32>
    %30 = arith.addf %29, %28 : vector<128x128xf32>
    %31 = arith.divf %29, %30 : vector<128x128xf32>
    %32 = arith.mulf %26, %31 : vector<128x128xf32>
    %c0_13 = arith.constant 0 : index
    %c0_14 = arith.constant 0 : index
    %33 = vector.load %arg5[%c0_13, %c0_14] : memref<128x128xf32, #tpu.memory_space<vmem>>, vector<128x128xf32>
    %cst_15 = arith.constant dense<0.000000e+00> : vector<128x128xf32>
    %34 = tpu.matmul %32, %33, %cst_15 {dimension_numbers = #tpu.dot_dimension_numbers<[1], [0], [0], [1], [0, 0, 1, 1], [], []>} : vector<128x128xf32>, vector<128x128xf32>, vector<128x128xf32> -> vector<128x128xf32>
    %cst_16 = arith.constant dense<0.000000e+00> : vector<128xf32>
    %35 = vector.multi_reduction <add>, %34, %cst_16 [1] : vector<128x128xf32> to vector<128xf32>
    %36 = vector.shape_cast %35 : vector<128xf32> to vector<128x1xf32>
    %cst_17 = arith.constant 1.280000e+02 : f32
    %37 = vector.broadcast %cst_17 : f32 to vector<128x1xf32>
    %38 = arith.divf %36, %37 : vector<128x1xf32>
    %39 = arith.mulf %34, %34 : vector<128x128xf32>
    %cst_18 = arith.constant dense<0.000000e+00> : vector<128xf32>
    %40 = vector.multi_reduction <add>, %39, %cst_18 [1] : vector<128x128xf32> to vector<128xf32>
    %41 = vector.shape_cast %40 : vector<128xf32> to vector<128x1xf32>
    %cst_19 = arith.constant 1.280000e+02 : f32
    %42 = vector.broadcast %cst_19 : f32 to vector<128x1xf32>
    %43 = arith.divf %41, %42 : vector<128x1xf32>
    %44 = arith.mulf %38, %38 : vector<128x1xf32>
    %45 = arith.subf %43, %44 : vector<128x1xf32>
    %cst_20 = arith.constant 1.000000e-03 : f32
    %46 = vector.broadcast %cst_20 : f32 to vector<128x1xf32>
    %47 = arith.addf %45, %46 : vector<128x1xf32>
    %48 = math.rsqrt %47 : vector<128x1xf32>
    %49 = vector.broadcast %38 : vector<128x1xf32> to vector<128x128xf32>
    %50 = arith.subf %34, %49 : vector<128x128xf32>
    %51 = vector.broadcast %48 : vector<128x1xf32> to vector<128x128xf32>
    %52 = arith.mulf %50, %51 : vector<128x128xf32>
    %c0_21 = arith.constant 0 : index
    %c0_22 = arith.constant 0 : index
    %53 = vector.load %arg6[%c0_21, %c0_22] : memref<1x128xf32, #tpu.memory_space<vmem>>, vector<1x128xf32>
    %54 = vector.broadcast %53 : vector<1x128xf32> to vector<128x128xf32>
    %55 = arith.mulf %52, %54 : vector<128x128xf32>
    %c0_23 = arith.constant 0 : index
    %c0_24 = arith.constant 0 : index
    %56 = vector.load %arg7[%c0_23, %c0_24] : memref<1x128xf32, #tpu.memory_space<vmem>>, vector<1x128xf32>
    %57 = vector.broadcast %56 : vector<1x128xf32> to vector<128x128xf32>
    %58 = arith.addf %55, %57 : vector<128x128xf32>
    %59 = arith.negf %58 : vector<128x128xf32>
    %60 = math.exp %59 : vector<128x128xf32>
    %cst_25 = arith.constant 1.000000e+00 : f32
    %61 = vector.broadcast %cst_25 : f32 to vector<128x128xf32>
    %62 = arith.addf %61, %60 : vector<128x128xf32>
    %63 = arith.divf %61, %62 : vector<128x128xf32>
    %64 = arith.mulf %58, %63 : vector<128x128xf32>
    %c0_26 = arith.constant 0 : index
    %c0_27 = arith.constant 0 : index
    %65 = vector.load %arg8[%c0_26, %c0_27] : memref<128x128xf32, #tpu.memory_space<vmem>>, vector<128x128xf32>
    %cst_28 = arith.constant dense<0.000000e+00> : vector<128x128xf32>
    %66 = tpu.matmul %64, %65, %cst_28 {dimension_numbers = #tpu.dot_dimension_numbers<[1], [0], [0], [1], [0, 0, 1, 1], [], []>} : vector<128x128xf32>, vector<128x128xf32>, vector<128x128xf32> -> vector<128x128xf32>
    %cst_29 = arith.constant dense<0.000000e+00> : vector<128xf32>
    %67 = vector.multi_reduction <add>, %66, %cst_29 [1] : vector<128x128xf32> to vector<128xf32>
    %68 = vector.shape_cast %67 : vector<128xf32> to vector<128x1xf32>
    %cst_30 = arith.constant 1.280000e+02 : f32
    %69 = vector.broadcast %cst_30 : f32 to vector<128x1xf32>
    %70 = arith.divf %68, %69 : vector<128x1xf32>
    %71 = arith.mulf %66, %66 : vector<128x128xf32>
    %cst_31 = arith.constant dense<0.000000e+00> : vector<128xf32>
    %72 = vector.multi_reduction <add>, %71, %cst_31 [1] : vector<128x128xf32> to vector<128xf32>
    %73 = vector.shape_cast %72 : vector<128xf32> to vector<128x1xf32>
    %cst_32 = arith.constant 1.280000e+02 : f32
    %74 = vector.broadcast %cst_32 : f32 to vector<128x1xf32>
    %75 = arith.divf %73, %74 : vector<128x1xf32>
    %76 = arith.mulf %70, %70 : vector<128x1xf32>
    %77 = arith.subf %75, %76 : vector<128x1xf32>
    %cst_33 = arith.constant 1.000000e-03 : f32
    %78 = vector.broadcast %cst_33 : f32 to vector<128x1xf32>
    %79 = arith.addf %77, %78 : vector<128x1xf32>
    %80 = math.rsqrt %79 : vector<128x1xf32>
    %81 = vector.broadcast %70 : vector<128x1xf32> to vector<128x128xf32>
    %82 = arith.subf %66, %81 : vector<128x128xf32>
    %83 = vector.broadcast %80 : vector<128x1xf32> to vector<128x128xf32>
    %84 = arith.mulf %82, %83 : vector<128x128xf32>
    %c0_34 = arith.constant 0 : index
    %c0_35 = arith.constant 0 : index
    %85 = vector.load %arg9[%c0_34, %c0_35] : memref<1x128xf32, #tpu.memory_space<vmem>>, vector<1x128xf32>
    %86 = vector.broadcast %85 : vector<1x128xf32> to vector<128x128xf32>
    %87 = arith.mulf %84, %86 : vector<128x128xf32>
    %c0_36 = arith.constant 0 : index
    %c0_37 = arith.constant 0 : index
    %88 = vector.load %arg10[%c0_36, %c0_37] : memref<1x128xf32, #tpu.memory_space<vmem>>, vector<1x128xf32>
    %89 = vector.broadcast %88 : vector<1x128xf32> to vector<128x128xf32>
    %90 = arith.addf %87, %89 : vector<128x128xf32>
    %91 = arith.negf %90 : vector<128x128xf32>
    %92 = math.exp %91 : vector<128x128xf32>
    %cst_38 = arith.constant 1.000000e+00 : f32
    %93 = vector.broadcast %cst_38 : f32 to vector<128x128xf32>
    %94 = arith.addf %93, %92 : vector<128x128xf32>
    %95 = arith.divf %93, %94 : vector<128x128xf32>
    %96 = arith.mulf %90, %95 : vector<128x128xf32>
    %c0_39 = arith.constant 0 : index
    %c0_40 = arith.constant 0 : index
    %97 = vector.load %arg11[%c0_39, %c0_40] : memref<128x128xf32, #tpu.memory_space<vmem>>, vector<128x128xf32>
    %cst_41 = arith.constant dense<0.000000e+00> : vector<128x128xf32>
    %98 = tpu.matmul %96, %97, %cst_41 {dimension_numbers = #tpu.dot_dimension_numbers<[1], [0], [0], [1], [0, 0, 1, 1], [], []>} : vector<128x128xf32>, vector<128x128xf32>, vector<128x128xf32> -> vector<128x128xf32>
    %cst_42 = arith.constant dense<0.000000e+00> : vector<128xf32>
    %99 = vector.multi_reduction <add>, %98, %cst_42 [1] : vector<128x128xf32> to vector<128xf32>
    %100 = vector.shape_cast %99 : vector<128xf32> to vector<128x1xf32>
    %cst_43 = arith.constant 1.280000e+02 : f32
    %101 = vector.broadcast %cst_43 : f32 to vector<128x1xf32>
    %102 = arith.divf %100, %101 : vector<128x1xf32>
    %103 = arith.mulf %98, %98 : vector<128x128xf32>
    %cst_44 = arith.constant dense<0.000000e+00> : vector<128xf32>
    %104 = vector.multi_reduction <add>, %103, %cst_44 [1] : vector<128x128xf32> to vector<128xf32>
    %105 = vector.shape_cast %104 : vector<128xf32> to vector<128x1xf32>
    %cst_45 = arith.constant 1.280000e+02 : f32
    %106 = vector.broadcast %cst_45 : f32 to vector<128x1xf32>
    %107 = arith.divf %105, %106 : vector<128x1xf32>
    %108 = arith.mulf %102, %102 : vector<128x1xf32>
    %109 = arith.subf %107, %108 : vector<128x1xf32>
    %cst_46 = arith.constant 1.000000e-03 : f32
    %110 = vector.broadcast %cst_46 : f32 to vector<128x1xf32>
    %111 = arith.addf %109, %110 : vector<128x1xf32>
    %112 = math.rsqrt %111 : vector<128x1xf32>
    %113 = vector.broadcast %102 : vector<128x1xf32> to vector<128x128xf32>
    %114 = arith.subf %98, %113 : vector<128x128xf32>
    %115 = vector.broadcast %112 : vector<128x1xf32> to vector<128x128xf32>
    %116 = arith.mulf %114, %115 : vector<128x128xf32>
    %c0_47 = arith.constant 0 : index
    %c0_48 = arith.constant 0 : index
    %117 = vector.load %arg12[%c0_47, %c0_48] : memref<1x128xf32, #tpu.memory_space<vmem>>, vector<1x128xf32>
    %118 = vector.broadcast %117 : vector<1x128xf32> to vector<128x128xf32>
    %119 = arith.mulf %116, %118 : vector<128x128xf32>
    %c0_49 = arith.constant 0 : index
    %c0_50 = arith.constant 0 : index
    %120 = vector.load %arg13[%c0_49, %c0_50] : memref<1x128xf32, #tpu.memory_space<vmem>>, vector<1x128xf32>
    %121 = vector.broadcast %120 : vector<1x128xf32> to vector<128x128xf32>
    %122 = arith.addf %119, %121 : vector<128x128xf32>
    %123 = arith.negf %122 : vector<128x128xf32>
    %124 = math.exp %123 : vector<128x128xf32>
    %cst_51 = arith.constant 1.000000e+00 : f32
    %125 = vector.broadcast %cst_51 : f32 to vector<128x128xf32>
    %126 = arith.addf %125, %124 : vector<128x128xf32>
    %127 = arith.divf %125, %126 : vector<128x128xf32>
    %128 = arith.mulf %122, %127 : vector<128x128xf32>
    %c0_52 = arith.constant 0 : index
    %c0_53 = arith.constant 0 : index
    %129 = vector.load %arg14[%c0_52, %c0_53] : memref<128x128xf32, #tpu.memory_space<vmem>>, vector<128x128xf32>
    %cst_54 = arith.constant dense<0.000000e+00> : vector<128x128xf32>
    %130 = tpu.matmul %128, %129, %cst_54 {dimension_numbers = #tpu.dot_dimension_numbers<[1], [0], [0], [1], [0, 0, 1, 1], [], []>} : vector<128x128xf32>, vector<128x128xf32>, vector<128x128xf32> -> vector<128x128xf32>
    %c0_55 = arith.constant 0 : index
    %c0_56 = arith.constant 0 : index
    %131 = vector.load %arg15[%c0_55, %c0_56] : memref<1x128xf32, #tpu.memory_space<vmem>>, vector<1x128xf32>
    %132 = vector.broadcast %131 : vector<1x128xf32> to vector<128x128xf32>
    %133 = arith.addf %130, %132 : vector<128x128xf32>
    %c0_57 = arith.constant 0 : index
    %c0_58 = arith.constant 0 : index
    %134 = vector.load %arg16[%c0_57, %c0_58] : memref<128x128xf32, #tpu.memory_space<vmem>>, vector<128x128xf32>
    tpu.vector_store %arg16[%c0_57, %c0_58], %133 {strides = array<i32>} : memref<128x128xf32, #tpu.memory_space<vmem>>, vector<128x128xf32>,
    return
  }
  func.func @transform_0(%arg0: i32) -> (i32, i32) {
    %c0_i32 = arith.constant 0 : i32
    %c0_i32_0 = arith.constant 0 : i32
    return %arg0, %c0_i32 : i32, i32
  }
  func.func @transform_1(%arg0: i32) -> (i32, i32) {
    %c0_i32 = arith.constant 0 : i32
    %c0_i32_0 = arith.constant 0 : i32
    %c0_i32_1 = arith.constant 0 : i32
    return %c0_i32, %c0_i32_0 : i32, i32
  }
  func.func @transform_2(%arg0: i32) -> (i32, i32) {
    %c0_i32 = arith.constant 0 : i32
    %c0_i32_0 = arith.constant 0 : i32
    %c0_i32_1 = arith.constant 0 : i32
    return %c0_i32, %c0_i32_0 : i32, i32
  }
  func.func @transform_3(%arg0: i32) -> (i32, i32) {
    %c0_i32 = arith.constant 0 : i32
    %c0_i32_0 = arith.constant 0 : i32
    %c0_i32_1 = arith.constant 0 : i32
    return %c0_i32, %c0_i32_0 : i32, i32
  }
  func.func @transform_4(%arg0: i32) -> (i32, i32) {
    %c0_i32 = arith.constant 0 : i32
    %c0_i32_0 = arith.constant 0 : i32
    %c0_i32_1 = arith.constant 0 : i32
    return %c0_i32, %c0_i32_0 : i32, i32
  }
  func.func @transform_5(%arg0: i32) -> (i32, i32) {
    %c0_i32 = arith.constant 0 : i32
    %c0_i32_0 = arith.constant 0 : i32
    %c0_i32_1 = arith.constant 0 : i32
    return %c0_i32, %c0_i32_0 : i32, i32
  }
  func.func @transform_6(%arg0: i32) -> (i32, i32) {
    %c0_i32 = arith.constant 0 : i32
    %c0_i32_0 = arith.constant 0 : i32
    %c0_i32_1 = arith.constant 0 : i32
    return %c0_i32, %c0_i32_0 : i32, i32
  }
  func.func @transform_7(%arg0: i32) -> (i32, i32) {
    %c0_i32 = arith.constant 0 : i32
    %c0_i32_0 = arith.constant 0 : i32
    %c0_i32_1 = arith.constant 0 : i32
    return %c0_i32, %c0_i32_0 : i32, i32
  }
  func.func @transform_8(%arg0: i32) -> (i32, i32) {
    %c0_i32 = arith.constant 0 : i32
    %c0_i32_0 = arith.constant 0 : i32
    %c0_i32_1 = arith.constant 0 : i32
    return %c0_i32, %c0_i32_0 : i32, i32
  }
  func.func @transform_9(%arg0: i32) -> (i32, i32) {
    %c0_i32 = arith.constant 0 : i32
    %c0_i32_0 = arith.constant 0 : i32
    %c0_i32_1 = arith.constant 0 : i32
    return %c0_i32, %c0_i32_0 : i32, i32
  }
  func.func @transform_10(%arg0: i32) -> (i32, i32) {
    %c0_i32 = arith.constant 0 : i32
    %c0_i32_0 = arith.constant 0 : i32
    %c0_i32_1 = arith.constant 0 : i32
    return %c0_i32, %c0_i32_0 : i32, i32
  }
  func.func @transform_11(%arg0: i32) -> (i32, i32) {
    %c0_i32 = arith.constant 0 : i32
    %c0_i32_0 = arith.constant 0 : i32
    %c0_i32_1 = arith.constant 0 : i32
    return %c0_i32, %c0_i32_0 : i32, i32
  }
  func.func @transform_12(%arg0: i32) -> (i32, i32) {
    %c0_i32 = arith.constant 0 : i32
    %c0_i32_0 = arith.constant 0 : i32
    %c0_i32_1 = arith.constant 0 : i32
    return %c0_i32, %c0_i32_0 : i32, i32
  }
  func.func @transform_13(%arg0: i32) -> (i32, i32) {
    %c0_i32 = arith.constant 0 : i32
    %c0_i32_0 = arith.constant 0 : i32
    %c0_i32_1 = arith.constant 0 : i32
    return %c0_i32, %c0_i32_0 : i32, i32
  }
  func.func @transform_14(%arg0: i32) -> (i32, i32) {
    %c0_i32 = arith.constant 0 : i32
    %c0_i32_0 = arith.constant 0 : i32
    %c0_i32_1 = arith.constant 0 : i32
    return %c0_i32, %c0_i32_0 : i32, i32
  }
  func.func @transform_15(%arg0: i32) -> (i32, i32) {
    %c0_i32 = arith.constant 0 : i32
    %c0_i32_0 = arith.constant 0 : i32
    return %arg0, %c0_i32 : i32, i32
  }
}

</mosaic_0001>

<bundles_post_ra>
// kernel: tpu_custom_call.1
= control target key start
LH: loop header
LB: loop body
LE: loop exit
PB: predicated region body
PF: predicated region fallthrough
CT: control target
= control target key end

     0   :  { %20 = vsyncpa [#allocation3], 0  ;;  %s4751_s0 = inlined_call_operand.vmem [shape: f32[128,64], index: 0, kind: input, shape index: {}]   ;;  %s4752_s1 = inlined_call_operand.vmem [shape: f32[64,128], index: 1, kind: input, shape index: {}]   ;;  %s4753_s2 = inlined_call_operand.vmem [shape: f32[1,128], index: 2, kind: input, shape index: {}]   ;;  %s4754_s3 = inlined_call_operand.vmem [shape: f32[1,128], index: 3, kind: input, shape index: {}]   ;;  %s4755_s4 = inlined_call_operand.vmem [shape: f32[128,128], index: 4, kind: input, shape index: {}]   ;;  %s4756_s5 = inlined_call_operand.vmem [shape: f32[1,128], index: 5, kind: input, shape index: {}]   ;;  %s4757_s6 = inlined_call_operand.vmem [shape: f32[1,128], index: 6, kind: input, shape index: {}]   ;;  %s4758_s7 = inlined_call_operand.hbm [shape: f32[128,128], index: 7, kind: input, shape index: {}]   ;;  %s4759_s8 = inlined_call_operand.vmem [shape: f32[1,128], index: 8, kind: input, shape index: {}]   ;;  %s4760_s9 = inlined_call_operand.vmem [shape: f32[1,128], index: 9, kind: input, shape index: {}]   ;;  %s4761_s10 = inlined_call_operand.hbm [shape: f32[128,128], index: 10, kind: input, shape index: {}]   ;;  %s4762_s11 = inlined_call_operand.vmem [shape: f32[1,128], index: 11, kind: input, shape index: {}]   ;;  %s4763_s12 = inlined_call_operand.vmem [shape: f32[1,128], index: 12, kind: input, shape index: {}]   ;;  %s4764_s13 = inlined_call_operand.hbm [shape: f32[128,128], index: 13, kind: input, shape index: {}]   ;;  %s4765_s14 = inlined_call_operand.vmem [shape: f32[1,128], index: 14, kind: input, shape index: {}]   ;;  %s4766_s15 = inlined_call_operand.hbm [shape: f32[128,128], index: 15, kind: output, shape index: {}]  }
   0x1   :  { %21 = vsyncpa [#allocation6], 0 }
   0x2   :  { %22 = vsyncpa [#allocation4], 0  ;;  %s3473_s18 = smov [#allocation5]   ;;  %s3474_s20 = smov [#allocation2]  }
   0x3   :  { %s58_s19 = sshll.u32 %s3473_s18, 4  ;;  %s42_s21 = sshll.u32 %s3474_s20, 4  ;;  %s59_s19 = int_to_ptr.vmem [resolvable:$true] %s58_s19  ;;  %s43_s21 = int_to_ptr.vmem [resolvable:$true] %s42_s21 }
   0x4   :  { %s3395_s22 = scalar_lea.vmem %s59_s19, 2048  ;;  %p3400_p1 = scmp.lt.s32.totalorder %s59_s19, %s59_s19 }
   0x5   :  { %p3396_p0 = scmp.ne.s32.totalorder %s59_s19, %s3395_s22  ;;  %p3401_p2 = scmp.lt.s32.totalorder %s3395_s22, %s3395_s22 }
   0x7   :  { %p3402_p3 = por %p3401_p2, %p3400_p1 }
   0x9   :  { %p3403_p4 = pnand %p3402_p3, %p3396_p0 }
   0xb   :  { %3406 = shalt.err (!%p3403_p4)
}
   0xc   :  { %s3475_s23 = smov 128   ;;  %s3476_s24 = smov 8  }
   0xd   :  { %64 = dma.hbm_to_vmem [thread:$0]  %s4761_s10, 2048, %s59_s19, [#allocation6], %s3475_s23, %s3475_s23, %s3476_s24  }
   0xe   :  { %s3415_s27 = scalar_lea.vmem %s43_s21, 2048  ;;  %p3420_p6 = scmp.lt.s32.totalorder %s43_s21, %s43_s21 }
   0xf   :  { %p3416_p5 = scmp.ne.s32.totalorder %s43_s21, %s3415_s27  ;;  %p3421_p7 = scmp.lt.s32.totalorder %s3415_s27, %s3415_s27 }
  0x11   :  { %p3422_p8 = por %p3421_p7, %p3420_p6 }
  0x13   :  { %p3423_p9 = pnand %p3422_p8, %p3416_p5 }
  0x15   :  { %3426 = shalt.err (!%p3423_p9)
}
  0x16   :  { %48 = dma.hbm_to_vmem [thread:$0]  %s4758_s7, 2048, %s43_s21, [#allocation3], %s3475_s23, %s3475_s23, %s3476_s24  }
  0x17   :  { %s3477_s30 = smov [#allocation7]  }
  0x18   :  { %s74_s16 = sshll.u32 %s3477_s30, 4  ;;  %s75_s16 = int_to_ptr.vmem [resolvable:$true] %s74_s16 }
  0x19   :  { %s3435_s17 = scalar_lea.vmem %s75_s16, 2048  ;;  %p3440_p11 = scmp.lt.s32.totalorder %s75_s16, %s75_s16 }
  0x1a   :  { %p3436_p10 = scmp.ne.s32.totalorder %s75_s16, %s3435_s17  ;;  %p3441_p12 = scmp.lt.s32.totalorder %s3435_s17, %s3435_s17 }
  0x1c   :  { %p3442_p13 = por %p3441_p12, %p3440_p11 }
  0x1e   :  { %p3443_p0 = pnand %p3442_p13, %p3436_p10 }
  0x20   :  { %3446 = shalt.err (!%p3443_p0)
}
  0x21   :  { %80 = dma.hbm_to_vmem [thread:$0]  %s4764_s13, 2048, %s75_s16, [#allocation6], %s3475_s23, %s3475_s23, %s3476_s24  }
  0x22   :  { %3467 = dma.done.wait [#allocation3], 2048  }
  0x23   :  { %3468 = vsyncadd [#allocation3], 4294965248 }
  0x24   :  { %3469 = dma.done.wait [#allocation6], 4096  }
  0x25   :  { %3470 = vsyncadd [#allocation6], 4294963200  ;;  %v115_v0 = vld [vmem:[%s4752_s1 + $0x38] sm:$0xff]  ;;  %v114_v1 = vld [vmem:[%s4752_s1 + $0x30] sm:$0xff]  ;;  %vm116_vm0 = vcmask 523264  }
  0x26   :  { %2701 = vmatprep.subr.mxu0 %v115_v0  ;;  %v113_v2 = vld [vmem:[%s4752_s1 + $0x28] sm:$0xff]  ;;  %v92_v3 = vld [vmem:[%s4751_s0] sm:$0xff]  ;;  %v111_v5 = vld [vmem:[%s4752_s1 + $0x18] sm:$0xff] }
  0x27   :  { %2702 = vmatpush3.msra.mxu0 %v115_v0  ;;  %2717 = vmatprep.mubr.msk.f32.mxu0 %vm116_vm0, %v92_v3  ;;  %v112_v4 = vld [vmem:[%s4752_s1 + $0x20] sm:$0xff]  ;;  %v110_v6 = vld [vmem:[%s4752_s1 + $0x10] sm:$0xff]  ;;  %v109_v7 = vld [vmem:[%s4752_s1 + $0x8] sm:$0xff] }
  0x28   :  { %2703 = vmatprep.subr.mxu0 %v114_v1  ;;  %v108_v8 = vld [vmem:[%s4752_s1] sm:$0xff]  ;;  %v93_v9 = vld [vmem:[%s4751_s0 + $0x8] sm:$0xff]  ;;  %v94_v10 = vld [vmem:[%s4751_s0 + $0x10] sm:$0xff] }
  0x29   :  { %2704 = vmatpush3.msra.mxu0 %v114_v1  ;;  %v95_v11 = vld [vmem:[%s4751_s0 + $0x18] sm:$0xff]  ;;  %v96_v12 = vld [vmem:[%s4751_s0 + $0x20] sm:$0xff]  ;;  %v97_v13 = vld [vmem:[%s4751_s0 + $0x28] sm:$0xff] }
  0x2a   :  { %2705 = vmatprep.subr.mxu0 %v113_v2  ;;  %v98_v14 = vld [vmem:[%s4751_s0 + $0x30] sm:$0xff]  ;;  %v99_v15 = vld [vmem:[%s4751_s0 + $0x38] sm:$0xff]  ;;  %v100_v16 = vld [vmem:[%s4751_s0 + $0x40] sm:$0xff] }
  0x2b   :  { %2706 = vmatpush3.msra.mxu0 %v113_v2  ;;  %v101_v17 = vld [vmem:[%s4751_s0 + $0x48] sm:$0xff]  ;;  %v102_v18 = vld [vmem:[%s4751_s0 + $0x50] sm:$0xff]  ;;  %v103_v19 = vld [vmem:[%s4751_s0 + $0x58] sm:$0xff] }
  0x2c   :  { %2707 = vmatprep.subr.mxu0 %v112_v4  ;;  %v104_v20 = vld [vmem:[%s4751_s0 + $0x60] sm:$0xff]  ;;  %v105_v21 = vld [vmem:[%s4751_s0 + $0x68] sm:$0xff]  ;;  %v106_v22 = vld [vmem:[%s4751_s0 + $0x70] sm:$0xff] }
  0x2d   :  { %2708 = vmatpush3.msra.mxu0 %v112_v4  ;;  %v107_v23 = vld [vmem:[%s4751_s0 + $0x78] sm:$0xff]  ;;  %v691_v51 = vld [vmem:[%s4755_s4 + $0x70] sm:$0xff]  ;;  %v690_v53 = vld [vmem:[%s4755_s4 + $0x68] sm:$0xff] }
  0x2e   :  { %2709 = vmatprep.subr.mxu0 %v111_v5  ;;  %v692_v50 = vld [vmem:[%s4755_s4 + $0x78] sm:$0xff]  ;;  %v689_v55 = vld [vmem:[%s4755_s4 + $0x60] sm:$0xff]  ;;  %v687_v59 = vld [vmem:[%s4755_s4 + $0x50] sm:$0xff] }
  0x2f   :  { %2710 = vmatpush3.msra.mxu0 %v111_v5  ;;  %2741 = vmatprep.subr.mxu1 %v692_v50  ;;  %v688_v58 = vld [vmem:[%s4755_s4 + $0x58] sm:$0xff]  ;;  %v686_v61 = vld [vmem:[%s4755_s4 + $0x48] sm:$0xff]  ;;  %v685_v63 = vld [vmem:[%s4755_s4 + $0x40] sm:$0xff] }
  0x30   :  { %2711 = vmatprep.subr.mxu0 %v110_v6  ;;  %2742 = vmatpush3.msra.mxu1 %v692_v50  ;;  %v684_v0 = vld [vmem:[%s4755_s4 + $0x38] sm:$0xff]  ;;  %v683_v1 = vld [vmem:[%s4755_s4 + $0x30] sm:$0xff]  ;;  %v682_v2 = vld [vmem:[%s4755_s4 + $0x28] sm:$0xff] }
  0x31   :  { %2712 = vmatpush3.msra.mxu0 %v110_v6  ;;  %2743 = vmatprep.subr.mxu1 %v691_v51  ;;  %v681_v3 = vld [vmem:[%s4755_s4 + $0x20] sm:$0xff]  ;;  %v680_v4 = vld [vmem:[%s4755_s4 + $0x18] sm:$0xff]  ;;  %v679_v5 = vld [vmem:[%s4755_s4 + $0x10] sm:$0xff] }
  0x32   :  { %2713 = vmatprep.subr.mxu0 %v109_v7  ;;  %2744 = vmatpush3.msra.mxu1 %v691_v51  ;;  %v678_v6 = vld [vmem:[%s4755_s4 + $0x8] sm:$0xff] }
  0x33   :  { %2714 = vmatpush3.msra.mxu0 %v109_v7  ;;  %2745 = vmatprep.subr.mxu1 %v690_v53  ;;  %v677_v7 = vld [vmem:[%s4755_s4] sm:$0xff] }
  0x34   :  { %2715 = vmatprep.subr.mxu0 %v108_v8  ;;  %2746 = vmatpush3.msra.mxu1 %v690_v53 }
  0x35   :  { %2716 = vmatpush3.msra.mxu0 %v108_v8  ;;  %2747 = vmatprep.subr.mxu1 %v689_v55 }
  0x36   :  { %2718 = vmatmul.mubr.msk.f32.vlgmr.msra.gmra.mxu0 %vm116_vm0, %v93_v9  ;;  %2748 = vmatpush3.msra.mxu1 %v689_v55 }
  0x37   :  { %2720 = vmatprep.mubr.msk.f32.mxu0 %vm116_vm0, %v94_v10  ;;  %2749 = vmatprep.subr.mxu1 %v688_v58 }
  0x38   :  { %2750 = vmatpush3.msra.mxu1 %v688_v58 }
  0x39   :  { %2751 = vmatprep.subr.mxu1 %v687_v59 }
  0x3a   :  { %2721 = vmatmul.mubr.msk.f32.gmra.mxu0 %vm116_vm0, %v95_v11  ;;  %2752 = vmatpush3.msra.mxu1 %v687_v59 }
  0x3b   :  { %2723 = vmatprep.mubr.msk.f32.mxu0 %vm116_vm0, %v96_v12  ;;  %2753 = vmatprep.subr.mxu1 %v686_v61 }
  0x3c   :  { %2754 = vmatpush3.msra.mxu1 %v686_v61 }
  0x3d   :  { %2755 = vmatprep.subr.mxu1 %v685_v63 }
  0x3e   :  { %2724 = vmatmul.mubr.msk.f32.gmra.mxu0 %vm116_vm0, %v97_v13  ;;  %2756 = vmatpush3.msra.mxu1 %v685_v63 }
  0x3f   :  { %2726 = vmatprep.mubr.msk.f32.mxu0 %vm116_vm0, %v98_v14  ;;  %2757 = vmatprep.subr.mxu1 %v684_v0 }
  0x40   :  { %2758 = vmatpush3.msra.mxu1 %v684_v0 }
  0x41   :  { %2759 = vmatprep.subr.mxu1 %v683_v1 }
  0x42   :  { %2727 = vmatmul.mubr.msk.f32.gmra.mxu0 %vm116_vm0, %v99_v15  ;;  %2760 = vmatpush3.msra.mxu1 %v683_v1 }
  0x43   :  { %2729 = vmatprep.mubr.msk.f32.mxu0 %vm116_vm0, %v100_v16  ;;  %2761 = vmatprep.subr.mxu1 %v682_v2 }
  0x44   :  { %2762 = vmatpush3.msra.mxu1 %v682_v2 }
  0x45   :  { %2763 = vmatprep.subr.mxu1 %v681_v3 }
  0x46   :  { %2730 = vmatmul.mubr.msk.f32.gmra.mxu0 %vm116_vm0, %v101_v17  ;;  %2764 = vmatpush3.msra.mxu1 %v681_v3 }
  0x47   :  { %2732 = vmatprep.mubr.msk.f32.mxu0 %vm116_vm0, %v102_v18  ;;  %2765 = vmatprep.subr.mxu1 %v680_v4 }
  0x48   :  { %2766 = vmatpush3.msra.mxu1 %v680_v4 }
  0x49   :  { %2767 = vmatprep.subr.mxu1 %v679_v5 }
  0x4a   :  { %2733 = vmatmul.mubr.msk.f32.gmra.mxu0 %vm116_vm0, %v103_v19  ;;  %2768 = vmatpush3.msra.mxu1 %v679_v5 }
  0x4b   :  { %2735 = vmatprep.mubr.msk.f32.mxu0 %vm116_vm0, %v104_v20  ;;  %2769 = vmatprep.subr.mxu1 %v678_v6 }
  0x4c   :  { %2770 = vmatpush3.msra.mxu1 %v678_v6  ;;  %v3820_v6 = vld [vmem:[%s4754_s3] ss:$0 sm:$0xff] }
  0x4d   :  { %2771 = vmatprep.subr.mxu1 %v677_v7 }
  0x4e   :  { %2736 = vmatmul.mubr.msk.f32.gmra.mxu0 %vm116_vm0, %v105_v21  ;;  %2772 = vmatpush3.msra.mxu1 %v677_v7 }
  0x4f   :  { %2738 = vmatprep.mubr.msk.f32.mxu0 %vm116_vm0, %v106_v22 }
  0x52   :  { %2739 = vmatmul.mubr.msk.f32.gmra.mxu0 %vm116_vm0, %v107_v23 }
  0xf6   :  { %v3665_v24 = vpop.f32.mrf.mxu0 }
  0xf7   :  { %312 = vadd.xlane.f32.xlu0 %v3665_v24  ;;  %v360_v25 = vmul.f32 %v3665_v24, %v3665_v24 }
  0xf8   :  { %v3670_v26 = vpop.f32.mrf.mxu0 }
  0xf9   :  { %377 = vadd.xlane.f32.xlu1 %v360_v25  ;;  %v359_v28 = vmul.f32 %v3670_v26, %v3670_v26 }
  0xfa   :  { %v3672_v27 = vpop.f32.mrf.mxu0 }
  0xfb   :  { %310 = vadd.xlane.f32.xlu0 %v3670_v26  ;;  %v362_v32 = vmul.f32 %v3672_v27, %v3672_v27 }
  0xfc   :  { %v3677_v29 = vpop.f32.mrf.mxu0 }
  0xfd   :  { %375 = vadd.xlane.f32.xlu1 %v359_v28  ;;  %v361_v31 = vmul.f32 %v3677_v29, %v3677_v29 }
  0xfe   :  { %v3680_v30 = vpop.f32.mrf.mxu0 }
  0xff   :  { %314 = vadd.xlane.f32.xlu0 %v3677_v29  ;;  %v364_v36 = vmul.f32 %v3680_v30, %v3680_v30 }
 0x100   :  { %v3687_v33 = vpop.f32.mrf.mxu0 }
 0x101   :  { %316 = vadd.xlane.f32.xlu1 %v3672_v27  ;;  %v363_v35 = vmul.f32 %v3687_v33, %v3687_v33 }
 0x102   :  { %v3690_v34 = vpop.f32.mrf.mxu0 }
 0x103   :  { %379 = vadd.xlane.f32.xlu0 %v361_v31  ;;  %v366_v40 = vmul.f32 %v3690_v34, %v3690_v34 }
 0x104   :  { %v3697_v37 = vpop.f32.mrf.mxu0 }
 0x105   :  { %381 = vadd.xlane.f32.xlu1 %v362_v32  ;;  %v365_v39 = vmul.f32 %v3697_v37, %v3697_v37 }
 0x106   :  { %v3700_v38 = vpop.f32.mrf.mxu0 }
 0x107   :  { %318 = vadd.xlane.f32.xlu0 %v3687_v33  ;;  %v368_v44 = vmul.f32 %v3700_v38, %v3700_v38 }
 0x108   :  { %v3707_v41 = vpop.f32.mrf.mxu0 }
 0x109   :  { %320 = vadd.xlane.f32.xlu1 %v3680_v30  ;;  %v367_v43 = vmul.f32 %v3707_v41, %v3707_v41 }
 0x10a   :  { %v3710_v42 = vpop.f32.mrf.mxu0 }
 0x10b   :  { %383 = vadd.xlane.f32.xlu0 %v363_v35  ;;  %v370_v48 = vmul.f32 %v3710_v42, %v3710_v42 }
 0x10c   :  { %v3717_v45 = vpop.f32.mrf.mxu0 }
 0x10d   :  { %385 = vadd.xlane.f32.xlu1 %v364_v36  ;;  %v369_v47 = vmul.f32 %v3717_v45, %v3717_v45 }
 0x10e   :  { %v3720_v46 = vpop.f32.mrf.mxu0 }
 0x10f   :  { %322 = vadd.xlane.f32.xlu0 %v3697_v37  ;;  %v372_v56 = vmul.f32 %v3720_v46, %v3720_v46 }
 0x110   :  { %v3727_v49 = vpop.f32.mrf.mxu0 }
 0x111   :  { %324 = vadd.xlane.f32.xlu1 %v3690_v34  ;;  %v371_v54 = vmul.f32 %v3727_v49, %v3727_v49 }
 0x112   :  { %v3736_v52 = vpop.f32.mrf.mxu0 }
 0x113   :  { %387 = vadd.xlane.f32.xlu0 %v365_v39  ;;  %v374_v62 = vmul.f32 %v3736_v52, %v3736_v52 }
 0x114   :  { %v3749_v57 = vpop.f32.mrf.mxu0 }
 0x115   :  { %389 = vadd.xlane.f32.xlu1 %v366_v40  ;;  %v373_v60 = vmul.f32 %v3749_v57, %v3749_v57 }
 0x117   :  { %326 = vadd.xlane.f32.xlu0 %v3707_v41 }
 0x119   :  { %328 = vadd.xlane.f32.xlu1 %v3700_v38 }
 0x11b   :  { %391 = vadd.xlane.f32.xlu0 %v367_v43 }
 0x11d   :  { %393 = vadd.xlane.f32.xlu1 %v368_v44 }
 0x11f   :  { %330 = vadd.xlane.f32.xlu0 %v3717_v45 }
 0x121   :  { %332 = vadd.xlane.f32.xlu1 %v3710_v42 }
 0x123   :  { %395 = vadd.xlane.f32.xlu0 %v369_v47 }
 0x125   :  { %397 = vadd.xlane.f32.xlu1 %v370_v48 }
 0x127   :  { %334 = vadd.xlane.f32.xlu0 %v3727_v49 }
 0x129   :  { %336 = vadd.xlane.f32.xlu1 %v3720_v46 }
 0x12b   :  { %399 = vadd.xlane.f32.xlu0 %v371_v54 }
 0x12d   :  { %401 = vadd.xlane.f32.xlu1 %v372_v56 }
 0x12f   :  { %338 = vadd.xlane.f32.xlu0 %v3749_v57 }
 0x131   :  { %340 = vadd.xlane.f32.xlu1 %v3736_v52 }
 0x133   :  { %403 = vadd.xlane.f32.xlu0 %v373_v60 }
 0x135   :  { %405 = vadd.xlane.f32.xlu1 %v374_v62  ;;  %v3811_v62 = vld [vmem:[%s4753_s2] ss:$0 sm:$0xff] }
 0x180   :  { %v313_v8 = vpop.xlane.xlu0 %312 }
 0x181   :  { %v344_v9 = vmul.f32 0.0078125, %v313_v8 }
 0x182   :  { %v378_v10 = vpop.xlane.xlu1 %377 }
 0x183   :  { %v424_v11 = vmul.f32 %v344_v9, %v344_v9  ;;  %v408_v12 = vmul.f32 0.0078125, %v378_v10  ;;  %v488_v56 = vsub.f32 %v3665_v24, %v344_v9 }
 0x184   :  { %v311_v13 = vpop.xlane.xlu0 %310 }
 0x185   :  { %v440_v14 = vsub.f32 %v408_v12, %v424_v11  ;;  %v343_v15 = vmul.f32 0.0078125, %v311_v13 }
 0x186   :  { %v376_v16 = vpop.xlane.xlu1 %375 }
 0x187   :  { %v456_v17 = vadd.f32 0.001, %v440_v14  ;;  %v423_v18 = vmul.f32 %v343_v15, %v343_v15  ;;  %v407_v19 = vmul.f32 0.0078125, %v376_v16  ;;  %v487_v9 = vsub.f32 %v3670_v26, %v343_v15 }
 0x188   :  { %v315_v20 = vpop.xlane.xlu0 %314 }
 0x189   :  { %3003 = vrsqrt.f32 %v456_v17  ;;  %v439_v21 = vsub.f32 %v407_v19, %v423_v18  ;;  %v3793_v22 = vmul.f32 0.0078125, %v315_v20 }
 0x18a   :  { %v317_v23 = vpop.xlane.xlu1 %316 }
 0x18b   :  { %v455_v25 = vadd.f32 0.001, %v439_v21  ;;  %v3795_v28 = vmul.f32 0.0078125, %v317_v23  ;;  %v425_v32 = vmul.f32 %v3793_v22, %v3793_v22  ;;  %v489_v15 = vsub.f32 %v3677_v29, %v3793_v22 }
 0x18c   :  { %v380_v31 = vpop.xlane.xlu0 %379 }
 0x18d   :  { %3005 = vrsqrt.f32 %v455_v25  ;;  %v409_v35 = vmul.f32 0.0078125, %v380_v31  ;;  %v426_v39 = vmul.f32 %v3795_v28, %v3795_v28  ;;  %v490_v29 = vsub.f32 %v3672_v27, %v3795_v28 }
 0x18e   :  { %v382_v36 = vpop.xlane.xlu1 %381 }
 0x18f   :  { %v441_v40 = vsub.f32 %v409_v35, %v425_v32  ;;  %v410_v43 = vmul.f32 0.0078125, %v382_v36 }
 0x190   :  { %v319_v44 = vpop.xlane.xlu0 %318 }
 0x191   :  { %v457_v47 = vadd.f32 0.001, %v441_v40  ;;  %v442_v48 = vsub.f32 %v410_v43, %v426_v39  ;;  %v3801_v50 = vmul.f32 0.0078125, %v319_v44 }
 0x192   :  { %v321_v51 = vpop.xlane.xlu1 %320 }
 0x193   :  { %3007 = vrsqrt.f32 %v457_v47  ;;  %v458_v53 = vadd.f32 0.001, %v442_v48  ;;  %v3803_v54 = vmul.f32 0.0078125, %v321_v51  ;;  %v427_v58 = vmul.f32 %v3801_v50, %v3801_v50 }
 0x194   :  { %v384_v55 = vpop.xlane.xlu0 %383 }
 0x195   :  { %3009 = vrsqrt.f32 %v458_v53  ;;  %v411_v59 = vmul.f32 0.0078125, %v384_v55  ;;  %v428_v63 = vmul.f32 %v3803_v54, %v3803_v54 }
 0x196   :  { %v3004_v60 = vpop.eup %3003  ;;  %v386_v61 = vpop.xlane.xlu1 %385 }
 0x197   :  { %v443_v0 = vsub.f32 %v411_v59, %v427_v58  ;;  %v412_v1 = vmul.f32 0.0078125, %v386_v61  ;;  %v504_v2 = vmul.f32 %v3004_v60, %v488_v56  ;;  %v491_v61 = vsub.f32 %v3687_v33, %v3801_v50 }
 0x198   :  { %v323_v3 = vpop.xlane.xlu0 %322  ;;  %v492_v33 = vsub.f32 %v3680_v30, %v3803_v54 }
 0x199   :  { %v459_v24 = vadd.f32 0.001, %v443_v0  ;;  %v444_v4 = vsub.f32 %v412_v1, %v428_v63  ;;  %v3815_v5 = vmul.f32 0.0078125, %v323_v3  ;;  %v527_v7 = vmul.f32 %v3811_v62, %v504_v2 }
 0x19a   :  { %v3006_v8 = vpop.eup %3005  ;;  %v325_v10 = vpop.xlane.xlu1 %324 }
 0x19b   :  { %3011 = vrsqrt.f32 %v459_v24  ;;  %v460_v11 = vadd.f32 0.001, %v444_v4  ;;  %v3824_v12 = vmul.f32 0.0078125, %v325_v10  ;;  %v503_v14 = vmul.f32 %v3006_v8, %v487_v9 }
 0x19c   :  { %v388_v13 = vpop.xlane.xlu0 %387  ;;  %v3827_v16 = vadd.f32 %v3820_v6, %v527_v7  ;;  %v429_v17 = vmul.f32 %v3815_v5, %v3815_v5 }
 0x19d   :  { %3013 = vrsqrt.f32 %v460_v11  ;;  %v413_v18 = vmul.f32 0.0078125, %v388_v13  ;;  %v526_v20 = vmul.f32 %v3811_v62, %v503_v14  ;;  %v430_v21 = vmul.f32 %v3824_v12, %v3824_v12 }
 0x19e   :  { %v390_v19 = vpop.xlane.xlu1 %389  ;;  %v2479_v26 = vmul.f32 -1.442695, %v3827_v16 }
 0x19f   :  { %v445_v23 = vsub.f32 %v413_v18, %v429_v17  ;;  %v414_v25 = vmul.f32 0.0078125, %v390_v19  ;;  %v3838_v35 = vadd.f32 %v3820_v6, %v526_v20 }
 0x1a0   :  { %v3008_v31 = vpop.eup %3007  ;;  %v327_v32 = vpop.xlane.xlu0 %326  ;;  %3015 = vpow2.f32 %v2479_v26 }
 0x1a1   :  { %v461_v36 = vadd.f32 0.001, %v445_v23  ;;  %v446_v39 = vsub.f32 %v414_v25, %v430_v21  ;;  %v3840_v40 = vmul.f32 0.0078125, %v327_v32  ;;  %v505_v43 = vmul.f32 %v3008_v31, %v489_v15 }
 0x1a2   :  { %v3010_v44 = vpop.eup %3009  ;;  %v329_v22 = vpop.xlane.xlu1 %328  ;;  %v2478_v47 = vmul.f32 -1.442695, %v3838_v35 }
 0x1a3   :  { %3017 = vrsqrt.f32 %v461_v36  ;;  %v462_v48 = vadd.f32 0.001, %v446_v39  ;;  %v3845_v51 = vmul.f32 0.0078125, %v329_v22  ;;  %v528_v55 = vmul.f32 %v3811_v62, %v505_v43 }
 0x1a4   :  { %v392_v53 = vpop.xlane.xlu0 %391  ;;  %3019 = vpow2.f32 %v2478_v47  ;;  %v506_v56 = vmul.f32 %v3010_v44, %v490_v29  ;;  %v431_v58 = vmul.f32 %v3840_v40, %v3840_v40  ;;  %v493_v43 = vsub.f32 %v3697_v37, %v3815_v5 }
 0x1a5   :  { %3021 = vrsqrt.f32 %v462_v48  ;;  %v415_v59 = vmul.f32 0.0078125, %v392_v53  ;;  %v3851_v27 = vadd.f32 %v3820_v6, %v528_v55  ;;  %v432_v63 = vmul.f32 %v3845_v51, %v3845_v51 }
 0x1a6   :  { %v394_v60 = vpop.xlane.xlu1 %393  ;;  %v529_v28 = vmul.f32 %v3811_v62, %v506_v56  ;;  %v494_v37 = vsub.f32 %v3690_v34, %v3824_v12 }
 0x1a7   :  { %v447_v0 = vsub.f32 %v415_v59, %v431_v58  ;;  %v416_v1 = vmul.f32 0.0078125, %v394_v60  ;;  %v2480_v24 = vmul.f32 -1.442695, %v3851_v27 }
 0x1a8   :  { %v3012_v2 = vpop.eup %3011  ;;  %v331_v3 = vpop.xlane.xlu0 %330  ;;  %v3860_v4 = vadd.f32 %v3820_v6, %v529_v28 }
 0x1a9   :  { %v463_v7 = vadd.f32 0.001, %v447_v0  ;;  %v448_v8 = vsub.f32 %v416_v1, %v432_v63  ;;  %v3862_v9 = vmul.f32 0.0078125, %v331_v3  ;;  %v507_v10 = vmul.f32 %v3012_v2, %v491_v61 }
 0x1aa   :  { %v3014_v11 = vpop.eup %3013  ;;  %v333_v50 = vpop.xlane.xlu1 %332  ;;  %3023 = vpow2.f32 %v2480_v24  ;;  %v2481_v13 = vmul.f32 -1.442695, %v3860_v4 }
 0x1ab   :  { %3025 = vrsqrt.f32 %v463_v7  ;;  %v464_v14 = vadd.f32 0.001, %v448_v8  ;;  %v3867_v17 = vmul.f32 0.0078125, %v333_v50  ;;  %v530_v19 = vmul.f32 %v3811_v62, %v507_v10 }
 0x1ac   :  { %v396_v18 = vpop.xlane.xlu0 %395  ;;  %3027 = vpow2.f32 %v2481_v13  ;;  %v508_v20 = vmul.f32 %v3014_v11, %v492_v33  ;;  %v433_v15 = vmul.f32 %v3862_v9, %v3862_v9  ;;  %v495_v50 = vsub.f32 %v3707_v41, %v3840_v40 }
 0x1ad   :  { %v3016_v26 = vpop.eup %3015  ;;  %3029 = vrsqrt.f32 %v464_v14  ;;  %v417_v21 = vmul.f32 0.0078125, %v396_v18  ;;  %v3873_v23 = vadd.f32 %v3820_v6, %v530_v19  ;;  %v434_v25 = vmul.f32 %v3867_v17, %v3867_v17 }
 0x1ae   :  { %v398_v30 = vpop.xlane.xlu1 %397  ;;  %v614_v54 = vadd.f32 1.0, %v3016_v26  ;;  %v531_v36 = vmul.f32 %v3811_v62, %v508_v20  ;;  %v496_v41 = vsub.f32 %v3700_v38, %v3845_v51  ;;  %v497_v38 = vsub.f32 %v3717_v45, %v3862_v9 }
 0x1af   :  { %v449_v31 = vsub.f32 %v417_v21, %v433_v15  ;;  %v418_v32 = vmul.f32 0.0078125, %v398_v30  ;;  %v2482_v29 = vmul.f32 -1.442695, %v3873_v23 }
 0x1b0   :  { %v3018_v39 = vpop.eup %3017  ;;  %v335_v44 = vpop.xlane.xlu0 %334  ;;  %3031 = vrcp.f32 %v614_v54  ;;  %v3884_v55 = vadd.f32 %v3820_v6, %v531_v36 }
 0x1b1   :  { %v3020_v22 = vpop.eup %3019  ;;  %v465_v47 = vadd.f32 0.001, %v449_v31  ;;  %v450_v48 = vsub.f32 %v418_v32, %v434_v25  ;;  %v3881_v53 = vmul.f32 0.0078125, %v335_v44  ;;  %3033 = vpow2.f32 %v2482_v29 }
 0x1b2   :  { %v3022_v56 = vpop.eup %3021  ;;  %v337_v58 = vpop.xlane.xlu1 %336  ;;  %v613_v59 = vadd.f32 1.0, %v3020_v22  ;;  %v509_v60 = vmul.f32 %v3018_v39, %v493_v43  ;;  %v2483_v63 = vmul.f32 -1.442695, %v3884_v55 }
 0x1b3   :  { %3035 = vrsqrt.f32 %v465_v47  ;;  %v466_v5 = vadd.f32 0.001, %v450_v48  ;;  %v3888_v28 = vmul.f32 0.0078125, %v337_v58  ;;  %v435_v1 = vmul.f32 %v3881_v53, %v3881_v53 }
 0x1b4   :  { %v400_v61 = vpop.xlane.xlu0 %399  ;;  %3037 = vrcp.f32 %v613_v59  ;;  %v532_v0 = vmul.f32 %v3811_v62, %v509_v60  ;;  %v510_v3 = vmul.f32 %v3022_v56, %v494_v37 }
 0x1b5   :  { %3039 = vrsqrt.f32 %v466_v5  ;;  %v419_v2 = vmul.f32 0.0078125, %v400_v61  ;;  %v436_v7 = vmul.f32 %v3888_v28, %v3888_v28  ;;  %v498_v5 = vsub.f32 %v3710_v42, %v3867_v17 }
 0x1b6   :  { %v402_v24 = vpop.xlane.xlu1 %401  ;;  %3041 = vpow2.f32 %v2483_v63  ;;  %v3895_v34 = vadd.f32 %v3820_v6, %v532_v0  ;;  %v533_v11 = vmul.f32 %v3811_v62, %v510_v3 }
 0x1b7   :  { %v3024_v12 = vpop.eup %3023  ;;  %v451_v8 = vsub.f32 %v419_v2, %v435_v1  ;;  %v420_v10 = vmul.f32 0.0078125, %v402_v24 }
 0x1b8   :  { %v3026_v33 = vpop.eup %3025  ;;  %v339_v13 = vpop.xlane.xlu0 %338  ;;  %v615_v14 = vadd.f32 1.0, %v3024_v12  ;;  %v3905_v15 = vadd.f32 %v3820_v6, %v533_v11  ;;  %v2484_v25 = vmul.f32 -1.442695, %v3895_v34 }
 0x1b9   :  { %v3028_v18 = vpop.eup %3027  ;;  %v467_v19 = vadd.f32 0.001, %v451_v8  ;;  %v452_v20 = vsub.f32 %v420_v10, %v436_v7  ;;  %v3902_v26 = vmul.f32 0.0078125, %v339_v13  ;;  %v511_v31 = vmul.f32 %v3026_v33, %v495_v50 }
 0x1ba   :  { %v3030_v21 = vpop.eup %3029  ;;  %v341_v30 = vpop.xlane.xlu1 %340  ;;  %3043 = vrcp.f32 %v615_v14  ;;  %v616_v54 = vadd.f32 1.0, %v3028_v18  ;;  %v2485_v43 = vmul.f32 -1.442695, %v3905_v15  ;;  %v499_v13 = vsub.f32 %v3727_v49, %v3881_v53 }
 0x1bb   :  { %3045 = vrsqrt.f32 %v467_v19  ;;  %v468_v40 = vadd.f32 0.001, %v452_v20  ;;  %v437_v32 = vmul.f32 %v3902_v26, %v3902_v26  ;;  %v3912_v36 = vmul.f32 0.0078125, %v341_v30 }
 0x1bc   :  { %v404_v39 = vpop.xlane.xlu0 %403  ;;  %3047 = vrcp.f32 %v616_v54  ;;  %v534_v44 = vmul.f32 %v3811_v62, %v511_v31  ;;  %v512_v47 = vmul.f32 %v3030_v21, %v496_v41  ;;  %v500_v30 = vsub.f32 %v3720_v46, %v3888_v28 }
 0x1bd   :  { %v3032_v29 = vpop.eup %3031  ;;  %3049 = vrsqrt.f32 %v468_v40  ;;  %v421_v22 = vmul.f32 0.0078125, %v404_v39  ;;  %v438_v51 = vmul.f32 %v3912_v36, %v3912_v36 }
 0x1be   :  { %v406_v48 = vpop.xlane.xlu1 %405  ;;  %3051 = vpow2.f32 %v2484_v25  ;;  %v3034_v56 = vpop.eup %3033  ;;  %v3921_v60 = vadd.f32 %v3820_v6, %v534_v44  ;;  %v535_v63 = vmul.f32 %v3811_v62, %v512_v47  ;;  %v662_v12 = vmul.f32 %v3032_v29, %v3827_v16 }
 0x1bf   :  { %v453_v58 = vsub.f32 %v421_v22, %v437_v32  ;;  %v422_v59 = vmul.f32 0.0078125, %v406_v48  ;;  %3053 = vpow2.f32 %v2485_v43  ;;  %v617_v61 = vadd.f32 1.0, %v3034_v56 }
 0x1c0   :  { %v3036_v37 = vpop.eup %3035  ;;  %v2486_v1 = vmul.f32 -1.442695, %v3921_v60  ;;  %v3930_v7 = vadd.f32 %v3820_v6, %v535_v63  ;;  %v501_v44 = vsub.f32 %v3749_v57, %v3902_v26 }
 0x1c1   :  { %v3038_v45 = vpop.eup %3037  ;;  %v469_v9 = vadd.f32 0.001, %v453_v58  ;;  %v454_v0 = vsub.f32 %v422_v59, %v438_v51  ;;  %v513_v2 = vmul.f32 %v3036_v37, %v497_v38  ;;  %3055 = vrcp.f32 %v617_v61 }
 0x1c2   :  { %v3040_v3 = vpop.eup %3039  ;;  %v661_v24 = vmul.f32 %v3038_v45, %v3838_v35  ;;  %v2487_v33 = vmul.f32 -1.442695, %v3930_v7  ;;  %v502_v51 = vsub.f32 %v3736_v52, %v3912_v36 }
 0x1c3   :  { %v3042_v8 = vpop.eup %3041  ;;  %3057 = vrsqrt.f32 %v469_v9  ;;  %v470_v42 = vadd.f32 0.001, %v454_v0  ;;  %v536_v17 = vmul.f32 %v3811_v62, %v513_v2  ;;  %v514_v10 = vmul.f32 %v3040_v3, %v498_v5 }
 0x1c4   :  { %2773 = vmatprep.mubr.f32.mxu1 %v661_v24  ;;  %v618_v11 = vadd.f32 1.0, %v3042_v8  ;;  %3059 = vpow2.f32 %v2486_v1 }
 0x1c5   :  { %3061 = vrsqrt.f32 %v470_v42  ;;  %2774 = vmatmul.mubr.f32.vlgmr.msra.gmra.mxu1 %v662_v12  ;;  %v3935_v35 = vadd.f32 %v3820_v6, %v536_v17  ;;  %v537_v16 = vmul.f32 %v3811_v62, %v514_v10 }
 0x1c6   :  { %3063 = vrcp.f32 %v618_v11 }
 0x1c7   :  { %v3044_v50 = vpop.eup %3043  ;;  %3065 = vpow2.f32 %v2487_v33  ;;  %v2488_v14 = vmul.f32 -1.442695, %v3935_v35  ;;  %v3942_v18 = vadd.f32 %v3820_v6, %v537_v16 }
 0x1c8   :  { %v3046_v19 = vpop.eup %3045  ;;  %v663_v20 = vmul.f32 %v3044_v50, %v3851_v27 }
 0x1c9   :  { %v3048_v21 = vpop.eup %3047  ;;  %3067 = vpow2.f32 %v2488_v14  ;;  %v2489_v54 = vmul.f32 -1.442695, %v3942_v18  ;;  %v515_v25 = vmul.f32 %v3046_v19, %v499_v13 }
 0x1ca   :  { %v3050_v31 = vpop.eup %3049  ;;  %2776 = vmatprep.mubr.f32.mxu1 %v663_v20  ;;  %v664_v49 = vmul.f32 %v3048_v21, %v3860_v4 }
 0x1cb   :  { %v3052_v53 = vpop.eup %3051  ;;  %3069 = vpow2.f32 %v2489_v54  ;;  %v538_v41 = vmul.f32 %v3811_v62, %v515_v25  ;;  %v516_v40 = vmul.f32 %v3050_v31, %v500_v30 }
 0x1cc   :  { %v3054_v32 = vpop.eup %3053  ;;  %2777 = vmatmul.mubr.f32.gmra.mxu1 %v664_v49  ;;  %v619_v27 = vadd.f32 1.0, %v3052_v53 }
 0x1cd   :  { %v620_v39 = vadd.f32 1.0, %v3054_v32  ;;  %v3951_v43 = vadd.f32 %v3820_v6, %v538_v41  ;;  %v539_v46 = vmul.f32 %v3811_v62, %v516_v40 }
 0x1ce   :  { %3071 = vrcp.f32 %v619_v27  ;;  %v3056_v28 = vpop.eup %3055 }
 0x1cf   :  { %3073 = vrcp.f32 %v620_v39  ;;  %v2490_v4 = vmul.f32 -1.442695, %v3951_v43  ;;  %v3958_v29 = vadd.f32 %v3820_v6, %v539_v46  ;;  %v665_v47 = vmul.f32 %v3056_v28, %v3873_v23 }
 0x1d0   :  { %v3058_v22 = vpop.eup %3057 }
 0x1d1   :  { %v3060_v38 = vpop.eup %3059  ;;  %3075 = vpow2.f32 %v2490_v4  ;;  %v2491_v48 = vmul.f32 -1.442695, %v3958_v29  ;;  %v517_v56 = vmul.f32 %v3058_v22, %v501_v44  ;;  %2779 = vmatprep.mubr.f32.mxu1 %v665_v47 }
 0x1d2   :  { %v3062_v58 = vpop.eup %3061  ;;  %v621_v57 = vadd.f32 1.0, %v3060_v38 }
 0x1d3   :  { %v3064_v26 = vpop.eup %3063  ;;  %3077 = vpow2.f32 %v2491_v48  ;;  %v540_v59 = vmul.f32 %v3811_v62, %v517_v56  ;;  %v518_v37 = vmul.f32 %v3062_v58, %v502_v51 }
 0x1d4   :  { %v3066_v5 = vpop.eup %3065  ;;  %v666_v61 = vmul.f32 %v3064_v26, %v3884_v55  ;;  %3079 = vrcp.f32 %v621_v57 }
 0x1d5   :  { %v622_v23 = vadd.f32 1.0, %v3066_v5  ;;  %v563_v63 = vadd.f32 %v3820_v6, %v540_v59  ;;  %v541_v52 = vmul.f32 %v3811_v62, %v518_v37 }
 0x1d6   :  { %v3068_v36 = vpop.eup %3067  ;;  %2780 = vmatmul.mubr.f32.gmra.mxu1 %v666_v61  ;;  %v1219_v61 = vld [vmem:[#allocation2 + $0x78] sm:$0xff] }
 0x1d7   :  { %3081 = vrcp.f32 %v622_v23  ;;  %v623_v45 = vadd.f32 1.0, %v3068_v36  ;;  %v2492_v9 = vmul.f32 -1.442695, %v563_v63  ;;  %v564_v0 = vadd.f32 %v3820_v6, %v541_v52  ;;  %2797 = vmatprep.subr.mxu0 %v1219_v61  ;;  %v1217_v36 = vld [vmem:[#allocation2 + $0x68] sm:$0xff] }
 0x1d8   :  { %v3070_v1 = vpop.eup %3069  ;;  %2798 = vmatpush3.msra.mxu0 %v1219_v61 }
 0x1d9   :  { %3083 = vrcp.f32 %v623_v45  ;;  %v624_v2 = vadd.f32 1.0, %v3070_v1  ;;  %v2493_v3 = vmul.f32 -1.442695, %v564_v0  ;;  %v1215_v1 = vld [vmem:[#allocation2 + $0x58] sm:$0xff] }
 0x1da   :  { %3085 = vpow2.f32 %v2492_v9 }
 0x1db   :  { %v3072_v24 = vpop.eup %3071  ;;  %3087 = vrcp.f32 %v624_v2 }
 0x1dc   :  { %v3074_v55 = vpop.eup %3073  ;;  %v667_v12 = vmul.f32 %v3072_v24, %v3895_v34  ;;  %3089 = vpow2.f32 %v2493_v3  ;;  %v1214_v3 = vld [vmem:[#allocation2 + $0x50] sm:$0xff] }
 0x1dd   :  { %v668_v62 = vmul.f32 %v3074_v55, %v3905_v15  ;;  %v1213_v55 = vld [vmem:[#allocation2 + $0x48] sm:$0xff] }
 0x1de   :  { %v3076_v8 = vpop.eup %3075  ;;  %2782 = vmatprep.mubr.f32.mxu1 %v667_v12 }
 0x1df   :  { %2783 = vmatmul.mubr.f32.gmra.mxu1 %v668_v62  ;;  %v625_v42 = vadd.f32 1.0, %v3076_v8  ;;  %v1212_v62 = vld [vmem:[#allocation2 + $0x40] sm:$0xff]  ;;  %v1211_v8 = vld [vmem:[#allocation2 + $0x38] sm:$0xff] }
 0x1e0   :  { %v3078_v17 = vpop.eup %3077 }
 0x1e1   :  { %v3080_v10 = vpop.eup %3079  ;;  %3091 = vrcp.f32 %v625_v42  ;;  %v626_v6 = vadd.f32 1.0, %v3078_v17  ;;  %v1210_v42 = vld [vmem:[#allocation2 + $0x30] sm:$0xff]  ;;  %v1209_v17 = vld [vmem:[#allocation2 + $0x28] sm:$0xff] }
 0x1e2   :  { %v669_v11 = vmul.f32 %v3080_v10, %v3921_v60  ;;  %v1208_v10 = vld [vmem:[#allocation2 + $0x20] sm:$0xff] }
 0x1e3   :  { %3093 = vrcp.f32 %v626_v6  ;;  %v1207_v6 = vld [vmem:[#allocation2 + $0x18] sm:$0xff] }
 0x1e4   :  { %v3082_v33 = vpop.eup %3081  ;;  %2785 = vmatprep.mubr.f32.mxu1 %v669_v11  ;;  %v1206_v11 = vld [vmem:[#allocation2 + $0x10] sm:$0xff] }
 0x1e5   :  { %v670_v16 = vmul.f32 %v3082_v33, %v3930_v7  ;;  %v1205_v33 = vld [vmem:[#allocation2 + $0x8] sm:$0xff] }
 0x1e6   :  { %v3084_v50 = vpop.eup %3083 }
 0x1e7   :  { %v3086_v34 = vpop.eup %3085  ;;  %2786 = vmatmul.mubr.f32.gmra.mxu1 %v670_v16  ;;  %v671_v15 = vmul.f32 %v3084_v50, %v3935_v35  ;;  %v1204_v16 = vld [vmem:[#allocation2] sm:$0xff] }
 0x1e8   :  { %v3088_v13 = vpop.eup %3087  ;;  %v627_v14 = vadd.f32 1.0, %v3086_v34 }
 0x1e9   :  { %v3090_v19 = vpop.eup %3089  ;;  %2788 = vmatprep.mubr.f32.mxu1 %v671_v15  ;;  %v672_v20 = vmul.f32 %v3088_v13, %v3942_v18 }
 0x1ea   :  { %3095 = vrcp.f32 %v627_v14  ;;  %v628_v21 = vadd.f32 1.0, %v3090_v19 }
 0x1eb   :  { %2789 = vmatmul.mubr.f32.gmra.mxu1 %v672_v20 }
 0x1ec   :  { %3097 = vrcp.f32 %v628_v21 }
 0x1ee   :  { %v3092_v60 = vpop.eup %3091 }
 0x1ef   :  { %v673_v30 = vmul.f32 %v3092_v60, %v3951_v43 }
 0x1f0   :  { %v3094_v54 = vpop.eup %3093 }
 0x1f1   :  { %2791 = vmatprep.mubr.f32.mxu1 %v673_v30  ;;  %v674_v7 = vmul.f32 %v3094_v54, %v3958_v29 }
 0x1f3   :  { %2792 = vmatmul.mubr.f32.gmra.mxu1 %v674_v7 }
 0x1f7   :  { %v3096_v25 = vpop.eup %3095 }
 0x1f8   :  { %v675_v35 = vmul.f32 %v3096_v25, %v563_v63  ;;  %v1218_v63 = vld [vmem:[#allocation2 + $0x70] sm:$0xff] }
 0x1f9   :  { %v3098_v31 = vpop.eup %3097  ;;  %2799 = vmatprep.subr.mxu0 %v1218_v63 }
 0x1fa   :  { %2794 = vmatprep.mubr.f32.mxu1 %v675_v35  ;;  %v676_v49 = vmul.f32 %v3098_v31, %v564_v0  ;;  %2800 = vmatpush3.msra.mxu0 %v1218_v63  ;;  %v1216_v0 = vld [vmem:[#allocation2 + $0x60] sm:$0xff] }
 0x1fb   :  { %2801 = vmatprep.subr.mxu0 %v1217_v36 }
 0x1fc   :  { %2795 = vmatmul.mubr.f32.gmra.mxu1 %v676_v49  ;;  %2802 = vmatpush3.msra.mxu0 %v1217_v36 }
 0x1fd   :  { %2803 = vmatprep.subr.mxu0 %v1216_v0 }
 0x1fe   :  { %2804 = vmatpush3.msra.mxu0 %v1216_v0 }
 0x1ff   :  { %2805 = vmatprep.subr.mxu0 %v1215_v1 }
 0x200   :  { %2806 = vmatpush3.msra.mxu0 %v1215_v1 }
 0x201   :  { %2807 = vmatprep.subr.mxu0 %v1214_v3 }
 0x202   :  { %2808 = vmatpush3.msra.mxu0 %v1214_v3 }
 0x203   :  { %2809 = vmatprep.subr.mxu0 %v1213_v55 }
 0x204   :  { %2810 = vmatpush3.msra.mxu0 %v1213_v55 }
 0x205   :  { %2811 = vmatprep.subr.mxu0 %v1212_v62 }
 0x206   :  { %2812 = vmatpush3.msra.mxu0 %v1212_v62 }
 0x207   :  { %2813 = vmatprep.subr.mxu0 %v1211_v8 }
 0x208   :  { %2814 = vmatpush3.msra.mxu0 %v1211_v8 }
 0x209   :  { %2815 = vmatprep.subr.mxu0 %v1210_v42 }
 0x20a   :  { %2816 = vmatpush3.msra.mxu0 %v1210_v42  ;;  %v4073_v42 = vld [vmem:[%s4756_s5] ss:$0 sm:$0xff] }
 0x20b   :  { %2817 = vmatprep.subr.mxu0 %v1209_v17 }
 0x20c   :  { %2818 = vmatpush3.msra.mxu0 %v1209_v17 }
 0x20d   :  { %2819 = vmatprep.subr.mxu0 %v1208_v10 }
 0x20e   :  { %2820 = vmatpush3.msra.mxu0 %v1208_v10 }
 0x20f   :  { %2821 = vmatprep.subr.mxu0 %v1207_v6 }
 0x210   :  { %2822 = vmatpush3.msra.mxu0 %v1207_v6 }
 0x211   :  { %2823 = vmatprep.subr.mxu0 %v1206_v11 }
 0x212   :  { %2824 = vmatpush3.msra.mxu0 %v1206_v11 }
 0x213   :  { %2825 = vmatprep.subr.mxu0 %v1205_v33 }
 0x214   :  { %2826 = vmatpush3.msra.mxu0 %v1205_v33 }
 0x215   :  { %2827 = vmatprep.subr.mxu0 %v1204_v16 }
 0x216   :  { %2828 = vmatpush3.msra.mxu0 %v1204_v16 }
 0x285   :  { %v3977_v53 = vpop.f32.mrf.mxu1 }
 0x286   :  { %840 = vadd.xlane.f32.xlu1 %v3977_v53  ;;  %v887_v41 = vmul.f32 %v3977_v53, %v3977_v53 }
 0x287   :  { %v3980_v18 = vpop.f32.mrf.mxu1 }
 0x288   :  { %838 = vadd.xlane.f32.xlu0 %v3980_v18  ;;  %v886_v40 = vmul.f32 %v3980_v18, %v3980_v18 }
 0x28a   :  { %904 = vadd.xlane.f32.xlu1 %v887_v41 }
 0x28c   :  { %v3987_v32 = vpop.f32.mrf.mxu1  ;;  %902 = vadd.xlane.f32.xlu0 %v886_v40 }
 0x28d   :  { %v889_v39 = vmul.f32 %v3987_v32, %v3987_v32 }
 0x28e   :  { %v3989_v27 = vpop.f32.mrf.mxu1  ;;  %844 = vadd.xlane.f32.xlu1 %v3987_v32 }
 0x28f   :  { %v888_v43 = vmul.f32 %v3989_v27, %v3989_v27 }
 0x290   :  { %842 = vadd.xlane.f32.xlu0 %v3989_v27 }
 0x292   :  { %908 = vadd.xlane.f32.xlu1 %v889_v39 }
 0x294   :  { %906 = vadd.xlane.f32.xlu0 %v888_v43 }
 0x296   :  { %v3997_v46 = vpop.f32.mrf.mxu1 }
 0x297   :  { %848 = vadd.xlane.f32.xlu1 %v3997_v46  ;;  %v891_v44 = vmul.f32 %v3997_v46, %v3997_v46 }
 0x298   :  { %v4000_v28 = vpop.f32.mrf.mxu1 }
 0x299   :  { %846 = vadd.xlane.f32.xlu0 %v4000_v28  ;;  %v890_v4 = vmul.f32 %v4000_v28, %v4000_v28 }
 0x29b   :  { %912 = vadd.xlane.f32.xlu1 %v891_v44 }
 0x29d   :  { %910 = vadd.xlane.f32.xlu0 %v890_v4 }
 0x29f   :  { %v4007_v29 = vpop.f32.mrf.mxu1 }
 0x2a0   :  { %852 = vadd.xlane.f32.xlu1 %v4007_v29  ;;  %v893_v47 = vmul.f32 %v4007_v29, %v4007_v29 }
 0x2a1   :  { %v4010_v22 = vpop.f32.mrf.mxu1 }
 0x2a2   :  { %850 = vadd.xlane.f32.xlu0 %v4010_v22  ;;  %v892_v38 = vmul.f32 %v4010_v22, %v4010_v22 }
 0x2a4   :  { %916 = vadd.xlane.f32.xlu1 %v893_v47 }
 0x2a6   :  { %914 = vadd.xlane.f32.xlu0 %v892_v38 }
 0x2a7   :  { %v4017_v51 = vpop.f32.mrf.mxu1 }
 0x2a8   :  { %856 = vadd.xlane.f32.xlu1 %v4017_v51  ;;  %v895_v56 = vmul.f32 %v4017_v51, %v4017_v51 }
 0x2a9   :  { %v4020_v48 = vpop.f32.mrf.mxu1 }
 0x2aa   :  { %854 = vadd.xlane.f32.xlu0 %v4020_v48  ;;  %v894_v57 = vmul.f32 %v4020_v48, %v4020_v48 }
 0x2ab   :  { %v4025_v58 = vpop.f32.mrf.mxu1 }
 0x2ac   :  { %920 = vadd.xlane.f32.xlu1 %v895_v56  ;;  %v897_v59 = vmul.f32 %v4025_v58, %v4025_v58 }
 0x2ad   :  { %v4029_v26 = vpop.f32.mrf.mxu1 }
 0x2ae   :  { %918 = vadd.xlane.f32.xlu0 %v894_v57  ;;  %v896_v5 = vmul.f32 %v4029_v26, %v4029_v26 }
 0x2b0   :  { %860 = vadd.xlane.f32.xlu1 %v4025_v58 }
 0x2b2   :  { %858 = vadd.xlane.f32.xlu0 %v4029_v26 }
 0x2b3   :  { %v4035_v37 = vpop.f32.mrf.mxu1 }
 0x2b4   :  { %924 = vadd.xlane.f32.xlu1 %v897_v59  ;;  %v899_v52 = vmul.f32 %v4035_v37, %v4035_v37 }
 0x2b5   :  { %v4039_v23 = vpop.f32.mrf.mxu1 }
 0x2b6   :  { %922 = vadd.xlane.f32.xlu0 %v896_v5  ;;  %v898_v45 = vmul.f32 %v4039_v23, %v4039_v23 }
 0x2b8   :  { %864 = vadd.xlane.f32.xlu1 %v4035_v37 }
 0x2ba   :  { %862 = vadd.xlane.f32.xlu0 %v4039_v23 }
 0x2bc   :  { %928 = vadd.xlane.f32.xlu1 %v899_v52  ;;  %v4047_v9 = vpop.f32.mrf.mxu1 }
 0x2bd   :  { %v901_v24 = vmul.f32 %v4047_v9, %v4047_v9 }
 0x2be   :  { %926 = vadd.xlane.f32.xlu0 %v898_v45  ;;  %v4049_v2 = vpop.f32.mrf.mxu1 }
 0x2bf   :  { %v900_v12 = vmul.f32 %v4049_v2, %v4049_v2 }
 0x2c0   :  { %868 = vadd.xlane.f32.xlu1 %v4047_v9 }
 0x2c2   :  { %866 = vadd.xlane.f32.xlu0 %v4049_v2 }
 0x2c4   :  { %932 = vadd.xlane.f32.xlu1 %v901_v24 }
 0x2c6   :  { %930 = vadd.xlane.f32.xlu0 %v900_v12 }
 0x30f   :  { %v841_v50 = vpop.xlane.xlu1 %840 }
 0x310   :  { %v871_v34 = vmul.f32 0.0078125, %v841_v50 }
 0x311   :  { %v839_v15 = vpop.xlane.xlu0 %838 }
 0x312   :  { %v870_v13 = vmul.f32 0.0078125, %v839_v15  ;;  %v951_v19 = vmul.f32 %v871_v34, %v871_v34  ;;  %v1015_v3 = vsub.f32 %v3977_v53, %v871_v34  ;;  %v4081_v34 = vld [vmem:[%s4757_s6] ss:$0 sm:$0xff] }
 0x313   :  { %v905_v14 = vpop.xlane.xlu1 %904 }
 0x314   :  { %v935_v20 = vmul.f32 0.0078125, %v905_v14  ;;  %v950_v60 = vmul.f32 %v870_v13, %v870_v13  ;;  %v1014_v17 = vsub.f32 %v3980_v18, %v870_v13 }
 0x315   :  { %v903_v21 = vpop.xlane.xlu0 %902 }
 0x316   :  { %v967_v30 = vsub.f32 %v935_v20, %v951_v19  ;;  %v934_v54 = vmul.f32 0.0078125, %v903_v21 }
 0x317   :  { %v845_v7 = vpop.xlane.xlu1 %844 }
 0x318   :  { %v983_v25 = vadd.f32 0.001, %v967_v30  ;;  %v966_v35 = vsub.f32 %v934_v54, %v950_v60  ;;  %v873_v31 = vmul.f32 0.0078125, %v845_v7 }
 0x319   :  { %v843_v49 = vpop.xlane.xlu0 %842 }
 0x31a   :  { %3099 = vrsqrt.f32 %v983_v25  ;;  %v982_v41 = vadd.f32 0.001, %v966_v35  ;;  %v4057_v40 = vmul.f32 0.0078125, %v843_v49  ;;  %v953_v43 = vmul.f32 %v873_v31, %v873_v31 }
 0x31b   :  { %v909_v39 = vpop.xlane.xlu1 %908  ;;  %v1017_v60 = vsub.f32 %v3987_v32, %v873_v31 }
 0x31c   :  { %3101 = vrsqrt.f32 %v982_v41  ;;  %v937_v44 = vmul.f32 0.0078125, %v909_v39  ;;  %v952_v47 = vmul.f32 %v4057_v40, %v4057_v40  ;;  %v1016_v31 = vsub.f32 %v3989_v27, %v4057_v40 }
 0x31d   :  { %v907_v4 = vpop.xlane.xlu0 %906 }
 0x31e   :  { %v969_v38 = vsub.f32 %v937_v44, %v953_v43  ;;  %v936_v56 = vmul.f32 0.0078125, %v907_v4 }
 0x320   :  { %v985_v57 = vadd.f32 0.001, %v969_v38  ;;  %v968_v59 = vsub.f32 %v936_v56, %v952_v47  ;;  %v849_v5 = vpop.xlane.xlu1 %848 }
 0x321   :  { %v4061_v61 = vmul.f32 0.0078125, %v849_v5 }
 0x322   :  { %3103 = vrsqrt.f32 %v985_v57  ;;  %v984_v63 = vadd.f32 0.001, %v968_v59  ;;  %v847_v52 = vpop.xlane.xlu0 %846 }
 0x323   :  { %v4063_v36 = vmul.f32 0.0078125, %v847_v52  ;;  %v955_v0 = vmul.f32 %v4061_v61, %v4061_v61 }
 0x324   :  { %3105 = vrsqrt.f32 %v984_v63  ;;  %v913_v45 = vpop.xlane.xlu1 %912 }
 0x325   :  { %v939_v1 = vmul.f32 0.0078125, %v913_v45  ;;  %v954_v12 = vmul.f32 %v4063_v36, %v4063_v36 }
 0x326   :  { %v911_v24 = vpop.xlane.xlu0 %910 }
 0x327   :  { %v3100_v55 = vpop.eup %3099  ;;  %v971_v62 = vsub.f32 %v939_v1, %v955_v0  ;;  %v938_v8 = vmul.f32 0.0078125, %v911_v24  ;;  %v1019_v24 = vsub.f32 %v3997_v46, %v4061_v61 }
 0x328   :  { %v1031_v10 = vmul.f32 %v3100_v55, %v1015_v3 }
 0x329   :  { %v3102_v6 = vpop.eup %3101  ;;  %v987_v11 = vadd.f32 0.001, %v971_v62  ;;  %v970_v33 = vsub.f32 %v938_v8, %v954_v12  ;;  %v853_v16 = vpop.xlane.xlu1 %852 }
 0x32a   :  { %v4076_v53 = vmul.f32 0.0078125, %v853_v16  ;;  %v1030_v50 = vmul.f32 %v3102_v6, %v1014_v17  ;;  %v1054_v15 = vmul.f32 %v4073_v42, %v1031_v10 }
 0x32b   :  { %3107 = vrsqrt.f32 %v987_v11  ;;  %v986_v14 = vadd.f32 0.001, %v970_v33  ;;  %v851_v19 = vpop.xlane.xlu0 %850  ;;  %v1018_v11 = vsub.f32 %v4000_v28, %v4063_v36 }
 0x32c   :  { %v4084_v20 = vmul.f32 0.0078125, %v851_v19  ;;  %v1053_v18 = vmul.f32 %v4073_v42, %v1030_v50  ;;  %v4088_v21 = vadd.f32 %v4081_v34, %v1054_v15  ;;  %v957_v30 = vmul.f32 %v4076_v53, %v4076_v53 }
 0x32d   :  { %3109 = vrsqrt.f32 %v986_v14  ;;  %v917_v13 = vpop.xlane.xlu1 %916 }
 0x32e   :  { %v941_v54 = vmul.f32 0.0078125, %v917_v13  ;;  %v4094_v7 = vadd.f32 %v4081_v34, %v1053_v18  ;;  %v956_v35 = vmul.f32 %v4084_v20, %v4084_v20  ;;  %v2497_v41 = vmul.f32 -1.442695, %v4088_v21 }
 0x32f   :  { %v3104_v25 = vpop.eup %3103  ;;  %v915_v49 = vpop.xlane.xlu0 %914 }
 0x330   :  { %v973_v39 = vsub.f32 %v941_v54, %v957_v30  ;;  %v940_v43 = vmul.f32 0.0078125, %v915_v49  ;;  %v2496_v44 = vmul.f32 -1.442695, %v4094_v7  ;;  %v1033_v4 = vmul.f32 %v3104_v25, %v1017_v60 }
 0x331   :  { %v3106_v32 = vpop.eup %3105  ;;  %v857_v47 = vpop.xlane.xlu1 %856  ;;  %3111 = vpow2.f32 %v2497_v41 }
 0x332   :  { %v989_v38 = vadd.f32 0.001, %v973_v39  ;;  %v972_v56 = vsub.f32 %v940_v43, %v956_v35  ;;  %v4102_v57 = vmul.f32 0.0078125, %v857_v47  ;;  %3113 = vpow2.f32 %v2496_v44 }
 0x333   :  { %v855_v59 = vpop.xlane.xlu0 %854  ;;  %v1032_v5 = vmul.f32 %v3106_v32, %v1016_v31  ;;  %v1056_v63 = vmul.f32 %v4073_v42, %v1033_v4 }
 0x334   :  { %3115 = vrsqrt.f32 %v989_v38  ;;  %v988_v52 = vadd.f32 0.001, %v972_v56  ;;  %v4105_v45 = vmul.f32 0.0078125, %v855_v59  ;;  %v959_v40 = vmul.f32 %v4102_v57, %v4102_v57 }
 0x335   :  { %v921_v0 = vpop.xlane.xlu1 %920  ;;  %v1055_v1 = vmul.f32 %v4073_v42, %v1032_v5  ;;  %v4109_v27 = vadd.f32 %v4081_v34, %v1056_v63  ;;  %v1021_v56 = vsub.f32 %v4007_v29, %v4076_v53 }
 0x336   :  { %3117 = vrsqrt.f32 %v988_v52  ;;  %v943_v3 = vmul.f32 0.0078125, %v921_v0  ;;  %v958_v17 = vmul.f32 %v4105_v45, %v4105_v45 }
 0x337   :  { %v919_v55 = vpop.xlane.xlu0 %918  ;;  %v4116_v12 = vadd.f32 %v4081_v34, %v1055_v1  ;;  %v2499_v62 = vmul.f32 -1.442695, %v4109_v27 }
 0x338   :  { %v3108_v8 = vpop.eup %3107  ;;  %v975_v10 = vsub.f32 %v943_v3, %v959_v40  ;;  %v942_v6 = vmul.f32 0.0078125, %v919_v55  ;;  %v1020_v3 = vsub.f32 %v4010_v22, %v4084_v20 }
 0x339   :  { %v861_v33 = vpop.xlane.xlu1 %860  ;;  %v2498_v16 = vmul.f32 -1.442695, %v4116_v12  ;;  %3119 = vpow2.f32 %v2499_v62  ;;  %v1035_v46 = vmul.f32 %v3108_v8, %v1019_v24 }
 0x33a   :  { %v3110_v61 = vpop.eup %3109  ;;  %v991_v50 = vadd.f32 0.001, %v975_v10  ;;  %v974_v15 = vsub.f32 %v942_v6, %v958_v17  ;;  %v4124_v14 = vmul.f32 0.0078125, %v861_v33 }
 0x33b   :  { %v859_v19 = vpop.xlane.xlu0 %858  ;;  %3121 = vpow2.f32 %v2498_v16  ;;  %v1034_v18 = vmul.f32 %v3110_v61, %v1018_v11  ;;  %v1058_v13 = vmul.f32 %v4073_v42, %v1035_v46 }
 0x33c   :  { %3123 = vrsqrt.f32 %v991_v50  ;;  %v990_v60 = vadd.f32 0.001, %v974_v15  ;;  %v4127_v30 = vmul.f32 0.0078125, %v859_v19  ;;  %v961_v35 = vmul.f32 %v4124_v14, %v4124_v14 }
 0x33d   :  { %v925_v28 = vpop.xlane.xlu1 %924  ;;  %v1057_v36 = vmul.f32 %v4073_v42, %v1034_v18  ;;  %v4131_v54 = vadd.f32 %v4081_v34, %v1058_v13  ;;  %v1023_v18 = vsub.f32 %v4017_v51, %v4102_v57  ;;  %v1022_v13 = vsub.f32 %v4020_v48, %v4105_v45 }
 0x33e   :  { %v3112_v25 = vpop.eup %3111  ;;  %3125 = vrsqrt.f32 %v990_v60  ;;  %v945_v49 = vmul.f32 0.0078125, %v925_v28  ;;  %v960_v4 = vmul.f32 %v4127_v30, %v4127_v30 }
 0x33f   :  { %v3114_v41 = vpop.eup %3113  ;;  %v923_v39 = vpop.xlane.xlu0 %922  ;;  %v1141_v43 = vadd.f32 1.0, %v3112_v25  ;;  %v4136_v44 = vadd.f32 %v4081_v34, %v1057_v36  ;;  %v2501_v63 = vmul.f32 -1.442695, %v4131_v54 }
 0x340   :  { %v977_v32 = vsub.f32 %v945_v49, %v961_v35  ;;  %v944_v31 = vmul.f32 0.0078125, %v923_v39  ;;  %v1140_v47 = vadd.f32 1.0, %v3114_v41 }
 0x341   :  { %v3116_v38 = vpop.eup %3115  ;;  %v865_v59 = vpop.xlane.xlu1 %864  ;;  %3127 = vrcp.f32 %v1141_v43  ;;  %v2500_v5 = vmul.f32 -1.442695, %v4136_v44 }
 0x342   :  { %v993_v52 = vadd.f32 0.001, %v977_v32  ;;  %v976_v0 = vsub.f32 %v944_v31, %v960_v4  ;;  %v4144_v1 = vmul.f32 0.0078125, %v865_v59  ;;  %3129 = vrcp.f32 %v1140_v47 }
 0x343   :  { %v3118_v40 = vpop.eup %3117  ;;  %v863_v24 = vpop.xlane.xlu0 %862  ;;  %3131 = vpow2.f32 %v2500_v5  ;;  %v1037_v55 = vmul.f32 %v3116_v38, %v1021_v56  ;;  %v1025_v5 = vsub.f32 %v4025_v58, %v4124_v14 }
 0x344   :  { %3133 = vrsqrt.f32 %v993_v52  ;;  %v992_v29 = vadd.f32 0.001, %v976_v0  ;;  %v4148_v53 = vmul.f32 0.0078125, %v863_v24  ;;  %v1036_v8 = vmul.f32 %v3118_v40, %v1020_v3 }
 0x345   :  { %v929_v62 = vpop.xlane.xlu1 %928  ;;  %3135 = vpow2.f32 %v2501_v63  ;;  %v1060_v17 = vmul.f32 %v4073_v42, %v1037_v55  ;;  %v963_v6 = vmul.f32 %v4144_v1, %v4144_v1 }
 0x346   :  { %v3120_v10 = vpop.eup %3119  ;;  %3137 = vrsqrt.f32 %v992_v29  ;;  %v947_v11 = vmul.f32 0.0078125, %v929_v62  ;;  %v1059_v20 = vmul.f32 %v4073_v42, %v1036_v8  ;;  %v962_v46 = vmul.f32 %v4148_v53, %v4148_v53 }
 0x347   :  { %v927_v33 = vpop.xlane.xlu0 %926  ;;  %v1143_v22 = vadd.f32 1.0, %v3120_v10  ;;  %v4157_v15 = vadd.f32 %v4081_v34, %v1060_v17  ;;  %v1024_v62 = vsub.f32 %v4029_v26, %v4127_v30 }
 0x348   :  { %v3122_v16 = vpop.eup %3121  ;;  %v979_v61 = vsub.f32 %v947_v11, %v963_v6  ;;  %v946_v50 = vmul.f32 0.0078125, %v927_v33  ;;  %v4164_v36 = vadd.f32 %v4081_v34, %v1059_v20 }
 0x349   :  { %v3124_v19 = vpop.eup %3123  ;;  %v869_v60 = vpop.xlane.xlu1 %868  ;;  %v1142_v28 = vadd.f32 1.0, %v3122_v16  ;;  %3139 = vrcp.f32 %v1143_v22  ;;  %v2503_v51 = vmul.f32 -1.442695, %v4157_v15 }
 0x34a   :  { %v995_v25 = vadd.f32 0.001, %v979_v61  ;;  %v978_v35 = vsub.f32 %v946_v50, %v962_v46  ;;  %v4166_v49 = vmul.f32 0.0078125, %v869_v60  ;;  %v2502_v43 = vmul.f32 -1.442695, %v4164_v36 }
 0x34b   :  { %v3126_v41 = vpop.eup %3125  ;;  %v867_v39 = vpop.xlane.xlu0 %866  ;;  %3141 = vrcp.f32 %v1142_v28  ;;  %v1039_v57 = vmul.f32 %v3124_v19, %v1023_v18  ;;  %v1027_v18 = vsub.f32 %v4035_v37, %v4144_v1 }
 0x34c   :  { %3143 = vrsqrt.f32 %v995_v25  ;;  %v994_v48 = vadd.f32 0.001, %v978_v35  ;;  %v4170_v45 = vmul.f32 0.0078125, %v867_v39  ;;  %v1038_v32 = vmul.f32 %v3126_v41, %v1022_v13 }
 0x34d   :  { %v933_v4 = vpop.xlane.xlu1 %932  ;;  %3145 = vpow2.f32 %v2502_v43  ;;  %v1062_v31 = vmul.f32 %v4073_v42, %v1039_v57  ;;  %v965_v38 = vmul.f32 %v4166_v49, %v4166_v49  ;;  %v1026_v41 = vsub.f32 %v4039_v23, %v4148_v53 }
 0x34e   :  { %v3128_v47 = vpop.eup %3127  ;;  %3147 = vrsqrt.f32 %v994_v48  ;;  %v949_v56 = vmul.f32 0.0078125, %v933_v4  ;;  %v964_v63 = vmul.f32 %v4170_v45, %v4170_v45  ;;  %v1061_v55 = vmul.f32 %v4073_v42, %v1038_v32 }
 0x34f   :  { %v3130_v59 = vpop.eup %3129  ;;  %v931_v52 = vpop.xlane.xlu0 %930  ;;  %3149 = vpow2.f32 %v2503_v51  ;;  %v1189_v8 = vmul.f32 %v3128_v47, %v4088_v21  ;;  %v4185_v58 = vadd.f32 %v4081_v34, %v1062_v31  ;;  %v1029_v53 = vsub.f32 %v4047_v9, %v4166_v49 }
 0x350   :  { %v3132_v0 = vpop.eup %3131  ;;  %v981_v40 = vsub.f32 %v949_v56, %v965_v38  ;;  %v948_v3 = vmul.f32 0.0078125, %v931_v52  ;;  %v1188_v24 = vmul.f32 %v3130_v59, %v4094_v7  ;;  %v4188_v11 = vadd.f32 %v4081_v34, %v1061_v55 }
 0x351   :  { %v3134_v29 = vpop.eup %3133  ;;  %v1144_v17 = vadd.f32 1.0, %v3132_v0  ;;  %v2505_v26 = vmul.f32 -1.442695, %v4185_v58 }
 0x352   :  { %v3136_v14 = vpop.eup %3135  ;;  %v997_v10 = vadd.f32 0.001, %v981_v40  ;;  %v980_v6 = vsub.f32 %v948_v3, %v964_v63  ;;  %2829 = vmatprep.mubr.f32.mxu0 %v1188_v24  ;;  %v1041_v7 = vmul.f32 %v3134_v29, %v1025_v5  ;;  %v2504_v30 = vmul.f32 -1.442695, %v4188_v11 }
 0x353   :  { %v3138_v33 = vpop.eup %3137  ;;  %2830 = vmatmul.mubr.f32.vlgmr.msra.gmra.mxu0 %v1189_v8  ;;  %3151 = vrcp.f32 %v1144_v17  ;;  %v1145_v22 = vadd.f32 1.0, %v3136_v14  ;;  %v1028_v5 = vsub.f32 %v4049_v2, %v4170_v45 }
 0x354   :  { %3153 = vrsqrt.f32 %v997_v10  ;;  %v996_v21 = vadd.f32 0.001, %v980_v6  ;;  %v1040_v20 = vmul.f32 %v3138_v33, %v1024_v62  ;;  %v1064_v16 = vmul.f32 %v4073_v42, %v1041_v7 }
 0x355   :  { %3155 = vrcp.f32 %v1145_v22 }
 0x356   :  { %3157 = vrsqrt.f32 %v996_v21  ;;  %v1063_v46 = vmul.f32 %v4073_v42, %v1040_v20  ;;  %v3140_v61 = vpop.eup %3139  ;;  %v4195_v50 = vadd.f32 %v4081_v34, %v1064_v16 }
 0x357   :  { %3159 = vpow2.f32 %v2504_v30  ;;  %v1191_v39 = vmul.f32 %v3140_v61, %v4109_v27 }
 0x358   :  { %v3142_v19 = vpop.eup %3141  ;;  %3161 = vpow2.f32 %v2505_v26  ;;  %v4200_v13 = vadd.f32 %v4081_v34, %v1063_v46  ;;  %v2507_v25 = vmul.f32 -1.442695, %v4195_v50 }
 0x359   :  { %v3144_v60 = vpop.eup %3143  ;;  %v1190_v28 = vmul.f32 %v3142_v19, %v4116_v12 }
 0x35a   :  { %v3146_v35 = vpop.eup %3145  ;;  %v2506_v43 = vmul.f32 -1.442695, %v4200_v13  ;;  %v1043_v51 = vmul.f32 %v3144_v60, %v1027_v18  ;;  %3163 = vpow2.f32 %v2507_v25 }
 0x35b   :  { %v3148_v57 = vpop.eup %3147  ;;  %2832 = vmatprep.mubr.f32.mxu0 %v1190_v28  ;;  %v1146_v37 = vadd.f32 1.0, %v3146_v35 }
 0x35c   :  { %v3150_v1 = vpop.eup %3149  ;;  %2833 = vmatmul.mubr.f32.gmra.mxu0 %v1191_v39  ;;  %3165 = vpow2.f32 %v2506_v43  ;;  %v1042_v48 = vmul.f32 %v3148_v57, %v1026_v41  ;;  %v1066_v12 = vmul.f32 %v4073_v42, %v1043_v51 }
 0x35d   :  { %3167 = vrcp.f32 %v1146_v37  ;;  %v1147_v4 = vadd.f32 1.0, %v3150_v1 }
 0x35e   :  { %v1065_v32 = vmul.f32 %v4073_v42, %v1042_v48  ;;  %v4211_v23 = vadd.f32 %v4081_v34, %v1066_v12 }
 0x35f   :  { %3169 = vrcp.f32 %v1147_v4 }
 0x360   :  { %v3152_v27 = vpop.eup %3151  ;;  %v4216_v31 = vadd.f32 %v4081_v34, %v1065_v32  ;;  %v2509_v47 = vmul.f32 -1.442695, %v4211_v23 }
 0x361   :  { %v3154_v38 = vpop.eup %3153  ;;  %v1192_v56 = vmul.f32 %v3152_v27, %v4136_v44 }
 0x362   :  { %v3156_v59 = vpop.eup %3155  ;;  %v2508_v63 = vmul.f32 -1.442695, %v4216_v31  ;;  %3171 = vpow2.f32 %v2509_v47  ;;  %v1045_v52 = vmul.f32 %v3154_v38, %v1029_v53 }
 0x363   :  { %v3158_v0 = vpop.eup %3157  ;;  %2835 = vmatprep.mubr.f32.mxu0 %v1192_v56  ;;  %v1193_v9 = vmul.f32 %v3156_v59, %v4131_v54 }
 0x364   :  { %v3160_v49 = vpop.eup %3159  ;;  %3173 = vpow2.f32 %v2508_v63  ;;  %v1044_v40 = vmul.f32 %v3158_v0, %v1028_v5  ;;  %v1068_v3 = vmul.f32 %v4073_v42, %v1045_v52 }
 0x365   :  { %v3162_v24 = vpop.eup %3161  ;;  %2836 = vmatmul.mubr.f32.gmra.mxu0 %v1193_v9  ;;  %v1148_v44 = vadd.f32 1.0, %v3160_v49 }
 0x366   :  { %v1149_v55 = vadd.f32 1.0, %v3162_v24  ;;  %v1067_v29 = vmul.f32 %v4073_v42, %v1044_v40  ;;  %v1091_v2 = vadd.f32 %v4081_v34, %v1068_v3 }
 0x367   :  { %3175 = vrcp.f32 %v1148_v44  ;;  %v3164_v45 = vpop.eup %3163  ;;  %v1746_v44 = vld [vmem:[#allocation5 + $0x78] sm:$0xff] }
 0x368   :  { %3177 = vrcp.f32 %v1149_v55  ;;  %v1090_v62 = vadd.f32 %v4081_v34, %v1067_v29  ;;  %v2511_v8 = vmul.f32 -1.442695, %v1091_v2  ;;  %v1151_v17 = vadd.f32 1.0, %v3164_v45  ;;  %2853 = vmatprep.subr.mxu1 %v1746_v44  ;;  %v1745_v29 = vld [vmem:[#allocation5 + $0x70] sm:$0xff]  ;;  %v1744_v45 = vld [vmem:[#allocation5 + $0x68] sm:$0xff] }
 0x369   :  { %v3166_v54 = vpop.eup %3165  ;;  %2854 = vmatpush3.msra.mxu1 %v1746_v44 }
 0x36a   :  { %v3168_v14 = vpop.eup %3167  ;;  %v1150_v10 = vadd.f32 1.0, %v3166_v54  ;;  %v2510_v6 = vmul.f32 -1.442695, %v1090_v62  ;;  %3179 = vpow2.f32 %v2511_v8  ;;  %2855 = vmatprep.subr.mxu1 %v1745_v29  ;;  %v1743_v54 = vld [vmem:[#allocation5 + $0x60] sm:$0xff] }
 0x36b   :  { %v1194_v7 = vmul.f32 %v3168_v14, %v4164_v36  ;;  %3181 = vrcp.f32 %v1151_v17  ;;  %2856 = vmatpush3.msra.mxu1 %v1745_v29  ;;  %v1742_v14 = vld [vmem:[#allocation5 + $0x58] sm:$0xff] }
 0x36c   :  { %v3170_v33 = vpop.eup %3169  ;;  %3183 = vrcp.f32 %v1150_v10  ;;  %2857 = vmatprep.subr.mxu1 %v1744_v45  ;;  %v1741_v10 = vld [vmem:[#allocation5 + $0x50] sm:$0xff] }
 0x36d   :  { %2838 = vmatprep.mubr.f32.mxu0 %v1194_v7  ;;  %v1195_v42 = vmul.f32 %v3170_v33, %v4157_v15  ;;  %3185 = vpow2.f32 %v2510_v6  ;;  %2858 = vmatpush3.msra.mxu1 %v1744_v45  ;;  %v1740_v7 = vld [vmem:[#allocation5 + $0x48] sm:$0xff] }
 0x36e   :  { %2859 = vmatprep.subr.mxu1 %v1743_v54 }
 0x36f   :  { %v3172_v22 = vpop.eup %3171  ;;  %2839 = vmatmul.mubr.f32.gmra.mxu0 %v1195_v42  ;;  %2860 = vmatpush3.msra.mxu1 %v1743_v54  ;;  %v1739_v42 = vld [vmem:[#allocation5 + $0x40] sm:$0xff] }
 0x370   :  { %v1153_v26 = vadd.f32 1.0, %v3172_v22  ;;  %2861 = vmatprep.subr.mxu1 %v1742_v14  ;;  %v1738_v22 = vld [vmem:[#allocation5 + $0x38] sm:$0xff] }
 0x371   :  { %v3174_v34 = vpop.eup %3173  ;;  %2862 = vmatpush3.msra.mxu1 %v1742_v14 }
 0x372   :  { %v1152_v21 = vadd.f32 1.0, %v3174_v34  ;;  %3187 = vrcp.f32 %v1153_v26  ;;  %2863 = vmatprep.subr.mxu1 %v1741_v10  ;;  %v1737_v26 = vld [vmem:[#allocation5 + $0x30] sm:$0xff]  ;;  %v1736_v34 = vld [vmem:[#allocation5 + $0x28] sm:$0xff] }
 0x373   :  { %2864 = vmatpush3.msra.mxu1 %v1741_v10 }
 0x374   :  { %v3176_v30 = vpop.eup %3175  ;;  %3189 = vrcp.f32 %v1152_v21  ;;  %2865 = vmatprep.subr.mxu1 %v1740_v7  ;;  %v1735_v21 = vld [vmem:[#allocation5 + $0x20] sm:$0xff] }
 0x375   :  { %v3178_v20 = vpop.eup %3177  ;;  %v1196_v16 = vmul.f32 %v3176_v30, %v4188_v11  ;;  %2866 = vmatpush3.msra.mxu1 %v1740_v7  ;;  %v1734_v30 = vld [vmem:[#allocation5 + $0x18] sm:$0xff] }
 0x376   :  { %v1197_v36 = vmul.f32 %v3178_v20, %v4185_v58  ;;  %2867 = vmatprep.subr.mxu1 %v1739_v42  ;;  %v1733_v20 = vld [vmem:[#allocation5 + $0x10] sm:$0xff] }
 0x377   :  { %v3180_v46 = vpop.eup %3179  ;;  %2841 = vmatprep.mubr.f32.mxu0 %v1196_v16  ;;  %2868 = vmatpush3.msra.mxu1 %v1739_v42  ;;  %v1732_v16 = vld [vmem:[#allocation5 + $0x8] sm:$0xff]  ;;  %v4331_v42 = vld [vmem:[%s4759_s8] ss:$0 sm:$0xff] }
 0x378   :  { %v3182_v61 = vpop.eup %3181  ;;  %2842 = vmatmul.mubr.f32.gmra.mxu0 %v1197_v36  ;;  %v1155_v19 = vadd.f32 1.0, %v3180_v46  ;;  %2869 = vmatprep.subr.mxu1 %v1738_v22  ;;  %v1731_v36 = vld [vmem:[#allocation5] sm:$0xff] }
 0x379   :  { %v3184_v15 = vpop.eup %3183  ;;  %v1199_v28 = vmul.f32 %v3182_v61, %v4195_v50  ;;  %2870 = vmatpush3.msra.mxu1 %v1738_v22 }
 0x37a   :  { %v3186_v18 = vpop.eup %3185  ;;  %v1198_v60 = vmul.f32 %v3184_v15, %v4200_v13  ;;  %3191 = vrcp.f32 %v1155_v19  ;;  %2871 = vmatprep.subr.mxu1 %v1737_v26 }
 0x37b   :  { %v1154_v25 = vadd.f32 1.0, %v3186_v18  ;;  %2872 = vmatpush3.msra.mxu1 %v1737_v26 }
 0x37c   :  { %2844 = vmatprep.mubr.f32.mxu0 %v1198_v60  ;;  %2873 = vmatprep.subr.mxu1 %v1736_v34 }
 0x37d   :  { %2845 = vmatmul.mubr.f32.gmra.mxu0 %v1199_v28  ;;  %3193 = vrcp.f32 %v1154_v25  ;;  %2874 = vmatpush3.msra.mxu1 %v1736_v34 }
 0x37e   :  { %2875 = vmatprep.subr.mxu1 %v1735_v21 }
 0x37f   :  { %v3188_v35 = vpop.eup %3187  ;;  %2876 = vmatpush3.msra.mxu1 %v1735_v21 }
 0x380   :  { %v1201_v41 = vmul.f32 %v3188_v35, %v4211_v23  ;;  %2877 = vmatprep.subr.mxu1 %v1734_v30 }
 0x381   :  { %v3190_v11 = vpop.eup %3189  ;;  %2878 = vmatpush3.msra.mxu1 %v1734_v30 }
 0x382   :  { %v1200_v58 = vmul.f32 %v3190_v11, %v4216_v31  ;;  %2879 = vmatprep.subr.mxu1 %v1733_v20 }
 0x383   :  { %2880 = vmatpush3.msra.mxu1 %v1733_v20 }
 0x384   :  { %2847 = vmatprep.mubr.f32.mxu0 %v1200_v58  ;;  %2881 = vmatprep.subr.mxu1 %v1732_v16 }
 0x385   :  { %2848 = vmatmul.mubr.f32.gmra.mxu0 %v1201_v41  ;;  %2882 = vmatpush3.msra.mxu1 %v1732_v16 }
 0x386   :  { %2883 = vmatprep.subr.mxu1 %v1731_v36 }
 0x387   :  { %v3192_v39 = vpop.eup %3191  ;;  %2884 = vmatpush3.msra.mxu1 %v1731_v36 }
 0x388   :  { %v1203_v57 = vmul.f32 %v3192_v39, %v1091_v2 }
 0x38a   :  { %v3194_v43 = vpop.eup %3193 }
 0x38b   :  { %v1202_v51 = vmul.f32 %v3194_v43, %v1090_v62 }
 0x38d   :  { %2850 = vmatprep.mubr.f32.mxu0 %v1202_v51 }
 0x38e   :  { %2851 = vmatmul.mubr.f32.gmra.mxu0 %v1203_v57 }
 0x413   :  { %v4236_v50 = vpop.f32.mrf.mxu0 }
 0x414   :  { %1367 = vadd.xlane.f32.xlu1 %v4236_v50  ;;  %v1414_v37 = vmul.f32 %v4236_v50, %v4236_v50 }
 0x415   :  { %v4239_v13 = vpop.f32.mrf.mxu0 }
 0x416   :  { %1365 = vadd.xlane.f32.xlu0 %v4239_v13  ;;  %v1413_v1 = vmul.f32 %v4239_v13, %v4239_v13 }
 0x418   :  { %1431 = vadd.xlane.f32.xlu1 %v1414_v37 }
 0x41a   :  { %1429 = vadd.xlane.f32.xlu0 %v1413_v1 }
 0x41c   :  { %v4246_v48 = vpop.f32.mrf.mxu0 }
 0x41d   :  { %1371 = vadd.xlane.f32.xlu1 %v4246_v48  ;;  %v1416_v4 = vmul.f32 %v4246_v48, %v4246_v48 }
 0x41e   :  { %v4249_v12 = vpop.f32.mrf.mxu0 }
 0x41f   :  { %1369 = vadd.xlane.f32.xlu0 %v4249_v12  ;;  %v1415_v32 = vmul.f32 %v4249_v12, %v4249_v12 }
 0x421   :  { %1435 = vadd.xlane.f32.xlu1 %v1416_v4 }
 0x423   :  { %1433 = vadd.xlane.f32.xlu0 %v1415_v32 }
 0x425   :  { %v4256_v23 = vpop.f32.mrf.mxu0 }
 0x426   :  { %1375 = vadd.xlane.f32.xlu1 %v4256_v23  ;;  %v1418_v53 = vmul.f32 %v4256_v23, %v4256_v23 }
 0x427   :  { %v4259_v27 = vpop.f32.mrf.mxu0 }
 0x428   :  { %1373 = vadd.xlane.f32.xlu0 %v4259_v27  ;;  %v1417_v31 = vmul.f32 %v4259_v27, %v4259_v27 }
 0x42a   :  { %1439 = vadd.xlane.f32.xlu1 %v1418_v53 }
 0x42c   :  { %1437 = vadd.xlane.f32.xlu0 %v1417_v31 }
 0x42f   :  { %v4266_v47 = vpop.f32.mrf.mxu0 }
 0x430   :  { %1379 = vadd.xlane.f32.xlu1 %v4266_v47  ;;  %v1420_v56 = vmul.f32 %v4266_v47, %v4266_v47 }
 0x431   :  { %v4269_v38 = vpop.f32.mrf.mxu0 }
 0x432   :  { %1377 = vadd.xlane.f32.xlu0 %v4269_v38  ;;  %v1419_v59 = vmul.f32 %v4269_v38, %v4269_v38 }
 0x434   :  { %1443 = vadd.xlane.f32.xlu1 %v1420_v56 }
 0x436   :  { %1441 = vadd.xlane.f32.xlu0 %v1419_v59 }
 0x438   :  { %v4276_v5 = vpop.f32.mrf.mxu0 }
 0x439   :  { %1383 = vadd.xlane.f32.xlu1 %v4276_v5  ;;  %v1422_v52 = vmul.f32 %v4276_v5, %v4276_v5 }
 0x43a   :  { %v4279_v63 = vpop.f32.mrf.mxu0 }
 0x43b   :  { %1381 = vadd.xlane.f32.xlu0 %v4279_v63  ;;  %v1421_v0 = vmul.f32 %v4279_v63, %v4279_v63 }
 0x43d   :  { %1447 = vadd.xlane.f32.xlu1 %v1422_v52  ;;  %v4286_v9 = vpop.f32.mrf.mxu0 }
 0x43e   :  { %v1424_v40 = vmul.f32 %v4286_v9, %v4286_v9 }
 0x43f   :  { %1445 = vadd.xlane.f32.xlu0 %v1421_v0  ;;  %v4288_v49 = vpop.f32.mrf.mxu0 }
 0x440   :  { %v1423_v3 = vmul.f32 %v4288_v49, %v4288_v49 }
 0x441   :  { %1387 = vadd.xlane.f32.xlu1 %v4286_v9 }
 0x443   :  { %1385 = vadd.xlane.f32.xlu0 %v4288_v49 }
 0x445   :  { %1451 = vadd.xlane.f32.xlu1 %v1424_v40  ;;  %v4296_v24 = vpop.f32.mrf.mxu0 }
 0x446   :  { %v1426_v2 = vmul.f32 %v4296_v24, %v4296_v24 }
 0x447   :  { %1449 = vadd.xlane.f32.xlu0 %v1423_v3  ;;  %v4298_v55 = vpop.f32.mrf.mxu0 }
 0x448   :  { %v1425_v62 = vmul.f32 %v4298_v55, %v4298_v55 }
 0x449   :  { %1391 = vadd.xlane.f32.xlu1 %v4296_v24 }
 0x44b   :  { %1389 = vadd.xlane.f32.xlu0 %v4298_v55 }
 0x44d   :  { %1455 = vadd.xlane.f32.xlu1 %v1426_v2 }
 0x44e   :  { %v4306_v8 = vpop.f32.mrf.mxu0 }
 0x44f   :  { %1453 = vadd.xlane.f32.xlu0 %v1425_v62  ;;  %v1428_v6 = vmul.f32 %v4306_v8, %v4306_v8 }
 0x450   :  { %v4308_v17 = vpop.f32.mrf.mxu0 }
 0x451   :  { %1395 = vadd.xlane.f32.xlu1 %v4306_v8  ;;  %v1427_v33 = vmul.f32 %v4308_v17, %v4308_v17 }
 0x453   :  { %1393 = vadd.xlane.f32.xlu0 %v4308_v17 }
 0x455   :  { %1459 = vadd.xlane.f32.xlu1 %v1428_v6 }
 0x457   :  { %1457 = vadd.xlane.f32.xlu0 %v1427_v33 }
 0x49d   :  { %v1368_v46 = vpop.xlane.xlu1 %1367 }
 0x49e   :  { %v1398_v61 = vmul.f32 0.0078125, %v1368_v46 }
 0x49f   :  { %v1366_v19 = vpop.xlane.xlu0 %1365 }
 0x4a0   :  { %v1397_v15 = vmul.f32 0.0078125, %v1366_v19  ;;  %v1478_v60 = vmul.f32 %v1398_v61, %v1398_v61  ;;  %v1542_v54 = vsub.f32 %v4236_v50, %v1398_v61 }
 0x4a1   :  { %v1432_v18 = vpop.xlane.xlu1 %1431 }
 0x4a2   :  { %v1462_v28 = vmul.f32 0.0078125, %v1432_v18  ;;  %v1477_v35 = vmul.f32 %v1397_v15, %v1397_v15  ;;  %v1541_v7 = vsub.f32 %v4239_v13, %v1397_v15  ;;  %v4338_v13 = vld [vmem:[%s4760_s9] ss:$0 sm:$0xff] }
 0x4a3   :  { %v1430_v25 = vpop.xlane.xlu0 %1429 }
 0x4a4   :  { %v1494_v11 = vsub.f32 %v1462_v28, %v1478_v60  ;;  %v1461_v58 = vmul.f32 0.0078125, %v1430_v25 }
 0x4a6   :  { %v1510_v41 = vadd.f32 0.001, %v1494_v11  ;;  %v1493_v39 = vsub.f32 %v1461_v58, %v1477_v35  ;;  %v1372_v43 = vpop.xlane.xlu1 %1371 }
 0x4a7   :  { %v1400_v51 = vmul.f32 0.0078125, %v1372_v43 }
 0x4a8   :  { %3195 = vrsqrt.f32 %v1510_v41  ;;  %v1509_v57 = vadd.f32 0.001, %v1493_v39  ;;  %v1370_v37 = vpop.xlane.xlu0 %1369 }
 0x4a9   :  { %v4316_v1 = vmul.f32 0.0078125, %v1370_v37  ;;  %v1480_v32 = vmul.f32 %v1400_v51, %v1400_v51  ;;  %v1544_v25 = vsub.f32 %v4246_v48, %v1400_v51 }
 0x4aa   :  { %3197 = vrsqrt.f32 %v1509_v57  ;;  %v1436_v4 = vpop.xlane.xlu1 %1435 }
 0x4ab   :  { %v1464_v53 = vmul.f32 0.0078125, %v1436_v4  ;;  %v1479_v56 = vmul.f32 %v4316_v1, %v4316_v1  ;;  %v1543_v57 = vsub.f32 %v4249_v12, %v4316_v1 }
 0x4ac   :  { %v1434_v31 = vpop.xlane.xlu0 %1433 }
 0x4ad   :  { %v1496_v59 = vsub.f32 %v1464_v53, %v1480_v32  ;;  %v1463_v52 = vmul.f32 0.0078125, %v1434_v31 }
 0x4af   :  { %v1512_v0 = vadd.f32 0.001, %v1496_v59  ;;  %v1495_v40 = vsub.f32 %v1463_v52, %v1479_v56  ;;  %v1376_v3 = vpop.xlane.xlu1 %1375 }
 0x4b0   :  { %v4320_v44 = vmul.f32 0.0078125, %v1376_v3 }
 0x4b1   :  { %3199 = vrsqrt.f32 %v1512_v0  ;;  %v1511_v29 = vadd.f32 0.001, %v1495_v40  ;;  %v1374_v2 = vpop.xlane.xlu0 %1373 }
 0x4b2   :  { %v4322_v45 = vmul.f32 0.0078125, %v1374_v2  ;;  %v1482_v14 = vmul.f32 %v4320_v44, %v4320_v44 }
 0x4b3   :  { %3201 = vrsqrt.f32 %v1511_v29  ;;  %v1440_v62 = vpop.xlane.xlu1 %1439 }
 0x4b4   :  { %v1466_v10 = vmul.f32 0.0078125, %v1440_v62  ;;  %v1481_v26 = vmul.f32 %v4322_v45, %v4322_v45 }
 0x4b5   :  { %v3196_v6 = vpop.eup %3195  ;;  %v1438_v33 = vpop.xlane.xlu0 %1437 }
 0x4b6   :  { %v1558_v22 = vmul.f32 %v3196_v6, %v1542_v54  ;;  %v1498_v34 = vsub.f32 %v1466_v10, %v1482_v14  ;;  %v1465_v21 = vmul.f32 0.0078125, %v1438_v33  ;;  %v1546_v14 = vsub.f32 %v4256_v23, %v4320_v44 }
 0x4b7   :  { %v3198_v50 = vpop.eup %3197 }
 0x4b8   :  { %v1514_v30 = vadd.f32 0.001, %v1498_v34  ;;  %v1497_v20 = vsub.f32 %v1465_v21, %v1481_v26  ;;  %v1557_v16 = vmul.f32 %v3198_v50, %v1541_v7  ;;  %v1581_v36 = vmul.f32 %v4331_v42, %v1558_v22 }
 0x4b9   :  { %v1380_v46 = vpop.xlane.xlu1 %1379  ;;  %v1545_v34 = vsub.f32 %v4259_v27, %v4322_v45 }
 0x4ba   :  { %3203 = vrsqrt.f32 %v1514_v30  ;;  %v1513_v61 = vadd.f32 0.001, %v1497_v20  ;;  %v4341_v19 = vmul.f32 0.0078125, %v1380_v46  ;;  %v1580_v15 = vmul.f32 %v4331_v42, %v1557_v16 }
 0x4bb   :  { %v1378_v18 = vpop.xlane.xlu0 %1377  ;;  %v4345_v60 = vadd.f32 %v4338_v13, %v1581_v36 }
 0x4bc   :  { %3205 = vrsqrt.f32 %v1513_v61  ;;  %v4347_v28 = vmul.f32 0.0078125, %v1378_v18  ;;  %v4351_v11 = vadd.f32 %v4338_v13, %v1580_v15  ;;  %v1484_v39 = vmul.f32 %v4341_v19, %v4341_v19 }
 0x4bd   :  { %v1444_v35 = vpop.xlane.xlu1 %1443  ;;  %v2515_v58 = vmul.f32 -1.442695, %v4345_v60 }
 0x4be   :  { %v3200_v41 = vpop.eup %3199  ;;  %v1468_v43 = vmul.f32 0.0078125, %v1444_v35  ;;  %v2514_v4 = vmul.f32 -1.442695, %v4351_v11  ;;  %v1483_v51 = vmul.f32 %v4347_v28, %v4347_v28 }
 0x4bf   :  { %v1442_v37 = vpop.xlane.xlu0 %1441  ;;  %3207 = vpow2.f32 %v2515_v58  ;;  %v1560_v32 = vmul.f32 %v3200_v41, %v1544_v25 }
 0x4c0   :  { %v3202_v48 = vpop.eup %3201  ;;  %v1500_v53 = vsub.f32 %v1468_v43, %v1484_v39  ;;  %v1467_v31 = vmul.f32 0.0078125, %v1442_v37  ;;  %3209 = vpow2.f32 %v2514_v4 }
 0x4c1   :  { %v1559_v56 = vmul.f32 %v3202_v48, %v1543_v57  ;;  %v1583_v59 = vmul.f32 %v4331_v42, %v1560_v32 }
 0x4c2   :  { %v1516_v52 = vadd.f32 0.001, %v1500_v53  ;;  %v1499_v0 = vsub.f32 %v1467_v31, %v1483_v51  ;;  %v1384_v40 = vpop.xlane.xlu1 %1383  ;;  %v1548_v53 = vsub.f32 %v4266_v47, %v4341_v19 }
 0x4c3   :  { %v4362_v3 = vmul.f32 0.0078125, %v1384_v40  ;;  %v1582_v12 = vmul.f32 %v4331_v42, %v1559_v56  ;;  %v4366_v1 = vadd.f32 %v4338_v13, %v1583_v59 }
 0x4c4   :  { %3211 = vrsqrt.f32 %v1516_v52  ;;  %v1515_v29 = vadd.f32 0.001, %v1499_v0  ;;  %v1382_v2 = vpop.xlane.xlu0 %1381 }
 0x4c5   :  { %v4368_v62 = vmul.f32 0.0078125, %v1382_v2  ;;  %v4371_v54 = vadd.f32 %v4338_v13, %v1582_v12  ;;  %v2517_v6 = vmul.f32 -1.442695, %v4366_v1  ;;  %v1486_v33 = vmul.f32 %v4362_v3, %v4362_v3 }
 0x4c6   :  { %3213 = vrsqrt.f32 %v1515_v29  ;;  %v1448_v10 = vpop.xlane.xlu1 %1447  ;;  %v1547_v12 = vsub.f32 %v4269_v38, %v4347_v28 }
 0x4c7   :  { %v3204_v7 = vpop.eup %3203  ;;  %v1470_v22 = vmul.f32 0.0078125, %v1448_v10  ;;  %v2516_v26 = vmul.f32 -1.442695, %v4371_v54  ;;  %3215 = vpow2.f32 %v2517_v6  ;;  %v1485_v23 = vmul.f32 %v4368_v62, %v4368_v62 }
 0x4c8   :  { %v1446_v21 = vpop.xlane.xlu0 %1445  ;;  %v1562_v50 = vmul.f32 %v3204_v7, %v1546_v14 }
 0x4c9   :  { %v3206_v30 = vpop.eup %3205  ;;  %v1502_v44 = vsub.f32 %v1470_v22, %v1486_v33  ;;  %v1469_v20 = vmul.f32 0.0078125, %v1446_v21  ;;  %3217 = vpow2.f32 %v2516_v26 }
 0x4ca   :  { %v1388_v16 = vpop.xlane.xlu1 %1387  ;;  %v1561_v36 = vmul.f32 %v3206_v30, %v1545_v34  ;;  %v1585_v46 = vmul.f32 %v4331_v42, %v1562_v50 }
 0x4cb   :  { %v1518_v61 = vadd.f32 0.001, %v1502_v44  ;;  %v1501_v15 = vsub.f32 %v1469_v20, %v1485_v23  ;;  %v4384_v18 = vmul.f32 0.0078125, %v1388_v16 }
 0x4cc   :  { %v3208_v25 = vpop.eup %3207  ;;  %v1386_v27 = vpop.xlane.xlu0 %1385  ;;  %v1584_v45 = vmul.f32 %v4331_v42, %v1561_v36  ;;  %v4388_v35 = vadd.f32 %v4338_v13, %v1585_v46 }
 0x4cd   :  { %3219 = vrsqrt.f32 %v1518_v61  ;;  %v1517_v58 = vadd.f32 0.001, %v1501_v15  ;;  %v3210_v41 = vpop.eup %3209  ;;  %v1488_v39 = vmul.f32 %v4384_v18, %v4384_v18  ;;  %v4392_v43 = vmul.f32 0.0078125, %v1386_v27 }
 0x4ce   :  { %v1452_v57 = vpop.xlane.xlu1 %1451  ;;  %v1668_v37 = vadd.f32 1.0, %v3208_v25  ;;  %v4395_v4 = vadd.f32 %v4338_v13, %v1584_v45  ;;  %v1667_v48 = vadd.f32 1.0, %v3210_v41  ;;  %v2519_v51 = vmul.f32 -1.442695, %v4388_v35 }
 0x4cf   :  { %3221 = vrsqrt.f32 %v1517_v58  ;;  %v1472_v32 = vmul.f32 0.0078125, %v1452_v57  ;;  %v1487_v52 = vmul.f32 %v4392_v43, %v4392_v43  ;;  %v1550_v45 = vsub.f32 %v4276_v5, %v4362_v3 }
 0x4d0   :  { %v1450_v31 = vpop.xlane.xlu0 %1449  ;;  %3223 = vrcp.f32 %v1668_v37  ;;  %v2518_v56 = vmul.f32 -1.442695, %v4395_v4 }
 0x4d1   :  { %v3212_v59 = vpop.eup %3211  ;;  %v1504_v0 = vsub.f32 %v1472_v32, %v1488_v39  ;;  %v1471_v40 = vmul.f32 0.0078125, %v1450_v31  ;;  %3225 = vrcp.f32 %v1667_v48  ;;  %v1549_v48 = vsub.f32 %v4279_v63, %v4368_v62 }
 0x4d2   :  { %v1392_v29 = vpop.xlane.xlu1 %1391  ;;  %3227 = vpow2.f32 %v2518_v56  ;;  %v1564_v2 = vmul.f32 %v3212_v59, %v1548_v53 }
 0x4d3   :  { %v3214_v14 = vpop.eup %3213  ;;  %v1520_v10 = vadd.f32 0.001, %v1504_v0  ;;  %v1503_v47 = vsub.f32 %v1471_v40, %v1487_v52  ;;  %v4405_v19 = vmul.f32 0.0078125, %v1392_v29  ;;  %3229 = vpow2.f32 %v2519_v51 }
 0x4d4   :  { %v1390_v6 = vpop.xlane.xlu0 %1389  ;;  %v1563_v7 = vmul.f32 %v3214_v14, %v1547_v12  ;;  %v1587_v33 = vmul.f32 %v4331_v42, %v1564_v2  ;;  %v3216_v22 = vpop.eup %3215 }
 0x4d5   :  { %3231 = vrsqrt.f32 %v1520_v10  ;;  %v1519_v26 = vadd.f32 0.001, %v1503_v47  ;;  %v4408_v21 = vmul.f32 0.0078125, %v1390_v6  ;;  %v1670_v28 = vadd.f32 1.0, %v3216_v22 }
 0x4d6   :  { %v3218_v34 = vpop.eup %3217  ;;  %v1456_v38 = vpop.xlane.xlu1 %1455  ;;  %v1586_v50 = vmul.f32 %v4331_v42, %v1563_v7  ;;  %v4412_v30 = vadd.f32 %v4338_v13, %v1587_v33  ;;  %v1490_v23 = vmul.f32 %v4405_v19, %v4405_v19 }
 0x4d7   :  { %3233 = vrsqrt.f32 %v1519_v26  ;;  %v1474_v44 = vmul.f32 0.0078125, %v1456_v38  ;;  %v1669_v20 = vadd.f32 1.0, %v3218_v34  ;;  %v1489_v16 = vmul.f32 %v4408_v21, %v4408_v21 }
 0x4d8   :  { %v1454_v36 = vpop.xlane.xlu0 %1453  ;;  %3235 = vrcp.f32 %v1670_v28  ;;  %v4419_v46 = vadd.f32 %v4338_v13, %v1586_v50  ;;  %v2521_v25 = vmul.f32 -1.442695, %v4412_v30 }
 0x4d9   :  { %v1506_v61 = vsub.f32 %v1474_v44, %v1490_v23  ;;  %v1473_v15 = vmul.f32 0.0078125, %v1454_v36  ;;  %3237 = vrcp.f32 %v1669_v20 }
 0x4da   :  { %v3220_v27 = vpop.eup %3219  ;;  %v1396_v58 = vpop.xlane.xlu1 %1395  ;;  %v2520_v41 = vmul.f32 -1.442695, %v4419_v46  ;;  %3239 = vpow2.f32 %v2521_v25 }
 0x4db   :  { %v1522_v39 = vadd.f32 0.001, %v1506_v61  ;;  %v1505_v57 = vsub.f32 %v1473_v15, %v1489_v16  ;;  %v4425_v37 = vmul.f32 0.0078125, %v1396_v58  ;;  %v1566_v53 = vmul.f32 %v3220_v27, %v1550_v45 }
 0x4dc   :  { %v3222_v32 = vpop.eup %3221  ;;  %v1394_v51 = vpop.xlane.xlu0 %1393  ;;  %3241 = vpow2.f32 %v2520_v41  ;;  %v1554_v41 = vsub.f32 %v4296_v24, %v4405_v19 }
 0x4dd   :  { %v3224_v31 = vpop.eup %3223  ;;  %3243 = vrsqrt.f32 %v1522_v39  ;;  %v1521_v56 = vadd.f32 0.001, %v1505_v57  ;;  %v4429_v5 = vmul.f32 0.0078125, %v1394_v51  ;;  %v1565_v52 = vmul.f32 %v3222_v32, %v1549_v48 }
 0x4de   :  { %v3226_v59 = vpop.eup %3225  ;;  %v1460_v3 = vpop.xlane.xlu1 %1459  ;;  %v1589_v0 = vmul.f32 %v4331_v42, %v1566_v53  ;;  %v1492_v12 = vmul.f32 %v4425_v37, %v4425_v37  ;;  %v1716_v10 = vmul.f32 %v3224_v31, %v4345_v60  ;;  %v1551_v60 = vsub.f32 %v4288_v49, %v4392_v43 }
 0x4df   :  { %v3228_v40 = vpop.eup %3227  ;;  %3245 = vrsqrt.f32 %v1521_v56  ;;  %v1476_v29 = vmul.f32 0.0078125, %v1460_v3  ;;  %v1715_v63 = vmul.f32 %v3226_v59, %v4351_v11  ;;  %v1491_v2 = vmul.f32 %v4429_v5, %v4429_v5 }
 0x4e0   :  { %v3230_v62 = vpop.eup %3229  ;;  %v1458_v14 = vpop.xlane.xlu0 %1457  ;;  %v1671_v47 = vadd.f32 1.0, %v3228_v40  ;;  %v1588_v6 = vmul.f32 %v4331_v42, %v1565_v52  ;;  %v4440_v26 = vadd.f32 %v4338_v13, %v1589_v0  ;;  %v1552_v11 = vsub.f32 %v4286_v9, %v4384_v18 }
 0x4e1   :  { %v1508_v7 = vsub.f32 %v1476_v29, %v1492_v12  ;;  %v1475_v33 = vmul.f32 0.0078125, %v1458_v14  ;;  %2885 = vmatprep.mubr.f32.mxu1 %v1715_v63  ;;  %v1672_v22 = vadd.f32 1.0, %v3230_v62  ;;  %v1555_v62 = vsub.f32 %v4308_v17, %v4429_v5 }
 0x4e2   :  { %v3232_v34 = vpop.eup %3231  ;;  %2886 = vmatmul.mubr.f32.vlgmr.msra.gmra.mxu1 %v1716_v10  ;;  %3247 = vrcp.f32 %v1671_v47  ;;  %v4445_v38 = vadd.f32 %v4338_v13, %v1588_v6  ;;  %v2523_v20 = vmul.f32 -1.442695, %v4440_v26 }
 0x4e3   :  { %v1524_v28 = vadd.f32 0.001, %v1508_v7  ;;  %v1507_v50 = vsub.f32 %v1475_v33, %v1491_v2  ;;  %3249 = vrcp.f32 %v1672_v22  ;;  %v1568_v16 = vmul.f32 %v3232_v34, %v1552_v11 }
 0x4e4   :  { %v3234_v23 = vpop.eup %3233  ;;  %v2522_v44 = vmul.f32 -1.442695, %v4445_v38 }
 0x4e5   :  { %v3236_v36 = vpop.eup %3235  ;;  %3251 = vrsqrt.f32 %v1524_v28  ;;  %v1523_v9 = vadd.f32 0.001, %v1507_v50  ;;  %v1567_v18 = vmul.f32 %v3234_v23, %v1551_v60  ;;  %v1591_v15 = vmul.f32 %v4331_v42, %v1568_v16 }
 0x4e6   :  { %v3238_v61 = vpop.eup %3237  ;;  %3253 = vpow2.f32 %v2522_v44  ;;  %v1718_v27 = vmul.f32 %v3236_v36, %v4366_v1  ;;  %v1553_v1 = vsub.f32 %v4298_v55, %v4408_v21  ;;  %v1556_v21 = vsub.f32 %v4306_v8, %v4425_v37 }
 0x4e7   :  { %3255 = vrsqrt.f32 %v1523_v9  ;;  %v1717_v49 = vmul.f32 %v3238_v61, %v4371_v54  ;;  %v1590_v43 = vmul.f32 %v4331_v42, %v1567_v18  ;;  %v3240_v25 = vpop.eup %3239  ;;  %v4456_v45 = vadd.f32 %v4338_v13, %v1591_v15 }
 0x4e8   :  { %3257 = vpow2.f32 %v2523_v20  ;;  %v1674_v39 = vadd.f32 1.0, %v3240_v25 }
 0x4e9   :  { %v3242_v58 = vpop.eup %3241  ;;  %2888 = vmatprep.mubr.f32.mxu1 %v1717_v49  ;;  %v4461_v57 = vadd.f32 %v4338_v13, %v1590_v43  ;;  %v2525_v48 = vmul.f32 -1.442695, %v4456_v45 }
 0x4ea   :  { %v3244_v32 = vpop.eup %3243  ;;  %2889 = vmatmul.mubr.f32.gmra.mxu1 %v1718_v27  ;;  %v1673_v54 = vadd.f32 1.0, %v3242_v58  ;;  %3259 = vrcp.f32 %v1674_v39 }
 0x4eb   :  { %v2524_v51 = vmul.f32 -1.442695, %v4461_v57  ;;  %v1570_v53 = vmul.f32 %v3244_v32, %v1554_v41 }
 0x4ec   :  { %v3246_v31 = vpop.eup %3245  ;;  %3261 = vrcp.f32 %v1673_v54 }
 0x4ed   :  { %3263 = vpow2.f32 %v2524_v51  ;;  %v1569_v24 = vmul.f32 %v3246_v31, %v1553_v1  ;;  %v1593_v19 = vmul.f32 %v4331_v42, %v1570_v53 }
 0x4ee   :  { %3265 = vpow2.f32 %v2525_v48 }
 0x4ef   :  { %v3248_v56 = vpop.eup %3247  ;;  %v1592_v59 = vmul.f32 %v4331_v42, %v1569_v24  ;;  %v4470_v3 = vadd.f32 %v4338_v13, %v1593_v19 }
 0x4f0   :  { %v3250_v52 = vpop.eup %3249  ;;  %v1719_v55 = vmul.f32 %v3248_v56, %v4395_v4 }
 0x4f1   :  { %v1720_v0 = vmul.f32 %v3250_v52, %v4388_v35  ;;  %v4477_v40 = vadd.f32 %v4338_v13, %v1592_v59  ;;  %v2527_v12 = vmul.f32 -1.442695, %v4470_v3 }
 0x4f2   :  { %v3252_v29 = vpop.eup %3251  ;;  %2891 = vmatprep.mubr.f32.mxu1 %v1719_v55 }
 0x4f3   :  { %v3254_v63 = vpop.eup %3253  ;;  %2892 = vmatmul.mubr.f32.gmra.mxu1 %v1720_v0  ;;  %v2526_v2 = vmul.f32 -1.442695, %v4477_v40  ;;  %3267 = vpow2.f32 %v2527_v12  ;;  %v1572_v4 = vmul.f32 %v3252_v29, %v1556_v21 }
 0x4f4   :  { %v3256_v14 = vpop.eup %3255  ;;  %v1675_v8 = vadd.f32 1.0, %v3254_v63 }
 0x4f5   :  { %v3258_v37 = vpop.eup %3257  ;;  %3269 = vpow2.f32 %v2526_v2  ;;  %v1571_v35 = vmul.f32 %v3256_v14, %v1555_v62  ;;  %v1595_v10 = vmul.f32 %v4331_v42, %v1572_v4 }
 0x4f6   :  { %3271 = vrcp.f32 %v1675_v8  ;;  %v1676_v47 = vadd.f32 1.0, %v3258_v37  ;;  %v2273_v8 = vld [vmem:[#allocation7 + $0x78] sm:$0xff]  ;;  %v2272_v37 = vld [vmem:[#allocation7 + $0x70] sm:$0xff] }
 0x4f7   :  { %v1594_v6 = vmul.f32 %v4331_v42, %v1571_v35  ;;  %v1618_v7 = vadd.f32 %v4338_v13, %v1595_v10  ;;  %v3260_v33 = vpop.eup %3259  ;;  %2909 = vmatprep.subr.mxu0 %v2273_v8  ;;  %2965 = vmatprep.subr.mxu1 %v2273_v8  ;;  %v2271_v10 = vld [vmem:[#allocation7 + $0x68] sm:$0xff] }
 0x4f8   :  { %3273 = vrcp.f32 %v1676_v47  ;;  %v1722_v28 = vmul.f32 %v3260_v33, %v4412_v30  ;;  %2910 = vmatpush3.msra.mxu0 %v2273_v8  ;;  %2981 = vmatpush3.msra.mxu1 %v2273_v8  ;;  %v2270_v47 = vld [vmem:[#allocation7 + $0x60] sm:$0xff] }
 0x4f9   :  { %v3262_v17 = vpop.eup %3261  ;;  %v1617_v5 = vadd.f32 %v4338_v13, %v1594_v6  ;;  %v2529_v22 = vmul.f32 -1.442695, %v1618_v7  ;;  %2911 = vmatprep.subr.mxu0 %v2272_v37  ;;  %2966 = vmatprep.subr.mxu1 %v2272_v37 }
 0x4fa   :  { %v3264_v34 = vpop.eup %3263  ;;  %v1721_v11 = vmul.f32 %v3262_v17, %v4419_v46  ;;  %2912 = vmatpush3.msra.mxu0 %v2272_v37  ;;  %2982 = vmatpush3.msra.mxu1 %v2272_v37  ;;  %v2269_v17 = vld [vmem:[#allocation7 + $0x58] sm:$0xff] }
 0x4fb   :  { %v3266_v60 = vpop.eup %3265  ;;  %v1677_v50 = vadd.f32 1.0, %v3264_v34  ;;  %v2528_v23 = vmul.f32 -1.442695, %v1617_v5  ;;  %3275 = vpow2.f32 %v2529_v22  ;;  %2913 = vmatprep.subr.mxu0 %v2271_v10  ;;  %2967 = vmatprep.subr.mxu1 %v2271_v10  ;;  %v2268_v22 = vld [vmem:[#allocation7 + $0x50] sm:$0xff] }
 0x4fc   :  { %2894 = vmatprep.mubr.f32.mxu1 %v1721_v11  ;;  %v1678_v44 = vadd.f32 1.0, %v3266_v60  ;;  %2914 = vmatpush3.msra.mxu0 %v2271_v10  ;;  %v2267_v11 = vld [vmem:[#allocation7 + $0x48] sm:$0xff]  ;;  %v2266_v60 = vld [vmem:[#allocation7 + $0x40] sm:$0xff] }
 0x4fd   :  { %2895 = vmatmul.mubr.f32.gmra.mxu1 %v1722_v28  ;;  %3277 = vrcp.f32 %v1677_v50  ;;  %2915 = vmatprep.subr.mxu0 %v2270_v47  ;;  %v2265_v50 = vld [vmem:[#allocation7 + $0x38] sm:$0xff] }
 0x4fe   :  { %3279 = vrcp.f32 %v1678_v44  ;;  %2916 = vmatpush3.msra.mxu0 %v2270_v47  ;;  %2983 = vmatpush3.msra.mxu1 %v2271_v10 }
 0x4ff   :  { %3281 = vpow2.f32 %v2528_v23  ;;  %2968 = vmatprep.subr.mxu1 %v2270_v47  ;;  %2917 = vmatprep.subr.mxu0 %v2269_v17  ;;  %v2264_v23 = vld [vmem:[#allocation7 + $0x30] sm:$0xff] }
 0x500   :  { %v3268_v42 = vpop.eup %3267  ;;  %2918 = vmatpush3.msra.mxu0 %v2269_v17  ;;  %2984 = vmatpush3.msra.mxu1 %v2270_v47 }
 0x501   :  { %v1680_v20 = vadd.f32 1.0, %v3268_v42  ;;  %2919 = vmatprep.subr.mxu0 %v2268_v22  ;;  %2969 = vmatprep.subr.mxu1 %v2269_v17  ;;  %v2263_v42 = vld [vmem:[#allocation7 + $0x28] sm:$0xff] }
 0x502   :  { %v3270_v16 = vpop.eup %3269  ;;  %2920 = vmatpush3.msra.mxu0 %v2268_v22  ;;  %2985 = vmatpush3.msra.mxu1 %v2269_v17 }
 0x503   :  { %v3272_v13 = vpop.eup %3271  ;;  %v1679_v36 = vadd.f32 1.0, %v3270_v16  ;;  %3283 = vrcp.f32 %v1680_v20  ;;  %2921 = vmatprep.subr.mxu0 %v2267_v11  ;;  %2970 = vmatprep.subr.mxu1 %v2268_v22  ;;  %v2262_v16 = vld [vmem:[#allocation7 + $0x20] sm:$0xff] }
 0x504   :  { %v1723_v9 = vmul.f32 %v3272_v13, %v4445_v38  ;;  %2922 = vmatpush3.msra.mxu0 %v2267_v11  ;;  %2986 = vmatpush3.msra.mxu1 %v2268_v22  ;;  %v2261_v13 = vld [vmem:[#allocation7 + $0x18] sm:$0xff] }
 0x505   :  { %v3274_v46 = vpop.eup %3273  ;;  %3285 = vrcp.f32 %v1679_v36  ;;  %2923 = vmatprep.subr.mxu0 %v2266_v60  ;;  %2971 = vmatprep.subr.mxu1 %v2267_v11 }
 0x506   :  { %2897 = vmatprep.mubr.f32.mxu1 %v1723_v9  ;;  %v1724_v30 = vmul.f32 %v3274_v46, %v4440_v26  ;;  %2924 = vmatpush3.msra.mxu0 %v2266_v60  ;;  %v2260_v9 = vld [vmem:[#allocation7 + $0x10] sm:$0xff]  ;;  %v2259_v46 = vld [vmem:[#allocation7 + $0x8] sm:$0xff] }
 0x507   :  { %2925 = vmatprep.subr.mxu0 %v2265_v50  ;;  %2987 = vmatpush3.msra.mxu1 %v2267_v11 }
 0x508   :  { %v3276_v18 = vpop.eup %3275  ;;  %2898 = vmatmul.mubr.f32.gmra.mxu1 %v1724_v30  ;;  %2926 = vmatpush3.msra.mxu0 %v2265_v50  ;;  %v2258_v30 = vld [vmem:[#allocation7] sm:$0xff] }
 0x509   :  { %v1682_v15 = vadd.f32 1.0, %v3276_v18  ;;  %2927 = vmatprep.subr.mxu0 %v2264_v23  ;;  %2972 = vmatprep.subr.mxu1 %v2266_v60 }
 0x50a   :  { %v3278_v61 = vpop.eup %3277  ;;  %2928 = vmatpush3.msra.mxu0 %v2264_v23  ;;  %2988 = vmatpush3.msra.mxu1 %v2266_v60 }
 0x50b   :  { %v3280_v49 = vpop.eup %3279  ;;  %v1725_v43 = vmul.f32 %v3278_v61, %v4461_v57  ;;  %3287 = vrcp.f32 %v1682_v15  ;;  %2929 = vmatprep.subr.mxu0 %v2263_v42  ;;  %2973 = vmatprep.subr.mxu1 %v2265_v50 }
 0x50c   :  { %v3282_v25 = vpop.eup %3281  ;;  %v1726_v27 = vmul.f32 %v3280_v49, %v4456_v45  ;;  %2930 = vmatpush3.msra.mxu0 %v2263_v42  ;;  %2989 = vmatpush3.msra.mxu1 %v2265_v50 }
 0x50d   :  { %2900 = vmatprep.mubr.f32.mxu1 %v1725_v43  ;;  %v1681_v58 = vadd.f32 1.0, %v3282_v25  ;;  %2931 = vmatprep.subr.mxu0 %v2262_v16 }
 0x50e   :  { %2901 = vmatmul.mubr.f32.gmra.mxu1 %v1726_v27  ;;  %2932 = vmatpush3.msra.mxu0 %v2262_v16 }
 0x50f   :  { %3289 = vrcp.f32 %v1681_v58  ;;  %2933 = vmatprep.subr.mxu0 %v2261_v13  ;;  %2974 = vmatprep.subr.mxu1 %v2264_v23 }
 0x510   :  { %v3284_v38 = vpop.eup %3283  ;;  %2934 = vmatpush3.msra.mxu0 %v2261_v13  ;;  %2990 = vmatpush3.msra.mxu1 %v2264_v23 }
 0x511   :  { %v1728_v26 = vmul.f32 %v3284_v38, %v4470_v3  ;;  %2935 = vmatprep.subr.mxu0 %v2260_v9  ;;  %2975 = vmatprep.subr.mxu1 %v2263_v42 }
 0x512   :  { %v3286_v41 = vpop.eup %3285  ;;  %2936 = vmatpush3.msra.mxu0 %v2260_v9  ;;  %2991 = vmatpush3.msra.mxu1 %v2263_v42 }
 0x513   :  { %v1727_v39 = vmul.f32 %v3286_v41, %v4477_v40  ;;  %2937 = vmatprep.subr.mxu0 %v2259_v46  ;;  %2976 = vmatprep.subr.mxu1 %v2262_v16 }
 0x514   :  { %2938 = vmatpush3.msra.mxu0 %v2259_v46  ;;  %2992 = vmatpush3.msra.mxu1 %v2262_v16 }
 0x515   :  { %2903 = vmatprep.mubr.f32.mxu1 %v1727_v39  ;;  %2939 = vmatprep.subr.mxu0 %v2258_v30 }
 0x516   :  { %2904 = vmatmul.mubr.f32.gmra.mxu1 %v1728_v26  ;;  %2940 = vmatpush3.msra.mxu0 %v2258_v30 }
 0x517   :  { %2977 = vmatprep.subr.mxu1 %v2261_v13 }
 0x518   :  { %v3288_v32 = vpop.eup %3287  ;;  %2993 = vmatpush3.msra.mxu1 %v2261_v13 }
 0x519   :  { %v1730_v57 = vmul.f32 %v3288_v32, %v1618_v7  ;;  %2978 = vmatprep.subr.mxu1 %v2260_v9 }
 0x51a   :  { %2994 = vmatpush3.msra.mxu1 %v2260_v9 }
 0x51b   :  { %2979 = vmatprep.subr.mxu1 %v2259_v46 }
 0x51c   :  { %v3290_v54 = vpop.eup %3289  ;;  %2995 = vmatpush3.msra.mxu1 %v2259_v46 }
 0x51d   :  { %v1729_v48 = vmul.f32 %v3290_v54, %v1617_v5  ;;  %2980 = vmatprep.subr.mxu1 %v2258_v30 }
 0x51e   :  { %2996 = vmatpush3.msra.mxu1 %v2258_v30 }
 0x51f   :  { %2906 = vmatprep.mubr.f32.mxu1 %v1729_v48 }
 0x520   :  { %2907 = vmatmul.mubr.f32.gmra.mxu1 %v1730_v57 }
 0x5a2   :  { %v4495_v45 = vpop.f32.mrf.mxu1 }
 0x5a3   :  { %1894 = vadd.xlane.f32.xlu1 %v4495_v45  ;;  %v1941_v51 = vmul.f32 %v4495_v45, %v4495_v45 }
 0x5a4   :  { %v4498_v1 = vpop.f32.mrf.mxu1 }
 0x5a5   :  { %1892 = vadd.xlane.f32.xlu0 %v4498_v1  ;;  %v1940_v53 = vmul.f32 %v4498_v1, %v4498_v1 }
 0x5a7   :  { %1958 = vadd.xlane.f32.xlu1 %v1941_v51 }
 0x5a9   :  { %1956 = vadd.xlane.f32.xlu0 %v1940_v53 }
 0x5aa   :  { %v4505_v31 = vpop.f32.mrf.mxu1 }
 0x5ab   :  { %1898 = vadd.xlane.f32.xlu1 %v4505_v31  ;;  %v1943_v19 = vmul.f32 %v4505_v31, %v4505_v31 }
 0x5ac   :  { %v4508_v24 = vpop.f32.mrf.mxu1 }
 0x5ad   :  { %1896 = vadd.xlane.f32.xlu0 %v4508_v24  ;;  %v1942_v56 = vmul.f32 %v4508_v24, %v4508_v24 }
 0x5af   :  { %1962 = vadd.xlane.f32.xlu1 %v1943_v19 }
 0x5b1   :  { %1960 = vadd.xlane.f32.xlu0 %v1942_v56 }
 0x5b3   :  { %v4515_v59 = vpop.f32.mrf.mxu1 }
 0x5b4   :  { %1902 = vadd.xlane.f32.xlu1 %v4515_v59  ;;  %v1945_v52 = vmul.f32 %v4515_v59, %v4515_v59 }
 0x5b5   :  { %v4518_v3 = vpop.f32.mrf.mxu1 }
 0x5b6   :  { %1900 = vadd.xlane.f32.xlu0 %v4518_v3  ;;  %v1944_v55 = vmul.f32 %v4518_v3, %v4518_v3 }
 0x5b8   :  { %1966 = vadd.xlane.f32.xlu1 %v1945_v52 }
 0x5ba   :  { %1964 = vadd.xlane.f32.xlu0 %v1944_v55 }
 0x5bd   :  { %v4525_v21 = vpop.f32.mrf.mxu1 }
 0x5be   :  { %1906 = vadd.xlane.f32.xlu1 %v4525_v21  ;;  %v1947_v40 = vmul.f32 %v4525_v21, %v4525_v21 }
 0x5bf   :  { %v4528_v0 = vpop.f32.mrf.mxu1 }
 0x5c0   :  { %1904 = vadd.xlane.f32.xlu0 %v4528_v0  ;;  %v1946_v12 = vmul.f32 %v4528_v0, %v4528_v0 }
 0x5c2   :  { %1970 = vadd.xlane.f32.xlu1 %v1947_v40 }
 0x5c4   :  { %1968 = vadd.xlane.f32.xlu0 %v1946_v12 }
 0x5c8   :  { %v4535_v29 = vpop.f32.mrf.mxu1 }
 0x5c9   :  { %1910 = vadd.xlane.f32.xlu0 %v4535_v29  ;;  %v1949_v62 = vmul.f32 %v4535_v29, %v4535_v29 }
 0x5ca   :  { %v4538_v63 = vpop.f32.mrf.mxu1 }
 0x5cb   :  { %v1948_v4 = vmul.f32 %v4538_v63, %v4538_v63 }
 0x5cd   :  { %1908 = vadd.xlane.f32.xlu0 %v4538_v63 }
 0x5ce   :  { %v4543_v2 = vpop.f32.mrf.mxu1 }
 0x5cf   :  { %v1951_v34 = vmul.f32 %v4543_v2, %v4543_v2 }
 0x5d0   :  { %v4547_v14 = vpop.f32.mrf.mxu1 }
 0x5d1   :  { %1974 = vadd.xlane.f32.xlu0 %v1949_v62  ;;  %v1950_v33 = vmul.f32 %v4547_v14, %v4547_v14 }
 0x5d5   :  { %1972 = vadd.xlane.f32.xlu0 %v1948_v4 }
 0x5d6   :  { %v4549_v35 = vpop.f32.mrf.mxu1 }
 0x5d7   :  { %1918 = vadd.xlane.f32.xlu1 %v4549_v35  ;;  %v1953_v7 = vmul.f32 %v4549_v35, %v4549_v35 }
 0x5d8   :  { %v4553_v6 = vpop.f32.mrf.mxu1 }
 0x5d9   :  { %1914 = vadd.xlane.f32.xlu0 %v4543_v2  ;;  %v1952_v5 = vmul.f32 %v4553_v6, %v4553_v6 }
 0x5db   :  { %1916 = vadd.xlane.f32.xlu1 %v4553_v6 }
 0x5dd   :  { %1912 = vadd.xlane.f32.xlu0 %v4547_v14 }
 0x5df   :  { %1982 = vadd.xlane.f32.xlu1 %v1953_v7 }
 0x5e0   :  { %v4565_v28 = vpop.f32.mrf.mxu1 }
 0x5e1   :  { %1976 = vadd.xlane.f32.xlu0 %v1950_v33  ;;  %v1955_v36 = vmul.f32 %v4565_v28, %v4565_v28 }
 0x5e2   :  { %v4568_v44 = vpop.f32.mrf.mxu1 }
 0x5e3   :  { %1980 = vadd.xlane.f32.xlu1 %v1952_v5  ;;  %v1954_v20 = vmul.f32 %v4568_v44, %v4568_v44 }
 0x5e5   :  { %1978 = vadd.xlane.f32.xlu0 %v1951_v34 }
 0x5e7   :  { %1922 = vadd.xlane.f32.xlu1 %v4565_v28 }
 0x5eb   :  { %1920 = vadd.xlane.f32.xlu1 %v4568_v44 }
 0x5ef   :  { %1984 = vadd.xlane.f32.xlu1 %v1954_v20  ;;  %v4591_v20 = vld [vmem:[%s4762_s11] ss:$0 sm:$0xff] }
 0x5f3   :  { %1986 = vadd.xlane.f32.xlu1 %v1955_v36 }
 0x62c   :  { %v1895_v18 = vpop.xlane.xlu1 %1894 }
 0x62d   :  { %v1925_v61 = vmul.f32 0.0078125, %v1895_v18 }
 0x62e   :  { %v1893_v15 = vpop.xlane.xlu0 %1892 }
 0x62f   :  { %v1924_v49 = vmul.f32 0.0078125, %v1893_v15  ;;  %v2005_v25 = vmul.f32 %v1925_v61, %v1925_v61  ;;  %v2069_v34 = vsub.f32 %v4495_v45, %v1925_v61  ;;  %v4597_v45 = vld [vmem:[%s4763_s12] ss:$0 sm:$0xff] }
 0x630   :  { %v1959_v43 = vpop.xlane.xlu1 %1958 }
 0x631   :  { %v1989_v27 = vmul.f32 0.0078125, %v1959_v43  ;;  %v2004_v38 = vmul.f32 %v1924_v49, %v1924_v49  ;;  %v2068_v16 = vsub.f32 %v4498_v1, %v1924_v49 }
 0x632   :  { %v1957_v58 = vpop.xlane.xlu0 %1956 }
 0x633   :  { %v2021_v41 = vsub.f32 %v1989_v27, %v2005_v25  ;;  %v1988_v39 = vmul.f32 0.0078125, %v1957_v58 }
 0x634   :  { %v1899_v26 = vpop.xlane.xlu1 %1898 }
 0x635   :  { %v2037_v32 = vadd.f32 0.001, %v2021_v41  ;;  %v2020_v54 = vsub.f32 %v1988_v39, %v2004_v38  ;;  %v1927_v48 = vmul.f32 0.0078125, %v1899_v26 }
 0x636   :  { %v1897_v57 = vpop.xlane.xlu0 %1896 }
 0x637   :  { %3291 = vrsqrt.f32 %v2037_v32  ;;  %v2036_v51 = vadd.f32 0.001, %v2020_v54  ;;  %v4575_v53 = vmul.f32 0.0078125, %v1897_v57  ;;  %v2007_v56 = vmul.f32 %v1927_v48, %v1927_v48 }
 0x638   :  { %v1963_v19 = vpop.xlane.xlu1 %1962  ;;  %v2071_v58 = vsub.f32 %v4505_v31, %v1927_v48 }
 0x639   :  { %3293 = vrsqrt.f32 %v2036_v51  ;;  %v1991_v52 = vmul.f32 0.0078125, %v1963_v19  ;;  %v2006_v40 = vmul.f32 %v4575_v53, %v4575_v53  ;;  %v2070_v57 = vsub.f32 %v4508_v24, %v4575_v53 }
 0x63a   :  { %v1961_v55 = vpop.xlane.xlu0 %1960 }
 0x63b   :  { %v2023_v12 = vsub.f32 %v1991_v52, %v2007_v56  ;;  %v1990_v62 = vmul.f32 0.0078125, %v1961_v55 }
 0x63d   :  { %v2039_v4 = vadd.f32 0.001, %v2023_v12  ;;  %v2022_v8 = vsub.f32 %v1990_v62, %v2006_v40  ;;  %v1903_v37 = vpop.xlane.xlu1 %1902 }
 0x63e   :  { %v4579_v10 = vmul.f32 0.0078125, %v1903_v37 }
 0x63f   :  { %3295 = vrsqrt.f32 %v2039_v4  ;;  %v2038_v47 = vadd.f32 0.001, %v2022_v8  ;;  %v1901_v7 = vpop.xlane.xlu0 %1900 }
 0x640   :  { %v4581_v33 = vmul.f32 0.0078125, %v1901_v7  ;;  %v2009_v5 = vmul.f32 %v4579_v10, %v4579_v10 }
 0x641   :  { %3297 = vrsqrt.f32 %v2038_v47  ;;  %v1967_v17 = vpop.xlane.xlu1 %1966 }
 0x642   :  { %v1993_v22 = vmul.f32 0.0078125, %v1967_v17  ;;  %v2008_v50 = vmul.f32 %v4581_v33, %v4581_v33  ;;  %v2073_v17 = vsub.f32 %v4515_v59, %v4579_v10 }
 0x643   :  { %v1965_v11 = vpop.xlane.xlu0 %1964 }
 0x644   :  { %v3292_v60 = vpop.eup %3291  ;;  %v2025_v23 = vsub.f32 %v1993_v22, %v2009_v5  ;;  %v1992_v42 = vmul.f32 0.0078125, %v1965_v11 }
 0x645   :  { %v2085_v13 = vmul.f32 %v3292_v60, %v2069_v34  ;;  %v2072_v34 = vsub.f32 %v4518_v3, %v4581_v33 }
 0x646   :  { %v3294_v36 = vpop.eup %3293  ;;  %v2041_v9 = vadd.f32 0.001, %v2025_v23  ;;  %v2024_v46 = vsub.f32 %v1992_v42, %v2008_v50 }
 0x647   :  { %v1907_v30 = vpop.xlane.xlu1 %1906  ;;  %v2084_v18 = vmul.f32 %v3294_v36, %v2068_v16  ;;  %v2108_v61 = vmul.f32 %v4591_v20, %v2085_v13 }
 0x648   :  { %3299 = vrsqrt.f32 %v2041_v9  ;;  %v2040_v15 = vadd.f32 0.001, %v2024_v46  ;;  %v4600_v43 = vmul.f32 0.0078125, %v1907_v30 }
 0x649   :  { %v1905_v25 = vpop.xlane.xlu0 %1904  ;;  %v2107_v1 = vmul.f32 %v4591_v20, %v2084_v18  ;;  %v4604_v49 = vadd.f32 %v4597_v45, %v2108_v61 }
 0x64a   :  { %3301 = vrsqrt.f32 %v2040_v15  ;;  %v4606_v27 = vmul.f32 0.0078125, %v1905_v25  ;;  %v2011_v32 = vmul.f32 %v4600_v43, %v4600_v43 }
 0x64b   :  { %v1971_v38 = vpop.xlane.xlu1 %1970  ;;  %v4610_v41 = vadd.f32 %v4597_v45, %v2107_v1  ;;  %v2533_v39 = vmul.f32 -1.442695, %v4604_v49  ;;  %v2075_v1 = vsub.f32 %v4525_v21, %v4600_v43 }
 0x64c   :  { %v3296_v26 = vpop.eup %3295  ;;  %v1995_v54 = vmul.f32 0.0078125, %v1971_v38  ;;  %v2010_v48 = vmul.f32 %v4606_v27, %v4606_v27 }
 0x64d   :  { %v1969_v51 = vpop.xlane.xlu0 %1968  ;;  %v2532_v19 = vmul.f32 -1.442695, %v4610_v41  ;;  %3303 = vpow2.f32 %v2533_v39  ;;  %v2087_v56 = vmul.f32 %v3296_v26, %v2071_v58 }
 0x64e   :  { %v3298_v31 = vpop.eup %3297  ;;  %v2027_v52 = vsub.f32 %v1995_v54, %v2011_v32  ;;  %v1994_v55 = vmul.f32 0.0078125, %v1969_v51 }
 0x64f   :  { %3305 = vpow2.f32 %v2532_v19  ;;  %v2086_v40 = vmul.f32 %v3298_v31, %v2070_v57  ;;  %v2110_v12 = vmul.f32 %v4591_v20, %v2087_v56  ;;  %v2074_v57 = vsub.f32 %v4528_v0, %v4606_v27 }
 0x650   :  { %v2043_v62 = vadd.f32 0.001, %v2027_v52  ;;  %v2026_v4 = vsub.f32 %v1994_v55, %v2010_v48 }
 0x651   :  { %v2109_v8 = vmul.f32 %v4591_v20, %v2086_v40  ;;  %v4623_v24 = vadd.f32 %v4597_v45, %v2110_v12 }
 0x652   :  { %3307 = vrsqrt.f32 %v2043_v62  ;;  %v2042_v53 = vadd.f32 0.001, %v2026_v4  ;;  %v1911_v37 = vpop.xlane.xlu0 %1910 }
 0x653   :  { %v4626_v47 = vadd.f32 %v4597_v45, %v2109_v8  ;;  %v2535_v7 = vmul.f32 -1.442695, %v4623_v24  ;;  %v4634_v23 = vmul.f32 0.0078125, %v1911_v37 }
 0x654   :  { %3309 = vrsqrt.f32 %v2042_v53 }
 0x655   :  { %v3300_v5 = vpop.eup %3299  ;;  %v2534_v22 = vmul.f32 -1.442695, %v4626_v47  ;;  %3311 = vpow2.f32 %v2535_v7  ;;  %v2013_v9 = vmul.f32 %v4634_v23, %v4634_v23 }
 0x656   :  { %v1909_v11 = vpop.xlane.xlu0 %1908  ;;  %v2089_v60 = vmul.f32 %v3300_v5, %v2073_v17 }
 0x657   :  { %v3302_v50 = vpop.eup %3301  ;;  %3313 = vpow2.f32 %v2534_v22  ;;  %v4643_v3 = vmul.f32 0.0078125, %v1909_v11 }
 0x658   :  { %v2088_v42 = vmul.f32 %v3302_v50, %v2072_v34  ;;  %v2112_v16 = vmul.f32 %v4591_v20, %v2089_v60 }
 0x659   :  { %v2012_v26 = vmul.f32 %v4643_v3, %v4643_v3 }
 0x65a   :  { %v3304_v13 = vpop.eup %3303  ;;  %v1975_v36 = vpop.xlane.xlu0 %1974  ;;  %v2111_v59 = vmul.f32 %v4591_v20, %v2088_v42  ;;  %v4639_v10 = vadd.f32 %v4597_v45, %v2112_v16 }
 0x65b   :  { %v1997_v33 = vmul.f32 0.0078125, %v1975_v36  ;;  %v2195_v46 = vadd.f32 1.0, %v3304_v13 }
 0x65c   :  { %v3306_v30 = vpop.eup %3305  ;;  %v4646_v18 = vadd.f32 %v4597_v45, %v2111_v59  ;;  %v2537_v61 = vmul.f32 -1.442695, %v4639_v10 }
 0x65d   :  { %v2029_v15 = vsub.f32 %v1997_v33, %v2013_v9  ;;  %v2194_v25 = vadd.f32 1.0, %v3306_v30  ;;  %3315 = vrcp.f32 %v2195_v46  ;;  %v2077_v46 = vsub.f32 %v4535_v29, %v4634_v23 }
 0x65e   :  { %v1973_v58 = vpop.xlane.xlu0 %1972  ;;  %v2536_v38 = vmul.f32 -1.442695, %v4646_v18  ;;  %3317 = vpow2.f32 %v2537_v61 }
 0x65f   :  { %v3308_v39 = vpop.eup %3307  ;;  %v2045_v32 = vadd.f32 0.001, %v2029_v15  ;;  %v1996_v54 = vmul.f32 0.0078125, %v1973_v58  ;;  %3319 = vrcp.f32 %v2194_v25 }
 0x660   :  { %v1919_v51 = vpop.xlane.xlu1 %1918  ;;  %3321 = vpow2.f32 %v2536_v38  ;;  %v2091_v19 = vmul.f32 %v3308_v39, %v2075_v1 }
 0x661   :  { %v3310_v56 = vpop.eup %3309  ;;  %3323 = vrsqrt.f32 %v2045_v32  ;;  %v2028_v21 = vsub.f32 %v1996_v54, %v2012_v26  ;;  %v4661_v0 = vmul.f32 0.0078125, %v1919_v51 }
 0x662   :  { %v3312_v43 = vpop.eup %3311  ;;  %v1915_v31 = vpop.xlane.xlu0 %1914  ;;  %v2090_v48 = vmul.f32 %v3310_v56, %v2074_v57  ;;  %v2114_v52 = vmul.f32 %v4591_v20, %v2091_v19 }
 0x663   :  { %v2044_v55 = vadd.f32 0.001, %v2028_v21  ;;  %v2197_v62 = vadd.f32 1.0, %v3312_v43  ;;  %v2017_v11 = vmul.f32 %v4661_v0, %v4661_v0  ;;  %v4674_v42 = vmul.f32 0.0078125, %v1915_v31 }
 0x664   :  { %v3314_v40 = vpop.eup %3313  ;;  %v1917_v12 = vpop.xlane.xlu1 %1916  ;;  %v2113_v4 = vmul.f32 %v4591_v20, %v2090_v48  ;;  %v4659_v8 = vadd.f32 %v4597_v45, %v2114_v52  ;;  %v2076_v48 = vsub.f32 %v4538_v63, %v4643_v3 }
 0x665   :  { %3325 = vrsqrt.f32 %v2044_v55  ;;  %v2196_v53 = vadd.f32 1.0, %v3314_v40  ;;  %v4669_v5 = vmul.f32 0.0078125, %v1917_v12  ;;  %v2015_v32 = vmul.f32 %v4674_v42, %v4674_v42 }
 0x666   :  { %v1913_v27 = vpop.xlane.xlu0 %1912  ;;  %v4664_v37 = vadd.f32 %v4597_v45, %v2113_v4  ;;  %v2539_v7 = vmul.f32 -1.442695, %v4659_v8  ;;  %3327 = vrcp.f32 %v2197_v62 }
 0x667   :  { %v4667_v17 = vmul.f32 0.0078125, %v1913_v27  ;;  %3329 = vrcp.f32 %v2196_v53  ;;  %v2016_v30 = vmul.f32 %v4669_v5, %v4669_v5 }
 0x668   :  { %v1983_v22 = vpop.xlane.xlu1 %1982  ;;  %v2538_v34 = vmul.f32 -1.442695, %v4664_v37  ;;  %3331 = vpow2.f32 %v2539_v7 }
 0x669   :  { %v2001_v60 = vmul.f32 0.0078125, %v1983_v22  ;;  %v2014_v36 = vmul.f32 %v4667_v17, %v4667_v17 }
 0x66a   :  { %v3316_v50 = vpop.eup %3315  ;;  %v1977_v16 = vpop.xlane.xlu0 %1976  ;;  %3333 = vpow2.f32 %v2538_v34 }
 0x66b   :  { %v3318_v13 = vpop.eup %3317  ;;  %v2033_v59 = vsub.f32 %v2001_v60, %v2017_v11  ;;  %v1998_v9 = vmul.f32 0.0078125, %v1977_v16  ;;  %v2243_v57 = vmul.f32 %v3316_v50, %v4604_v49 }
 0x66c   :  { %v3320_v33 = vpop.eup %3319  ;;  %v1981_v61 = vpop.xlane.xlu1 %1980  ;;  %v2199_v15 = vadd.f32 1.0, %v3318_v13 }
 0x66d   :  { %v3322_v25 = vpop.eup %3321  ;;  %v2049_v1 = vadd.f32 0.001, %v2033_v59  ;;  %v2030_v58 = vsub.f32 %v1998_v9, %v2014_v36  ;;  %v2000_v38 = vmul.f32 0.0078125, %v1981_v61  ;;  %v2242_v39 = vmul.f32 %v3320_v33, %v4610_v41 }
 0x66e   :  { %v3324_v26 = vpop.eup %3323  ;;  %v1979_v54 = vpop.xlane.xlu0 %1978  ;;  %v2198_v51 = vadd.f32 1.0, %v3322_v25  ;;  %3335 = vrcp.f32 %v2199_v15  ;;  %v2081_v9 = vsub.f32 %v4549_v35, %v4661_v0 }
 0x66f   :  { %3337 = vrsqrt.f32 %v2049_v1  ;;  %v2046_v29 = vadd.f32 0.001, %v2030_v58  ;;  %v2032_v23 = vsub.f32 %v2000_v38, %v2016_v30  ;;  %v1999_v19 = vmul.f32 0.0078125, %v1979_v54  ;;  %2941 = vmatprep.mubr.f32.mxu0 %v2242_v39 }
 0x670   :  { %v1923_v56 = vpop.xlane.xlu1 %1922  ;;  %2942 = vmatmul.mubr.f32.vlgmr.msra.gmra.mxu0 %v2243_v57  ;;  %3339 = vrcp.f32 %v2198_v51  ;;  %v2093_v21 = vmul.f32 %v3324_v26, %v2077_v46  ;;  %v2078_v30 = vsub.f32 %v4547_v14, %v4667_v17  ;;  %v2080_v26 = vsub.f32 %v4553_v6, %v4669_v5 }
 0x671   :  { %3341 = vrsqrt.f32 %v2046_v29  ;;  %v2048_v41 = vadd.f32 0.001, %v2032_v23  ;;  %v2031_v43 = vsub.f32 %v1999_v19, %v2015_v32  ;;  %v4701_v13 = vmul.f32 0.0078125, %v1923_v56 }
 0x672   :  { %v3326_v31 = vpop.eup %3325  ;;  %v2116_v49 = vmul.f32 %v4591_v20, %v2093_v21 }
 0x673   :  { %3343 = vrsqrt.f32 %v2048_v41  ;;  %v2047_v52 = vadd.f32 0.001, %v2031_v43  ;;  %v3328_v55 = vpop.eup %3327  ;;  %v2092_v12 = vmul.f32 %v3326_v31, %v2076_v48  ;;  %v2019_v1 = vmul.f32 %v4701_v13, %v4701_v13 }
 0x674   :  { %v1921_v40 = vpop.xlane.xlu1 %1920  ;;  %v4690_v62 = vadd.f32 %v4597_v45, %v2116_v49  ;;  %v3330_v4 = vpop.eup %3329  ;;  %v2245_v34 = vmul.f32 %v3328_v55, %v4623_v24 }
 0x675   :  { %3345 = vrsqrt.f32 %v2047_v52  ;;  %v4692_v27 = vmul.f32 0.0078125, %v1921_v40  ;;  %v3332_v53 = vpop.eup %3331  ;;  %v2244_v7 = vmul.f32 %v3330_v4, %v4626_v47  ;;  %v2115_v22 = vmul.f32 %v4591_v20, %v2092_v12 }
 0x676   :  { %v2541_v63 = vmul.f32 -1.442695, %v4690_v62  ;;  %v2201_v11 = vadd.f32 1.0, %v3332_v53 }
 0x677   :  { %v3334_v3 = vpop.eup %3333  ;;  %2944 = vmatprep.mubr.f32.mxu0 %v2244_v7  ;;  %v4699_v16 = vadd.f32 %v4597_v45, %v2115_v22  ;;  %v2018_v47 = vmul.f32 %v4692_v27, %v4692_v27  ;;  %v2082_v7 = vsub.f32 %v4568_v44, %v4692_v27 }
 0x678   :  { %v1985_v60 = vpop.xlane.xlu1 %1984  ;;  %v2200_v50 = vadd.f32 1.0, %v3334_v3  ;;  %3347 = vpow2.f32 %v2541_v63  ;;  %2945 = vmatmul.mubr.f32.gmra.mxu0 %v2245_v34 }
 0x679   :  { %v2002_v36 = vmul.f32 0.0078125, %v1985_v60  ;;  %3349 = vrcp.f32 %v2201_v11  ;;  %v2540_v59 = vmul.f32 -1.442695, %v4699_v16 }
 0x67a   :  { %3351 = vrcp.f32 %v2200_v50 }
 0x67b   :  { %v3336_v24 = vpop.eup %3335  ;;  %v2034_v33 = vsub.f32 %v2002_v36, %v2018_v47  ;;  %3353 = vpow2.f32 %v2540_v59 }
 0x67c   :  { %v3338_v46 = vpop.eup %3337  ;;  %v1987_v61 = vpop.xlane.xlu1 %1986  ;;  %v2247_v0 = vmul.f32 %v3336_v24, %v4639_v10 }
 0x67d   :  { %v3340_v15 = vpop.eup %3339  ;;  %v2097_v25 = vmul.f32 %v3338_v46, %v2081_v9  ;;  %v2050_v58 = vadd.f32 0.001, %v2034_v33  ;;  %v2003_v38 = vmul.f32 0.0078125, %v1987_v61 }
 0x67e   :  { %v3342_v39 = vpop.eup %3341  ;;  %v2246_v35 = vmul.f32 %v3340_v15, %v4646_v18  ;;  %v2079_v18 = vsub.f32 %v4543_v2, %v4674_v42 }
 0x67f   :  { %3355 = vrsqrt.f32 %v2050_v58  ;;  %v2035_v32 = vsub.f32 %v2003_v38, %v2019_v1  ;;  %v2094_v14 = vmul.f32 %v3342_v39, %v2078_v30  ;;  %v2120_v17 = vmul.f32 %v4591_v20, %v2097_v25 }
 0x680   :  { %v3344_v54 = vpop.eup %3343  ;;  %2947 = vmatprep.mubr.f32.mxu0 %v2246_v35 }
 0x681   :  { %v2051_v57 = vadd.f32 0.001, %v2035_v32  ;;  %2948 = vmatmul.mubr.f32.gmra.mxu0 %v2247_v0  ;;  %v2117_v51 = vmul.f32 %v4591_v20, %v2094_v14  ;;  %v2096_v29 = vmul.f32 %v3344_v54, %v2080_v26  ;;  %v4719_v23 = vadd.f32 %v4597_v45, %v2120_v17 }
 0x682   :  { %v3346_v6 = vpop.eup %3345 }
 0x683   :  { %3357 = vrsqrt.f32 %v2051_v57  ;;  %v2140_v10 = vadd.f32 %v4597_v45, %v2117_v51  ;;  %v2119_v5 = vmul.f32 %v4591_v20, %v2096_v29  ;;  %v2545_v19 = vmul.f32 -1.442695, %v4719_v23  ;;  %v2548_v57 = vld [vmem:[%s4765_s14] ss:$0 sm:$0xff]  ;;  %s3478_s14 = smov [#allocation8]  }
 0x684   :  { %v2095_v56 = vmul.f32 %v3346_v6, %v2079_v18  ;;  %s2447_s20 = sshll.u32 %s3478_s14, 4  ;;  %s2448_s20 = int_to_ptr.vmem [resolvable:$true] %s2447_s20 }
 0x685   :  { %v3348_v21 = vpop.eup %3347  ;;  %v2542_v41 = vmul.f32 -1.442695, %v2140_v10  ;;  %v2142_v43 = vadd.f32 %v4597_v45, %v2119_v5  ;;  %3359 = vpow2.f32 %v2545_v19  ;;  %s3447_s21 = scalar_lea.vmem %s2448_s20, 2048  ;;  %p3452_p2 = scmp.lt.s32.totalorder %s2448_s20, %s2448_s20 }
 0x686   :  { %v3350_v31 = vpop.eup %3349  ;;  %v2118_v48 = vmul.f32 %v4591_v20, %v2095_v56  ;;  %v2203_v52 = vadd.f32 1.0, %v3348_v21  ;;  %p3448_p1 = scmp.ne.s32.totalorder %s2448_s20, %s3447_s21  ;;  %p3453_p3 = scmp.lt.s32.totalorder %s3447_s21, %s3447_s21 }
 0x687   :  { %v3352_v49 = vpop.eup %3351  ;;  %3361 = vpow2.f32 %v2542_v41  ;;  %v2544_v2 = vmul.f32 -1.442695, %v2142_v43  ;;  %v2249_v12 = vmul.f32 %v3350_v31, %v4659_v8 }
 0x688   :  { %v2248_v42 = vmul.f32 %v3352_v49, %v4664_v37  ;;  %v2141_v55 = vadd.f32 %v4597_v45, %v2118_v48  ;;  %v3354_v40 = vpop.eup %3353  ;;  %v2083_v37 = vsub.f32 %v4565_v28, %v4701_v13  ;;  %p3454_p4 = por %p3453_p3, %p3452_p2 }
 0x689   :  { %3363 = vpow2.f32 %v2544_v2  ;;  %v2202_v4 = vadd.f32 1.0, %v3354_v40 }
 0x68a   :  { %2950 = vmatprep.mubr.f32.mxu0 %v2248_v42  ;;  %v2543_v53 = vmul.f32 -1.442695, %v2141_v55  ;;  %3365 = vrcp.f32 %v2203_v52  ;;  %p3455_p5 = pnand %p3454_p4, %p3448_p1 }
 0x68b   :  { %2951 = vmatmul.mubr.f32.gmra.mxu0 %v2249_v12  ;;  %3367 = vrcp.f32 %v2202_v4 }
 0x68c   :  { %v3356_v22 = vpop.eup %3355  ;;  %3369 = vpow2.f32 %v2543_v53 }
 0x68d   :  { %v2098_v63 = vmul.f32 %v3356_v22, %v2082_v7 }
 0x68f   :  { %v2121_v3 = vmul.f32 %v4591_v20, %v2098_v63 }
 0x690   :  { %v3358_v34 = vpop.eup %3357 }
 0x691   :  { %v2144_v8 = vadd.f32 %v4597_v45, %v2121_v3  ;;  %v2099_v11 = vmul.f32 %v3358_v34, %v2083_v37 }
 0x692   :  { %v3360_v60 = vpop.eup %3359 }
 0x693   :  { %v2546_v50 = vmul.f32 -1.442695, %v2144_v8  ;;  %v2122_v47 = vmul.f32 %v4591_v20, %v2099_v11  ;;  %v2207_v27 = vadd.f32 1.0, %v3360_v60 }
 0x694   :  { %v3362_v44 = vpop.eup %3361 }
 0x695   :  { %v2204_v36 = vadd.f32 1.0, %v3362_v44  ;;  %v2145_v59 = vadd.f32 %v4597_v45, %v2122_v47  ;;  %3371 = vpow2.f32 %v2546_v50 }
 0x696   :  { %v3364_v24 = vpop.eup %3363 }
 0x697   :  { %3373 = vrcp.f32 %v2204_v36  ;;  %v2206_v9 = vadd.f32 1.0, %v3364_v24  ;;  %v2547_v28 = vmul.f32 -1.442695, %v2145_v59  ;;  %v3366_v13 = vpop.eup %3365 }
 0x698   :  { %3375 = vrcp.f32 %v2207_v27  ;;  %v3368_v33 = vpop.eup %3367  ;;  %v2251_v20 = vmul.f32 %v3366_v13, %v4690_v62 }
 0x699   :  { %3377 = vrcp.f32 %v2206_v9  ;;  %v3370_v46 = vpop.eup %3369  ;;  %v2250_v30 = vmul.f32 %v3368_v33, %v4699_v16 }
 0x69a   :  { %3379 = vpow2.f32 %v2547_v28  ;;  %v2205_v61 = vadd.f32 1.0, %v3370_v46 }
 0x69b   :  { %2953 = vmatprep.mubr.f32.mxu0 %v2250_v30 }
 0x69c   :  { %2954 = vmatmul.mubr.f32.gmra.mxu0 %v2251_v20  ;;  %3381 = vrcp.f32 %v2205_v61 }
 0x6a2   :  { %v3372_v45 = vpop.eup %3371 }
 0x6a3   :  { %v2208_v25 = vadd.f32 1.0, %v3372_v45 }
 0x6a4   :  { %v3374_v15 = vpop.eup %3373 }
 0x6a5   :  { %v3376_v1 = vpop.eup %3375  ;;  %v2252_v58 = vmul.f32 %v3374_v15, %v2140_v10  ;;  %3383 = vrcp.f32 %v2208_v25 }
 0x6a6   :  { %v3378_v38 = vpop.eup %3377  ;;  %v2255_v35 = vmul.f32 %v3376_v1, %v4719_v23 }
 0x6a7   :  { %v3380_v39 = vpop.eup %3379  ;;  %2956 = vmatprep.mubr.f32.mxu0 %v2252_v58  ;;  %v2254_v26 = vmul.f32 %v3378_v38, %v2142_v43 }
 0x6a8   :  { %v2209_v16 = vadd.f32 1.0, %v3380_v39 }
 0x6a9   :  { %2959 = vmatprep.mubr.f32.mxu1 %v2254_v26  ;;  %v3382_v0 = vpop.eup %3381 }
 0x6aa   :  { %2960 = vmatmul.mubr.f32.vlgmr.msra.gmra.mxu1 %v2255_v35  ;;  %3385 = vrcp.f32 %v2209_v16  ;;  %v2253_v62 = vmul.f32 %v3382_v0, %v2141_v55 }
 0x6ac   :  { %2957 = vmatmul.mubr.f32.gmra.mxu0 %v2253_v62 }
 0x6b2   :  { %v3384_v32 = vpop.eup %3383 }
 0x6b3   :  { %v2256_v14 = vmul.f32 %v3384_v32, %v2144_v8 }
 0x6b5   :  { %2962 = vmatprep.mubr.f32.mxu1 %v2256_v14 }
 0x6b7   :  { %v3386_v17 = vpop.eup %3385 }
 0x6b8   :  { %v2257_v54 = vmul.f32 %v3386_v17, %v2145_v59 }
 0x6ba   :  { %2963 = vmatmul.mubr.f32.gmra.mxu1 %v2257_v54 }
 0x730   :  { %v2943_v51 = vpop.f32.mrf.mxu0 }
 0x731   :  { %v2353_v29 = vadd.f32 %v2943_v51, %v2548_v57 }
 0x732   :  { %v2347_v23 = vpop.f32.mrf.mxu0 }
 0x733   :  { %2427 = vst [vmem:[#allocation8 + $0x8] sm:$0xff] %v2353_v29  ;;  %v2348_v6 = vadd.f32 %v2548_v57, %v2347_v23 }
 0x735   :  { %2426 = vst [vmem:[#allocation8] sm:$0xff] %v2348_v6 }
 0x738   :  { %v2946_v18 = vpop.f32.mrf.mxu0 }
 0x739   :  { %v2363_v10 = vadd.f32 %v2946_v18, %v2548_v57 }
 0x73a   :  { %v2357_v5 = vpop.f32.mrf.mxu0 }
 0x73b   :  { %2429 = vst [vmem:[#allocation8 + $0x18] sm:$0xff] %v2363_v10  ;;  %v2358_v19 = vadd.f32 %v2548_v57, %v2357_v5 }
 0x73d   :  { %2428 = vst [vmem:[#allocation8 + $0x10] sm:$0xff] %v2358_v19 }
 0x741   :  { %v2949_v56 = vpop.f32.mrf.mxu0 }
 0x742   :  { %v2373_v21 = vadd.f32 %v2949_v56, %v2548_v57 }
 0x743   :  { %v2367_v41 = vpop.f32.mrf.mxu0 }
 0x744   :  { %2431 = vst [vmem:[#allocation8 + $0x28] sm:$0xff] %v2373_v21  ;;  %v2368_v43 = vadd.f32 %v2548_v57, %v2367_v41 }
 0x746   :  { %2430 = vst [vmem:[#allocation8 + $0x20] sm:$0xff] %v2368_v43 }
 0x74b   :  { %v2952_v31 = vpop.f32.mrf.mxu0 }
 0x74c   :  { %v2383_v48 = vadd.f32 %v2952_v31, %v2548_v57 }
 0x74d   :  { %v2377_v49 = vpop.f32.mrf.mxu0 }
 0x74e   :  { %2433 = vst [vmem:[#allocation8 + $0x38] sm:$0xff] %v2383_v48  ;;  %v2378_v52 = vadd.f32 %v2548_v57, %v2377_v49 }
 0x750   :  { %2432 = vst [vmem:[#allocation8 + $0x30] sm:$0xff] %v2378_v52 }
 0x75c   :  { %v2955_v2 = vpop.f32.mrf.mxu0 }
 0x75d   :  { %v2393_v42 = vadd.f32 %v2955_v2, %v2548_v57 }
 0x75e   :  { %v2387_v55 = vpop.f32.mrf.mxu0 }
 0x75f   :  { %2435 = vst [vmem:[#allocation8 + $0x48] sm:$0xff] %v2393_v42  ;;  %v2388_v40 = vadd.f32 %v2548_v57, %v2387_v55 }
 0x761   :  { %2434 = vst [vmem:[#allocation8 + $0x40] sm:$0xff] %v2388_v40 }
 0x76a   :  { %v2961_v12 = vpop.f32.mrf.mxu1 }
 0x76b   :  { %v2413_v4 = vadd.f32 %v2961_v12, %v2548_v57 }
 0x76c   :  { %v2407_v53 = vpop.f32.mrf.mxu1  ;;  %v2958_v7 = vpop.f32.mrf.mxu0 }
 0x76d   :  { %2439 = vst [vmem:[#allocation8 + $0x68] sm:$0xff] %v2413_v4  ;;  %v2408_v22 = vadd.f32 %v2548_v57, %v2407_v53  ;;  %v2403_v63 = vadd.f32 %v2958_v7, %v2548_v57 }
 0x76e   :  { %v2397_v37 = vpop.f32.mrf.mxu0 }
 0x76f   :  { %2438 = vst [vmem:[#allocation8 + $0x60] sm:$0xff] %v2408_v22  ;;  %2437 = vst [vmem:[#allocation8 + $0x58] sm:$0xff] %v2403_v63  ;;  %v2398_v3 = vadd.f32 %v2548_v57, %v2397_v37 }
 0x771   :  { %2436 = vst [vmem:[#allocation8 + $0x50] sm:$0xff] %v2398_v3 }
 0x77a   :  { %v2964_v34 = vpop.f32.mrf.mxu1 }
 0x77b   :  { %v2423_v8 = vadd.f32 %v2964_v34, %v2548_v57 }
 0x77c   :  { %v2417_v11 = vpop.f32.mrf.mxu1 }
 0x77d   :  { %2441 = vst [vmem:[#allocation8 + $0x78] sm:$0xff] %v2423_v8  ;;  %v2418_v60 = vadd.f32 %v2548_v57, %v2417_v11 }
 0x77f   :  { %2440 = vst [vmem:[#allocation8 + $0x70] sm:$0xff] %v2418_v60 }
 0x780   :  { %3458 = shalt.err (!%p3455_p5)
}
 0x781   :  { %2453 = dma.vmem_to_hbm [thread:$0]  %s2448_s20, 2048, %s4766_s15, [#allocation4], %s3475_s23, %s3475_s23, %s3476_s24  }
 0x782   :  { %3471 = dma.done.wait [#allocation4], 2048  }
 0x783   :  { %3472 = vsyncadd [#allocation4], 4294965248 }
 0x784   :  { %2457 = vsyncpa [#allocation3], 1 }
 0x785   :  { %2458 = vsyncpa [#allocation6], 1 }
 0x786   :  { %2459 = vsyncpa [#allocation4], 1 }

</bundles_post_ra>
